<compile_context>
chip_gen: v5e
topology: v5e:2x2
jax: 0.10.0
libtpu: 0.0.40
codegen_flags: <defaults>
</compile_context>

<pallas_src>
import jax
import jax.numpy as jnp
from jax.experimental import pallas as pl
from jax.experimental.pallas import tpu as pltpu

_BN_EPS = 1e-5
_TM_CAP = 4096                     # row-tile cap (multiple of 16 for bf16 sublane packing)
_ROW_BUDGET = 10 * 1024 * 1024     # target for the double-buffered per-row working set


# ---------------------------------------------------------------------------
# Pallas kernels
# ---------------------------------------------------------------------------
def _mm_stats_kernel(p_ref, w_ref, y_ref, s_ref):
    """y = patches @ W (bf16 operands, f32 accumulate) + packed channel stats."""
    acc = jnp.dot(p_ref[...], w_ref[...], preferred_element_type=jnp.float32)
    y_ref[...] = acc.astype(y_ref.dtype)
    # One lane-contiguous (1, 2*C) row: [sum | sum-of-squares].  Single store,
    # reduced in the wrapper -> no cross-iteration accumulator, grid stays
    # fully "parallel".
    s_ref[...] = jnp.concatenate(
        [jnp.sum(acc, axis=0, keepdims=True),
         jnp.sum(acc * acc, axis=0, keepdims=True)], axis=-1)[None]


def _mm_tanh_kernel(p_ref, w_ref, o_ref):
    acc = jnp.dot(p_ref[...], w_ref[...], preferred_element_type=jnp.float32)
    o_ref[...] = jnp.tanh(acc).astype(o_ref.dtype)


# ---------------------------------------------------------------------------
# Tiling helpers
# ---------------------------------------------------------------------------
def _round_up(x, m):
    return ((x + m - 1) // m) * m


def _pick_tm(M, K, C, out_bytes):
    """Row tile scaled with K/C so the double-buffered per-row working set
    (bf16 patches + output block) stays around _ROW_BUDGET, capped at 4096."""
    row_bytes = 2 * (2 * K + out_bytes * C)
    tm = min(_TM_CAP, _ROW_BUDGET // row_bytes)
    tm = max(16, (tm // 16) * 16)
    return min(tm, _round_up(M, 16))


def _pad_rows(patches, tm):
    """Zero-pad the M axis to a multiple of tm.  Zero rows contribute 0 to the
    BN sums and are sliced off afterwards, so arbitrary batch sizes are exact."""
    B, M, K = patches.shape
    Mp = _round_up(M, tm)
    if Mp != M:
        patches = jnp.pad(patches, ((0, 0), (0, Mp - M), (0, 0)))
    return patches


def _vmem_limit(tm, K, C, out_bytes):
    """Scoped VMEM budget from the actual double-buffered working set."""
    need = 2 * (tm * 2 * K + tm * out_bytes * C + 2 * K * C + 4 * 2 * C)
    return int(min(40 << 20, max(need + (6 << 20), 20 << 20)))


# ---------------------------------------------------------------------------
# Pallas wrappers (batched over B independent matmuls = the 4 deconv phases)
# ---------------------------------------------------------------------------
def _bmm_stats(patches, weights, tm):
    B, Mp, K = patches.shape
    C = weights.shape[-1]
    nm = Mp // tm
    cost = pl.CostEstimate(
        flops=2 * B * Mp * K * C,
        transcendentals=0,
        bytes_accessed=patches.size * 2 + B * K * C * 2 + B * Mp * C * 2
                       + B * nm * 2 * C * 4)
    return pl.pallas_call(
        _mm_stats_kernel,
        out_shape=(jax.ShapeDtypeStruct((B, Mp, C), jnp.bfloat16),
                   jax.ShapeDtypeStruct((B, nm, 1, 2 * C), jnp.float32)),
        grid=(B, nm),
        in_specs=[
            pl.BlockSpec((None, tm, K), lambda b, m: (b, m, 0)),
            pl.BlockSpec((None, K, C), lambda b, m: (b, 0, 0)),   # resident per phase
        ],
        out_specs=(
            pl.BlockSpec((None, tm, C), lambda b, m: (b, m, 0)),
            pl.BlockSpec((None, 1, 1, 2 * C), lambda b, m: (b, m, 0, 0)),
        ),
        compiler_params=pltpu.CompilerParams(
            dimension_semantics=("parallel", "parallel"),
            vmem_limit_bytes=_vmem_limit(tm, K, C, 2)),
        cost_estimate=cost,
    )(patches, weights)


def _bmm_tanh(patches, weights, tm):
    B, Mp, K = patches.shape
    C = weights.shape[-1]
    nm = Mp // tm
    cost = pl.CostEstimate(
        flops=2 * B * Mp * K * C,
        transcendentals=B * Mp * C,
        bytes_accessed=patches.size * 2 + B * K * C * 2 + B * Mp * C * 4)
    return pl.pallas_call(
        _mm_tanh_kernel,
        out_shape=jax.ShapeDtypeStruct((B, Mp, C), jnp.float32),
        grid=(B, nm),
        in_specs=[
            pl.BlockSpec((None, tm, K), lambda b, m: (b, m, 0)),
            pl.BlockSpec((None, K, C), lambda b, m: (b, 0, 0)),
        ],
        out_specs=pl.BlockSpec((None, tm, C), lambda b, m: (b, m, 0)),
        compiler_params=pltpu.CompilerParams(
            dimension_semantics=("parallel", "parallel"),
            vmem_limit_bytes=_vmem_limit(tm, K, C, 4)),
        cost_estimate=cost,
    )(patches, weights)


# ---------------------------------------------------------------------------
# ConvTranspose2d(k=4, s=2, p=1) phase decomposition
# ---------------------------------------------------------------------------
# Output position o relates to input i and kernel tap t by o = 2*i - 1 + t.
# Even outputs (phase 0) only use taps {1,3}; odd outputs (phase 1) use {0,2}.
# Each of the four 2x2 output phases is an ordinary dense 2x2 conv over the
# (1-zero-padded) input: no multiplications against inserted zeros.
# Entries are (kernel_tap, offset into the padded input) per phase.
_PHASE_TAPS = (((1, 1), (3, 0)),    # phase 0 (even output index)
               ((0, 2), (2, 1)))    # phase 1 (odd output index)


def _phase_patches_and_weights(x, w_t, cout_pad=None):
    """im2col patches (4, N*H*W, 4*Cin) and weights (4, 4*Cin, Cp), bf16.
    If cout_pad is given the weight columns (output channels) are zero-padded
    up to Cp so the kernel's stores are lane-dense."""
    Cin, Cout = w_t.shape[0], w_t.shape[1]
    x = x[..., :Cin]                          # drop any lane-padding channels
    N, H, W, _ = x.shape
    Cp = Cout if cout_pad is None else cout_pad
    xp = jnp.pad(x, ((0, 0), (1, 1), (1, 1), (0, 0))).astype(jnp.bfloat16)
    patches, wmats = [], []
    for py in (0, 1):
        for px in (0, 1):
            cols, wrows = [], []
            for ky, dy in _PHASE_TAPS[py]:
                for kx, dx in _PHASE_TAPS[px]:
                    cols.append(xp[:, dy:dy + H, dx:dx + W, :])
                    wrows.append(w_t[:, :, ky, kx])               # (Cin, Cout)
            patches.append(jnp.stack(cols, axis=3).reshape(N * H * W, 4 * Cin))
            wm = jnp.stack(wrows, axis=0).reshape(4 * Cin, Cout)
            if Cp != Cout:
                wm = jnp.pad(wm, ((0, 0), (0, Cp - Cout)))
            wmats.append(wm)
    return jnp.stack(patches, axis=0), jnp.stack(wmats, axis=0).astype(jnp.bfloat16)


def _interleave_phases(y, N, H, W, C):
    """(4, N*H*W, C) phase outputs -> (N, 2H, 2W, C)."""
    y = y.reshape(2, 2, N, H, W, C)                 # (py, px, N, H, W, C)
    y = jnp.transpose(y, (2, 3, 0, 4, 1, 5))        # (N, H, py, W, px, C)
    return y.reshape(N, 2 * H, 2 * W, C)


# ---------------------------------------------------------------------------
# Layers
# ---------------------------------------------------------------------------
def _bn_scale_shift(s1, s2, count, gamma, beta, eps=_BN_EPS):
    # Training-mode BatchNorm2d: biased batch statistics over (N, H, W).
    # Single-pass E[x^2]-E[x]^2 (clamped); acceptable precision for DCGAN.
    mean = s1 / count
    var = jnp.maximum(s2 / count - mean * mean, 0.0)
    scale = gamma * jax.lax.rsqrt(var + eps)
    return scale, beta - mean * scale


def _deconv1x1_bn_relu(z, w_t, gamma, beta):
    """ConvTranspose2d(nz, C, 4, 1, 0) on a 1x1 input == a single matmul.
    Output columns (k*k*Cout >= 1024) are already lane-dense."""
    N = z.shape[0]
    Cin, Cout, k, _ = w_t.shape
    C = k * k * Cout
    p = z.reshape(1, N, Cin).astype(jnp.bfloat16)
    w = jnp.transpose(w_t, (0, 2, 3, 1)).reshape(1, Cin, C).astype(jnp.bfloat16)
    tm = _pick_tm(N, Cin, C, out_bytes=2)
    p = _pad_rows(p, tm)
    y, stats = _bmm_stats(p, w, tm)
    # columns are (ky, kx, cout): fold the 16 spatial taps into per-channel sums
    s = stats.sum(axis=(0, 1, 2))
    s1 = s[:C].reshape(k * k, Cout).sum(axis=0)
    s2 = s[C:].reshape(k * k, Cout).sum(axis=0)
    scale, shift = _bn_scale_shift(s1, s2, N * k * k, gamma, beta)
    y = y[0, :N].reshape(N, k, k, Cout)
    return jnp.maximum(y * scale + shift, 0.0).astype(jnp.bfloat16)


def _deconv_s2_bn_relu(x, w_t, gamma, beta):
    Cin, Cout = w_t.shape[0], w_t.shape[1]
    N, H, W = x.shape[0], x.shape[1], x.shape[2]
    M = N * H * W
    # Lane-dense output channels: pad Cout (weight columns, gamma, beta) up to
    # a multiple of 128 with zeros -> padded channels are exactly 0 after the
    # affine and are ignored by the next layer's patch builder.
    Cp = max(_round_up(Cout, 128), 128)
    patches, wmats = _phase_patches_and_weights(x, w_t, cout_pad=Cp)
    tm = _pick_tm(M, patches.shape[-1], Cp, out_bytes=2)
    patches = _pad_rows(patches, tm)
    y, stats = _bmm_stats(patches, wmats, tm)
    s = stats.sum(axis=(0, 1, 2))                       # (2*Cp,)
    gamma_p = jnp.pad(gamma, (0, Cp - Cout))
    beta_p = jnp.pad(beta, (0, Cp - Cout))
    scale, shift = _bn_scale_shift(s[:Cp], s[Cp:], 4 * M, gamma_p, beta_p)
    # BN affine + ReLU + interleave stay in bf16 plain jnp: XLA fuses it with
    # the next layer's im2col slicing glue and the materialized activation is
    # half the bytes of an f32 one.
    act = jnp.maximum(y[:, :M] * scale + shift, 0.0).astype(jnp.bfloat16)
    return _interleave_phases(act, N, H, W, Cp)


def _deconv_s2_tanh(x, w_t):
    Cout = w_t.shape[1]
    N, H, W = x.shape[0], x.shape[1], x.shape[2]
    M = N * H * W
    # Final layer: store only the real nc output channels (f32, last dim equals
    # the full array dim -> masked but tiny stores); no 128-wide padded slab.
    patches, wmats = _phase_patches_and_weights(x, w_t)
    tm = _pick_tm(M, patches.shape[-1], Cout, out_bytes=4)
    patches = _pad_rows(patches, tm)
    y = _bmm_tanh(patches, wmats, tm)
    return _interleave_phases(y[:, :M], N, H, W, Cout)


# ---------------------------------------------------------------------------
# _netG forward
# ---------------------------------------------------------------------------
def init_netg_params(key, nz, ngf, nc):
    ks = jax.random.split(key, 9)
    return {
        # ConvTranspose2d weights: (C_in, C_out, 4, 4), DCGAN init N(0, 0.02)
        "w1": 0.02 * jax.random.normal(ks[0], (nz, ngf * 8, 4, 4), jnp.float32),
        "w2": 0.02 * jax.random.normal(ks[1], (ngf * 8, ngf * 4, 4, 4), jnp.float32),
        "w3": 0.02 * jax.random.normal(ks[2], (ngf * 4, ngf * 2, 4, 4), jnp.float32),
        "w4": 0.02 * jax.random.normal(ks[3], (ngf * 2, ngf, 4, 4), jnp.float32),
        "w5": 0.02 * jax.random.normal(ks[4], (ngf, nc, 4, 4), jnp.float32),
        # BatchNorm gamma ~ N(1, 0.02), beta = 0 (DCGAN weights_init)
        "g1": 1.0 + 0.02 * jax.random.normal(ks[5], (ngf * 8,), jnp.float32),
        "g2": 1.0 + 0.02 * jax.random.normal(ks[6], (ngf * 4,), jnp.float32),
        "g3": 1.0 + 0.02 * jax.random.normal(ks[7], (ngf * 2,), jnp.float32),
        "g4": 1.0 + 0.02 * jax.random.normal(ks[8], (ngf,), jnp.float32),
        "b1": jnp.zeros((ngf * 8,), jnp.float32),
        "b2": jnp.zeros((ngf * 4,), jnp.float32),
        "b3": jnp.zeros((ngf * 2,), jnp.float32),
        "b4": jnp.zeros((ngf,), jnp.float32),
    }


@jax.jit
def netg_forward(z_nchw, params):
    # z: (N, nz, 1, 1) NCHW -> NHWC for the internal pipeline
    x = jnp.transpose(z_nchw, (0, 2, 3, 1)).astype(jnp.float32)
    x = _deconv1x1_bn_relu(x, params["w1"], params["g1"], params["b1"])   # (N, 4, 4, 8*ngf)
    x = _deconv_s2_bn_relu(x, params["w2"], params["g2"], params["b2"])   # (N, 8, 8, >=128)
    x = _deconv_s2_bn_relu(x, params["w3"], params["g3"], params["b3"])   # (N,16,16, >=128)
    x = _deconv_s2_bn_relu(x, params["w4"], params["g4"], params["b4"])   # (N,32,32, >=128)
    x = _deconv_s2_tanh(x, params["w5"])                                  # (N,64,64,    nc)
    return jnp.transpose(x, (0, 3, 1, 2))   # back to NCHW, (N, nc, 64, 64)


if __name__ == "__main__":
    # small DCGAN config: nz=8, ngf=8, nc=3, batch=2
    N, nz, ngf, nc = 2, 8, 8, 3
    key = jax.random.PRNGKey(0)
    k_param, k_z = jax.random.split(key)
    params = init_netg_params(k_param, nz, ngf, nc)
    z = jax.random.normal(k_z, (N, nz, 1, 1), jnp.float32)

    out = netg_forward(z, params)
    out = jax.block_until_ready(out)

    assert out.shape == (N, nc, 64, 64), out.shape
    assert bool(jnp.all(jnp.isfinite(out)))
    assert bool(jnp.all(jnp.abs(out) <= 1.0 + 1e-6))  # tanh range
    print("KERNEL_OK")
</pallas_src>

<mosaic_0001>
module attributes {stable_mosaic.version = 11 : i64} {
  func.func @_mm_stats_kernel(%arg0: i32, %arg1: i32, %arg2: memref<1x16x8xbf16, #tpu.memory_space<vmem>>, %arg3: memref<1x8x1024xbf16, #tpu.memory_space<vmem>>, %arg4: memref<1x16x1024xbf16, #tpu.memory_space<vmem>>, %arg5: memref<1x1x1x2048xf32, #tpu.memory_space<vmem>>) attributes {dimension_semantics = [#tpu.dimension_semantics<parallel>, #tpu.dimension_semantics<parallel>], iteration_bounds = array<i64: 1, 1>, scalar_prefetch = 0 : i64, scratch_operands = 0 : i64, tpu.core_type = #tpu.core_type<tc>, window_params = [{transform_indices = @transform_0, window_bounds = array<i64: 1, 16, 8>}, {transform_indices = @transform_1, window_bounds = array<i64: 1, 8, 1024>}, {transform_indices = @transform_2, window_bounds = array<i64: 1, 16, 1024>}, {transform_indices = @transform_3, window_bounds = array<i64: 1, 1, 1, 2048>}]} {
    %c0 = arith.constant 0 : index
    %c0_0 = arith.constant 0 : index
    %c0_1 = arith.constant 0 : index
    %0 = vector.load %arg2[%c0, %c0_0, %c0_1] : memref<1x16x8xbf16, #tpu.memory_space<vmem>>, vector<1x16x8xbf16>
    %1 = vector.shape_cast %0 : vector<1x16x8xbf16> to vector<16x8xbf16>
    %c0_2 = arith.constant 0 : index
    %c0_3 = arith.constant 0 : index
    %c0_4 = arith.constant 0 : index
    %2 = vector.load %arg3[%c0_2, %c0_3, %c0_4] : memref<1x8x1024xbf16, #tpu.memory_space<vmem>>, vector<1x8x1024xbf16>
    %3 = vector.shape_cast %2 : vector<1x8x1024xbf16> to vector<8x1024xbf16>
    %cst = arith.constant dense<0.000000e+00> : vector<16x1024xf32>
    %4 = tpu.matmul %1, %3, %cst {dimension_numbers = #tpu.dot_dimension_numbers<[1], [0], [0], [1], [0, 0, 1, 1], [], []>} : vector<16x8xbf16>, vector<8x1024xbf16>, vector<16x1024xf32> -> vector<16x1024xf32>
    %5 = arith.truncf %4 : vector<16x1024xf32> to vector<16x1024xbf16>
    %c0_5 = arith.constant 0 : index
    %c0_6 = arith.constant 0 : index
    %c0_7 = arith.constant 0 : index
    %6 = vector.load %arg4[%c0_5, %c0_6, %c0_7] : memref<1x16x1024xbf16, #tpu.memory_space<vmem>>, vector<1x16x1024xbf16>
    %7 = vector.shape_cast %6 : vector<1x16x1024xbf16> to vector<16x1024xbf16>
    %8 = vector.shape_cast %5 : vector<16x1024xbf16> to vector<1x16x1024xbf16>
    tpu.vector_store %arg4[%c0_5, %c0_6, %c0_7], %8 {strides = array<i32>} : memref<1x16x1024xbf16, #tpu.memory_space<vmem>>, vector<1x16x1024xbf16>,
    %cst_8 = arith.constant dense<0.000000e+00> : vector<1024xf32>
    %9 = vector.multi_reduction <add>, %4, %cst_8 [0] : vector<16x1024xf32> to vector<1024xf32>
    %10 = vector.shape_cast %9 : vector<1024xf32> to vector<1x1024xf32>
    %11 = arith.mulf %4, %4 : vector<16x1024xf32>
    %cst_9 = arith.constant dense<0.000000e+00> : vector<1024xf32>
    %12 = vector.multi_reduction <add>, %11, %cst_9 [0] : vector<16x1024xf32> to vector<1024xf32>
    %13 = vector.shape_cast %12 : vector<1024xf32> to vector<1x1024xf32>
    %14 = tpu.concatenate %10, %13 in 1 : vector<1x1024xf32>, vector<1x1024xf32> -> vector<1x2048xf32>
    %15 = vector.shape_cast %14 : vector<1x2048xf32> to vector<1x1x2048xf32>
    %c0_10 = arith.constant 0 : index
    %c0_11 = arith.constant 0 : index
    %c0_12 = arith.constant 0 : index
    %c0_13 = arith.constant 0 : index
    %16 = vector.load %arg5[%c0_10, %c0_11, %c0_12, %c0_13] : memref<1x1x1x2048xf32, #tpu.memory_space<vmem>>, vector<1x1x1x2048xf32>
    %17 = vector.shape_cast %16 : vector<1x1x1x2048xf32> to vector<1x1x2048xf32>
    %18 = vector.shape_cast %15 : vector<1x1x2048xf32> to vector<1x1x1x2048xf32>
    tpu.vector_store %arg5[%c0_10, %c0_11, %c0_12, %c0_13], %18 {strides = array<i32>} : memref<1x1x1x2048xf32, #tpu.memory_space<vmem>>, vector<1x1x1x2048xf32>,
    return
  }
  func.func @transform_0(%arg0: i32, %arg1: i32) -> (i32, i32, i32) {
    %c0_i32 = arith.constant 0 : i32
    %c0_i32_0 = arith.constant 0 : i32
    return %arg0, %arg1, %c0_i32 : i32, i32, i32
  }
  func.func @transform_1(%arg0: i32, %arg1: i32) -> (i32, i32, i32) {
    %c0_i32 = arith.constant 0 : i32
    %c0_i32_0 = arith.constant 0 : i32
    %c0_i32_1 = arith.constant 0 : i32
    return %arg0, %c0_i32, %c0_i32_0 : i32, i32, i32
  }
  func.func @transform_2(%arg0: i32, %arg1: i32) -> (i32, i32, i32) {
    %c0_i32 = arith.constant 0 : i32
    %c0_i32_0 = arith.constant 0 : i32
    return %arg0, %arg1, %c0_i32 : i32, i32, i32
  }
  func.func @transform_3(%arg0: i32, %arg1: i32) -> (i32, i32, i32, i32) {
    %c0_i32 = arith.constant 0 : i32
    %c0_i32_0 = arith.constant 0 : i32
    %c0_i32_1 = arith.constant 0 : i32
    return %arg0, %arg1, %c0_i32, %c0_i32_0 : i32, i32, i32, i32
  }
}

module attributes {stable_mosaic.version = 11 : i64} {
  func.func @_mm_stats_kernel(%arg0: i32, %arg1: i32, %arg2: memref<1x32x256xbf16, #tpu.memory_space<vmem>>, %arg3: memref<1x256x128xbf16, #tpu.memory_space<vmem>>, %arg4: memref<1x32x128xbf16, #tpu.memory_space<vmem>>, %arg5: memref<1x1x1x256xf32, #tpu.memory_space<vmem>>) attributes {dimension_semantics = [#tpu.dimension_semantics<parallel>, #tpu.dimension_semantics<parallel>], iteration_bounds = array<i64: 4, 1>, scalar_prefetch = 0 : i64, scratch_operands = 0 : i64, tpu.core_type = #tpu.core_type<tc>, window_params = [{transform_indices = @transform_0, window_bounds = array<i64: 1, 32, 256>}, {transform_indices = @transform_1, window_bounds = array<i64: 1, 256, 128>}, {transform_indices = @transform_2, window_bounds = array<i64: 1, 32, 128>}, {transform_indices = @transform_3, window_bounds = array<i64: 1, 1, 1, 256>}]} {
    %c0 = arith.constant 0 : index
    %c0_0 = arith.constant 0 : index
    %c0_1 = arith.constant 0 : index
    %0 = vector.load %arg2[%c0, %c0_0, %c0_1] : memref<1x32x256xbf16, #tpu.memory_space<vmem>>, vector<1x32x256xbf16>
    %1 = vector.shape_cast %0 : vector<1x32x256xbf16> to vector<32x256xbf16>
    %c0_2 = arith.constant 0 : index
    %c0_3 = arith.constant 0 : index
    %c0_4 = arith.constant 0 : index
    %2 = vector.load %arg3[%c0_2, %c0_3, %c0_4] : memref<1x256x128xbf16, #tpu.memory_space<vmem>>, vector<1x256x128xbf16>
    %3 = vector.shape_cast %2 : vector<1x256x128xbf16> to vector<256x128xbf16>
    %cst = arith.constant dense<0.000000e+00> : vector<32x128xf32>
    %4 = tpu.matmul %1, %3, %cst {dimension_numbers = #tpu.dot_dimension_numbers<[1], [0], [0], [1], [0, 0, 1, 1], [], []>} : vector<32x256xbf16>, vector<256x128xbf16>, vector<32x128xf32> -> vector<32x128xf32>
    %5 = arith.truncf %4 : vector<32x128xf32> to vector<32x128xbf16>
    %c0_5 = arith.constant 0 : index
    %c0_6 = arith.constant 0 : index
    %c0_7 = arith.constant 0 : index
    %6 = vector.load %arg4[%c0_5, %c0_6, %c0_7] : memref<1x32x128xbf16, #tpu.memory_space<vmem>>, vector<1x32x128xbf16>
    %7 = vector.shape_cast %6 : vector<1x32x128xbf16> to vector<32x128xbf16>
    %8 = vector.shape_cast %5 : vector<32x128xbf16> to vector<1x32x128xbf16>
    tpu.vector_store %arg4[%c0_5, %c0_6, %c0_7], %8 {strides = array<i32>} : memref<1x32x128xbf16, #tpu.memory_space<vmem>>, vector<1x32x128xbf16>,
    %cst_8 = arith.constant dense<0.000000e+00> : vector<128xf32>
    %9 = vector.multi_reduction <add>, %4, %cst_8 [0] : vector<32x128xf32> to vector<128xf32>
    %10 = vector.shape_cast %9 : vector<128xf32> to vector<1x128xf32>
    %11 = arith.mulf %4, %4 : vector<32x128xf32>
    %cst_9 = arith.constant dense<0.000000e+00> : vector<128xf32>
    %12 = vector.multi_reduction <add>, %11, %cst_9 [0] : vector<32x128xf32> to vector<128xf32>
    %13 = vector.shape_cast %12 : vector<128xf32> to vector<1x128xf32>
    %14 = tpu.concatenate %10, %13 in 1 : vector<1x128xf32>, vector<1x128xf32> -> vector<1x256xf32>
    %15 = vector.shape_cast %14 : vector<1x256xf32> to vector<1x1x256xf32>
    %c0_10 = arith.constant 0 : index
    %c0_11 = arith.constant 0 : index
    %c0_12 = arith.constant 0 : index
    %c0_13 = arith.constant 0 : index
    %16 = vector.load %arg5[%c0_10, %c0_11, %c0_12, %c0_13] : memref<1x1x1x256xf32, #tpu.memory_space<vmem>>, vector<1x1x1x256xf32>
    %17 = vector.shape_cast %16 : vector<1x1x1x256xf32> to vector<1x1x256xf32>
    %18 = vector.shape_cast %15 : vector<1x1x256xf32> to vector<1x1x1x256xf32>
    tpu.vector_store %arg5[%c0_10, %c0_11, %c0_12, %c0_13], %18 {strides = array<i32>} : memref<1x1x1x256xf32, #tpu.memory_space<vmem>>, vector<1x1x1x256xf32>,
    return
  }
  func.func @transform_0(%arg0: i32, %arg1: i32) -> (i32, i32, i32) {
    %c0_i32 = arith.constant 0 : i32
    %c0_i32_0 = arith.constant 0 : i32
    return %arg0, %arg1, %c0_i32 : i32, i32, i32
  }
  func.func @transform_1(%arg0: i32, %arg1: i32) -> (i32, i32, i32) {
    %c0_i32 = arith.constant 0 : i32
    %c0_i32_0 = arith.constant 0 : i32
    %c0_i32_1 = arith.constant 0 : i32
    return %arg0, %c0_i32, %c0_i32_0 : i32, i32, i32
  }
  func.func @transform_2(%arg0: i32, %arg1: i32) -> (i32, i32, i32) {
    %c0_i32 = arith.constant 0 : i32
    %c0_i32_0 = arith.constant 0 : i32
    return %arg0, %arg1, %c0_i32 : i32, i32, i32
  }
  func.func @transform_3(%arg0: i32, %arg1: i32) -> (i32, i32, i32, i32) {
    %c0_i32 = arith.constant 0 : i32
    %c0_i32_0 = arith.constant 0 : i32
    %c0_i32_1 = arith.constant 0 : i32
    return %arg0, %arg1, %c0_i32, %c0_i32_0 : i32, i32, i32, i32
  }
}

module attributes {stable_mosaic.version = 11 : i64} {
  func.func @_mm_stats_kernel(%arg0: i32, %arg1: i32, %arg2: memref<1x128x128xbf16, #tpu.memory_space<vmem>>, %arg3: memref<1x128x128xbf16, #tpu.memory_space<vmem>>, %arg4: memref<1x128x128xbf16, #tpu.memory_space<vmem>>, %arg5: memref<1x1x1x256xf32, #tpu.memory_space<vmem>>) attributes {dimension_semantics = [#tpu.dimension_semantics<parallel>, #tpu.dimension_semantics<parallel>], iteration_bounds = array<i64: 4, 1>, scalar_prefetch = 0 : i64, scratch_operands = 0 : i64, tpu.core_type = #tpu.core_type<tc>, window_params = [{transform_indices = @transform_0, window_bounds = array<i64: 1, 128, 128>}, {transform_indices = @transform_1, window_bounds = array<i64: 1, 128, 128>}, {transform_indices = @transform_2, window_bounds = array<i64: 1, 128, 128>}, {transform_indices = @transform_3, window_bounds = array<i64: 1, 1, 1, 256>}]} {
    %c0 = arith.constant 0 : index
    %c0_0 = arith.constant 0 : index
    %c0_1 = arith.constant 0 : index
    %0 = vector.load %arg2[%c0, %c0_0, %c0_1] : memref<1x128x128xbf16, #tpu.memory_space<vmem>>, vector<1x128x128xbf16>
    %1 = vector.shape_cast %0 : vector<1x128x128xbf16> to vector<128x128xbf16>
    %c0_2 = arith.constant 0 : index
    %c0_3 = arith.constant 0 : index
    %c0_4 = arith.constant 0 : index
    %2 = vector.load %arg3[%c0_2, %c0_3, %c0_4] : memref<1x128x128xbf16, #tpu.memory_space<vmem>>, vector<1x128x128xbf16>
    %3 = vector.shape_cast %2 : vector<1x128x128xbf16> to vector<128x128xbf16>
    %cst = arith.constant dense<0.000000e+00> : vector<128x128xf32>
    %4 = tpu.matmul %1, %3, %cst {dimension_numbers = #tpu.dot_dimension_numbers<[1], [0], [0], [1], [0, 0, 1, 1], [], []>} : vector<128x128xbf16>, vector<128x128xbf16>, vector<128x128xf32> -> vector<128x128xf32>
    %5 = arith.truncf %4 : vector<128x128xf32> to vector<128x128xbf16>
    %c0_5 = arith.constant 0 : index
    %c0_6 = arith.constant 0 : index
    %c0_7 = arith.constant 0 : index
    %6 = vector.load %arg4[%c0_5, %c0_6, %c0_7] : memref<1x128x128xbf16, #tpu.memory_space<vmem>>, vector<1x128x128xbf16>
    %7 = vector.shape_cast %6 : vector<1x128x128xbf16> to vector<128x128xbf16>
    %8 = vector.shape_cast %5 : vector<128x128xbf16> to vector<1x128x128xbf16>
    tpu.vector_store %arg4[%c0_5, %c0_6, %c0_7], %8 {strides = array<i32>} : memref<1x128x128xbf16, #tpu.memory_space<vmem>>, vector<1x128x128xbf16>,
    %cst_8 = arith.constant dense<0.000000e+00> : vector<128xf32>
    %9 = vector.multi_reduction <add>, %4, %cst_8 [0] : vector<128x128xf32> to vector<128xf32>
    %10 = vector.shape_cast %9 : vector<128xf32> to vector<1x128xf32>
    %11 = arith.mulf %4, %4 : vector<128x128xf32>
    %cst_9 = arith.constant dense<0.000000e+00> : vector<128xf32>
    %12 = vector.multi_reduction <add>, %11, %cst_9 [0] : vector<128x128xf32> to vector<128xf32>
    %13 = vector.shape_cast %12 : vector<128xf32> to vector<1x128xf32>
    %14 = tpu.concatenate %10, %13 in 1 : vector<1x128xf32>, vector<1x128xf32> -> vector<1x256xf32>
    %15 = vector.shape_cast %14 : vector<1x256xf32> to vector<1x1x256xf32>
    %c0_10 = arith.constant 0 : index
    %c0_11 = arith.constant 0 : index
    %c0_12 = arith.constant 0 : index
    %c0_13 = arith.constant 0 : index
    %16 = vector.load %arg5[%c0_10, %c0_11, %c0_12, %c0_13] : memref<1x1x1x256xf32, #tpu.memory_space<vmem>>, vector<1x1x1x256xf32>
    %17 = vector.shape_cast %16 : vector<1x1x1x256xf32> to vector<1x1x256xf32>
    %18 = vector.shape_cast %15 : vector<1x1x256xf32> to vector<1x1x1x256xf32>
    tpu.vector_store %arg5[%c0_10, %c0_11, %c0_12, %c0_13], %18 {strides = array<i32>} : memref<1x1x1x256xf32, #tpu.memory_space<vmem>>, vector<1x1x1x256xf32>,
    return
  }
  func.func @transform_0(%arg0: i32, %arg1: i32) -> (i32, i32, i32) {
    %c0_i32 = arith.constant 0 : i32
    %c0_i32_0 = arith.constant 0 : i32
    return %arg0, %arg1, %c0_i32 : i32, i32, i32
  }
  func.func @transform_1(%arg0: i32, %arg1: i32) -> (i32, i32, i32) {
    %c0_i32 = arith.constant 0 : i32
    %c0_i32_0 = arith.constant 0 : i32
    %c0_i32_1 = arith.constant 0 : i32
    return %arg0, %c0_i32, %c0_i32_0 : i32, i32, i32
  }
  func.func @transform_2(%arg0: i32, %arg1: i32) -> (i32, i32, i32) {
    %c0_i32 = arith.constant 0 : i32
    %c0_i32_0 = arith.constant 0 : i32
    return %arg0, %arg1, %c0_i32 : i32, i32, i32
  }
  func.func @transform_3(%arg0: i32, %arg1: i32) -> (i32, i32, i32, i32) {
    %c0_i32 = arith.constant 0 : i32
    %c0_i32_0 = arith.constant 0 : i32
    %c0_i32_1 = arith.constant 0 : i32
    return %arg0, %arg1, %c0_i32, %c0_i32_0 : i32, i32, i32, i32
  }
}

module attributes {stable_mosaic.version = 11 : i64} {
  func.func @_mm_stats_kernel(%arg0: i32, %arg1: i32, %arg2: memref<1x512x64xbf16, #tpu.memory_space<vmem>>, %arg3: memref<1x64x128xbf16, #tpu.memory_space<vmem>>, %arg4: memref<1x512x128xbf16, #tpu.memory_space<vmem>>, %arg5: memref<1x1x1x256xf32, #tpu.memory_space<vmem>>) attributes {dimension_semantics = [#tpu.dimension_semantics<parallel>, #tpu.dimension_semantics<parallel>], iteration_bounds = array<i64: 4, 1>, scalar_prefetch = 0 : i64, scratch_operands = 0 : i64, tpu.core_type = #tpu.core_type<tc>, window_params = [{transform_indices = @transform_0, window_bounds = array<i64: 1, 512, 64>}, {transform_indices = @transform_1, window_bounds = array<i64: 1, 64, 128>}, {transform_indices = @transform_2, window_bounds = array<i64: 1, 512, 128>}, {transform_indices = @transform_3, window_bounds = array<i64: 1, 1, 1, 256>}]} {
    %c0 = arith.constant 0 : index
    %c0_0 = arith.constant 0 : index
    %c0_1 = arith.constant 0 : index
    %0 = vector.load %arg2[%c0, %c0_0, %c0_1] : memref<1x512x64xbf16, #tpu.memory_space<vmem>>, vector<1x512x64xbf16>
    %1 = vector.shape_cast %0 : vector<1x512x64xbf16> to vector<512x64xbf16>
    %c0_2 = arith.constant 0 : index
    %c0_3 = arith.constant 0 : index
    %c0_4 = arith.constant 0 : index
    %2 = vector.load %arg3[%c0_2, %c0_3, %c0_4] : memref<1x64x128xbf16, #tpu.memory_space<vmem>>, vector<1x64x128xbf16>
    %3 = vector.shape_cast %2 : vector<1x64x128xbf16> to vector<64x128xbf16>
    %cst = arith.constant dense<0.000000e+00> : vector<512x128xf32>
    %4 = tpu.matmul %1, %3, %cst {dimension_numbers = #tpu.dot_dimension_numbers<[1], [0], [0], [1], [0, 0, 1, 1], [], []>} : vector<512x64xbf16>, vector<64x128xbf16>, vector<512x128xf32> -> vector<512x128xf32>
    %5 = arith.truncf %4 : vector<512x128xf32> to vector<512x128xbf16>
    %c0_5 = arith.constant 0 : index
    %c0_6 = arith.constant 0 : index
    %c0_7 = arith.constant 0 : index
    %6 = vector.load %arg4[%c0_5, %c0_6, %c0_7] : memref<1x512x128xbf16, #tpu.memory_space<vmem>>, vector<1x512x128xbf16>
    %7 = vector.shape_cast %6 : vector<1x512x128xbf16> to vector<512x128xbf16>
    %8 = vector.shape_cast %5 : vector<512x128xbf16> to vector<1x512x128xbf16>
    tpu.vector_store %arg4[%c0_5, %c0_6, %c0_7], %8 {strides = array<i32>} : memref<1x512x128xbf16, #tpu.memory_space<vmem>>, vector<1x512x128xbf16>,
    %cst_8 = arith.constant dense<0.000000e+00> : vector<128xf32>
    %9 = vector.multi_reduction <add>, %4, %cst_8 [0] : vector<512x128xf32> to vector<128xf32>
    %10 = vector.shape_cast %9 : vector<128xf32> to vector<1x128xf32>
    %11 = arith.mulf %4, %4 : vector<512x128xf32>
    %cst_9 = arith.constant dense<0.000000e+00> : vector<128xf32>
    %12 = vector.multi_reduction <add>, %11, %cst_9 [0] : vector<512x128xf32> to vector<128xf32>
    %13 = vector.shape_cast %12 : vector<128xf32> to vector<1x128xf32>
    %14 = tpu.concatenate %10, %13 in 1 : vector<1x128xf32>, vector<1x128xf32> -> vector<1x256xf32>
    %15 = vector.shape_cast %14 : vector<1x256xf32> to vector<1x1x256xf32>
    %c0_10 = arith.constant 0 : index
    %c0_11 = arith.constant 0 : index
    %c0_12 = arith.constant 0 : index
    %c0_13 = arith.constant 0 : index
    %16 = vector.load %arg5[%c0_10, %c0_11, %c0_12, %c0_13] : memref<1x1x1x256xf32, #tpu.memory_space<vmem>>, vector<1x1x1x256xf32>
    %17 = vector.shape_cast %16 : vector<1x1x1x256xf32> to vector<1x1x256xf32>
    %18 = vector.shape_cast %15 : vector<1x1x256xf32> to vector<1x1x1x256xf32>
    tpu.vector_store %arg5[%c0_10, %c0_11, %c0_12, %c0_13], %18 {strides = array<i32>} : memref<1x1x1x256xf32, #tpu.memory_space<vmem>>, vector<1x1x1x256xf32>,
    return
  }
  func.func @transform_0(%arg0: i32, %arg1: i32) -> (i32, i32, i32) {
    %c0_i32 = arith.constant 0 : i32
    %c0_i32_0 = arith.constant 0 : i32
    return %arg0, %arg1, %c0_i32 : i32, i32, i32
  }
  func.func @transform_1(%arg0: i32, %arg1: i32) -> (i32, i32, i32) {
    %c0_i32 = arith.constant 0 : i32
    %c0_i32_0 = arith.constant 0 : i32
    %c0_i32_1 = arith.constant 0 : i32
    return %arg0, %c0_i32, %c0_i32_0 : i32, i32, i32
  }
  func.func @transform_2(%arg0: i32, %arg1: i32) -> (i32, i32, i32) {
    %c0_i32 = arith.constant 0 : i32
    %c0_i32_0 = arith.constant 0 : i32
    return %arg0, %arg1, %c0_i32 : i32, i32, i32
  }
  func.func @transform_3(%arg0: i32, %arg1: i32) -> (i32, i32, i32, i32) {
    %c0_i32 = arith.constant 0 : i32
    %c0_i32_0 = arith.constant 0 : i32
    %c0_i32_1 = arith.constant 0 : i32
    return %arg0, %arg1, %c0_i32, %c0_i32_0 : i32, i32, i32, i32
  }
}

module attributes {stable_mosaic.version = 11 : i64} {
  func.func @_mm_tanh_kernel(%arg0: i32, %arg1: i32, %arg2: memref<1x2048x32xbf16, #tpu.memory_space<vmem>>, %arg3: memref<1x32x3xbf16, #tpu.memory_space<vmem>>, %arg4: memref<1x2048x3xf32, #tpu.memory_space<vmem>>) attributes {dimension_semantics = [#tpu.dimension_semantics<parallel>, #tpu.dimension_semantics<parallel>], iteration_bounds = array<i64: 4, 1>, scalar_prefetch = 0 : i64, scratch_operands = 0 : i64, tpu.core_type = #tpu.core_type<tc>, window_params = [{transform_indices = @transform_0, window_bounds = array<i64: 1, 2048, 32>}, {transform_indices = @transform_1, window_bounds = array<i64: 1, 32, 3>}, {transform_indices = @transform_2, window_bounds = array<i64: 1, 2048, 3>}]} {
    %c0 = arith.constant 0 : index
    %c0_0 = arith.constant 0 : index
    %c0_1 = arith.constant 0 : index
    %0 = vector.load %arg2[%c0, %c0_0, %c0_1] : memref<1x2048x32xbf16, #tpu.memory_space<vmem>>, vector<1x2048x32xbf16>
    %1 = vector.shape_cast %0 : vector<1x2048x32xbf16> to vector<2048x32xbf16>
    %c0_2 = arith.constant 0 : index
    %c0_3 = arith.constant 0 : index
    %c0_4 = arith.constant 0 : index
    %2 = vector.load %arg3[%c0_2, %c0_3, %c0_4] : memref<1x32x3xbf16, #tpu.memory_space<vmem>>, vector<1x32x3xbf16>
    %3 = vector.shape_cast %2 : vector<1x32x3xbf16> to vector<32x3xbf16>
    %cst = arith.constant dense<0.000000e+00> : vector<2048x3xf32>
    %4 = tpu.matmul %1, %3, %cst {dimension_numbers = #tpu.dot_dimension_numbers<[1], [0], [0], [1], [0, 0, 1, 1], [], []>} : vector<2048x32xbf16>, vector<32x3xbf16>, vector<2048x3xf32> -> vector<2048x3xf32>
    %5 = math.tanh %4 : vector<2048x3xf32>
    %c0_5 = arith.constant 0 : index
    %c0_6 = arith.constant 0 : index
    %c0_7 = arith.constant 0 : index
    %6 = vector.load %arg4[%c0_5, %c0_6, %c0_7] : memref<1x2048x3xf32, #tpu.memory_space<vmem>>, vector<1x2048x3xf32>
    %7 = vector.shape_cast %6 : vector<1x2048x3xf32> to vector<2048x3xf32>
    %8 = vector.shape_cast %5 : vector<2048x3xf32> to vector<1x2048x3xf32>
    tpu.vector_store %arg4[%c0_5, %c0_6, %c0_7], %8 {strides = array<i32>} : memref<1x2048x3xf32, #tpu.memory_space<vmem>>, vector<1x2048x3xf32>,
    return
  }
  func.func @transform_0(%arg0: i32, %arg1: i32) -> (i32, i32, i32) {
    %c0_i32 = arith.constant 0 : i32
    %c0_i32_0 = arith.constant 0 : i32
    return %arg0, %arg1, %c0_i32 : i32, i32, i32
  }
  func.func @transform_1(%arg0: i32, %arg1: i32) -> (i32, i32, i32) {
    %c0_i32 = arith.constant 0 : i32
    %c0_i32_0 = arith.constant 0 : i32
    %c0_i32_1 = arith.constant 0 : i32
    return %arg0, %c0_i32, %c0_i32_0 : i32, i32, i32
  }
  func.func @transform_2(%arg0: i32, %arg1: i32) -> (i32, i32, i32) {
    %c0_i32 = arith.constant 0 : i32
    %c0_i32_0 = arith.constant 0 : i32
    return %arg0, %arg1, %c0_i32 : i32, i32, i32
  }
}

</mosaic_0001>

<bundles_post_ra>
// kernel: netg_forward.5
= control target key start
LH: loop header
LB: loop body
LE: loop exit
PB: predicated region body
PF: predicated region fallthrough
CT: control target
= control target key end

     0   :  { %vm49_vm0 = vcmask 1043456   ;;  %vm45_vm1 = vcmask 64512   ;;  %vm362_vm2 = vcmask 1042434   ;;  %vm360_vm3 = vcmask 1040384   ;;  %s524_s1 = inlined_call_operand.vmem [shape: bf16[1,8,1024], index: 1, kind: input, shape index: {}]   ;;  %s525_s0 = inlined_call_operand.vmem [shape: bf16[1,16,8], index: 0, kind: input, shape index: {}]   ;;  %s526_s2 = inlined_call_operand.vmem [shape: bf16[1,16,1024], index: 2, kind: output, shape index: {0}]   ;;  %s527_s3 = inlined_call_operand.vmem [shape: f32[1,1,1,2048], index: 3, kind: output, shape index: {1}]  }
   0x1   :  { %v16_v0 = vld [vmem:[%s524_s1] sm:$0xff]  ;;  %v17_v1 = vld [vmem:[%s524_s1 + $0x8] sm:$0xff]  ;;  %v19_v6 = vld [vmem:[%s524_s1 + $0x18] sm:$0xff]  ;;  %vm366_vm4 = vcmask 1044484   ;;  %vm364_vm5 = vcmask 1041408   ;;  %vm368_vm6 = vcmask 1046534  }
   0x2   :  { %v29_v2 = vunpack.c.l.b16 %v16_v0  ;;  %v30_v3 = vunpack.c.h.b16 %v16_v0  ;;  %v31_v4 = vunpack.c.l.b16 %v17_v1  ;;  %v32_v5 = vunpack.c.h.b16 %v17_v1  ;;  %v18_v7 = vld [vmem:[%s524_s1 + $0x10] sm:$0xff]  ;;  %v404_v24 = vld [vmem:[%s525_s0] sm:$0xff] }
   0x3   :  { %v35_v8 = vunpack.c.l.b16 %v19_v6  ;;  %v36_v9 = vunpack.c.h.b16 %v19_v6  ;;  %v33_v10 = vunpack.c.l.b16 %v18_v7  ;;  %v34_v11 = vunpack.c.h.b16 %v18_v7 }
   0x4   :  { %v37_v12 = vpack.c.b16 %v29_v2, %v29_v2  ;;  %v38_v13 = vpack.c.b16 %v30_v3, %v30_v3  ;;  %v39_v14 = vpack.c.b16 %v31_v4, %v31_v4  ;;  %v40_v15 = vpack.c.b16 %v32_v5, %v32_v5 }
   0x5   :  { %v43_v16 = vpack.c.b16 %v35_v8, %v35_v8  ;;  %v44_v17 = vpack.c.b16 %v36_v9, %v36_v9  ;;  %v41_v18 = vpack.c.b16 %v33_v10, %v33_v10  ;;  %v42_v19 = vpack.c.b16 %v34_v11, %v34_v11 }
   0x6   :  { %v51_v20 = vsel %vm49_vm0, %v37_v12, 0  ;;  %v54_v21 = vsel %vm49_vm0, %v38_v13, 0  ;;  %v57_v22 = vsel %vm49_vm0, %v39_v14, 0  ;;  %v60_v23 = vsel %vm49_vm0, %v40_v15, 0 }
   0x7   :  { %81 = vmatpush.bf16.msra.mxu0 %v51_v20  ;;  %95 = vmatpush.bf16.msra.mxu1 %v54_v21  ;;  %v69_v25 = vsel %vm49_vm0, %v43_v16, 0  ;;  %v72_v26 = vsel %vm49_vm0, %v44_v17, 0  ;;  %v63_v27 = vsel %vm49_vm0, %v41_v18, 0  ;;  %v66_v28 = vsel %vm49_vm0, %v42_v19, 0 }
   0x8   :  { %109 = vmatpush.bf16.msra.mxu2 %v57_v22  ;;  %123 = vmatpush.bf16.msra.mxu3 %v60_v23  ;;  %vm370_vm7 = vcmask 1045508  }
   0xa   :  { %396 = vmatmul.msk.bf16.vlgmr.msra.gmra.mxu0 %vm45_vm1, %v404_v24  ;;  %397 = vmatmul.msk.bf16.vlgmr.msra.gmra.mxu1 %vm45_vm1, %v404_v24 }
   0xb   :  { %398 = vmatmul.msk.bf16.vlgmr.msra.gmra.mxu2 %vm45_vm1, %v404_v24  ;;  %399 = vmatmul.msk.bf16.vlgmr.msra.gmra.mxu3 %vm45_vm1, %v404_v24 }
   0xc   :  { %165 = vmatpush.bf16.msrb.mxu2 %v69_v25  ;;  %179 = vmatpush.bf16.msrb.mxu3 %v72_v26 }
   0xd   :  { %137 = vmatpush.bf16.msrb.mxu0 %v63_v27  ;;  %151 = vmatpush.bf16.msrb.mxu1 %v66_v28 }
  0x1a   :  { %400 = vmatmul.msk.bf16.vlgmr.msrb.gmra.mxu0 %vm45_vm1, %v404_v24  ;;  %401 = vmatmul.msk.bf16.vlgmr.msrb.gmra.mxu1 %vm45_vm1, %v404_v24 }
  0x1b   :  { %402 = vmatmul.msk.bf16.vlgmr.msrb.gmra.mxu2 %vm45_vm1, %v404_v24  ;;  %403 = vmatmul.msk.bf16.vlgmr.msrb.gmra.mxu3 %vm45_vm1, %v404_v24 }
  0x87   :  { %v83_v29 = vpop.f32.mrf.mxu0  ;;  %v97_v30 = vpop.f32.mrf.mxu1 }
  0x88   :  { %v186_v31 = vpack.c.bf16 %v97_v30, %v83_v29  ;;  %v258_v34 = vmul.f32 %v83_v29, %v83_v29  ;;  %v259_v42 = vmul.f32 %v97_v30, %v97_v30 }
  0x8a   :  { %194 = vst [vmem:[%s526_s2] sm:$0xff] %v186_v31 }
  0x8e   :  { %v111_v32 = vpop.f32.mrf.mxu2  ;;  %v125_v33 = vpop.f32.mrf.mxu3 }
  0x8f   :  { %v187_v35 = vpack.c.bf16 %v125_v33, %v111_v32  ;;  %v85_v36 = vpop.f32.mrf.mxu0  ;;  %v99_v37 = vpop.f32.mrf.mxu1  ;;  %v260_v62 = vmul.f32 %v111_v32, %v111_v32  ;;  %v261_v2 = vmul.f32 %v125_v33, %v125_v33 }
  0x90   :  { %v202_v38 = vadd.f32 %v85_v36, %v83_v29  ;;  %v266_v39 = vmul.f32 %v85_v36, %v85_v36  ;;  %v190_v40 = vpack.c.bf16 %v99_v37, %v85_v36  ;;  %v209_v41 = vadd.f32 %v99_v37, %v97_v30 }
  0x91   :  { %195 = vst [vmem:[%s526_s2 + $0x8] sm:$0xff] %v187_v35  ;;  %v267_v43 = vmul.f32 %v99_v37, %v99_v37 }
  0x92   :  { %v203_v44 = vrot.slane %v202_v38, 4  ;;  %v274_v45 = vadd.f32 %v266_v39, %v258_v34  ;;  %198 = vst [vmem:[%s526_s2 + $0x20] sm:$0xff] %v190_v40  ;;  %v210_v46 = vrot.slane %v209_v41, 4 }
  0x93   :  { %v281_v47 = vadd.f32 %v267_v43, %v259_v42 }
  0x94   :  { %v204_v48 = vadd.f32 %v203_v44, %v202_v38  ;;  %v275_v49 = vrot.slane %v274_v45, 4  ;;  %v211_v50 = vadd.f32 %v210_v46, %v209_v41 }
  0x95   :  { %v282_v52 = vrot.slane %v281_v47, 4 }
  0x96   :  { %v205_v51 = vrot.slane %v204_v48, 2  ;;  %v113_v53 = vpop.f32.mrf.mxu2  ;;  %v127_v54 = vpop.f32.mrf.mxu3  ;;  %v276_v55 = vadd.f32 %v275_v49, %v274_v45  ;;  %v212_v63 = vrot.slane %v211_v50, 2 }
  0x97   :  { %v216_v56 = vadd.f32 %v113_v53, %v111_v32  ;;  %v268_v57 = vmul.f32 %v113_v53, %v113_v53  ;;  %v191_v58 = vpack.c.bf16 %v127_v54, %v113_v53  ;;  %v139_v59 = vpop.f32.mrf.mxu0  ;;  %v153_v60 = vpop.f32.mrf.mxu1  ;;  %v223_v61 = vadd.f32 %v127_v54, %v125_v33 }
  0x98   :  { %v269_v1 = vmul.f32 %v127_v54, %v127_v54  ;;  %v283_v3 = vadd.f32 %v282_v52, %v281_v47  ;;  %v206_v4 = vadd.f32 %v205_v51, %v204_v48  ;;  %v277_v5 = vrot.slane %v276_v55, 2 }
  0x99   :  { %v217_v0 = vrot.slane %v216_v56, 4  ;;  %199 = vst [vmem:[%s526_s2 + $0x28] sm:$0xff] %v191_v58  ;;  %v288_v6 = vadd.f32 %v268_v57, %v260_v62  ;;  %v224_v7 = vrot.slane %v223_v61, 4  ;;  %v213_v8 = vadd.f32 %v212_v63, %v211_v50 }
  0x9a   :  { %v295_v10 = vadd.f32 %v269_v1, %v261_v2  ;;  %v284_v11 = vrot.slane %v283_v3, 2  ;;  %v207_v14 = vrot.slane %v206_v4, 1  ;;  %v470_v15 = vadd.f32 %v277_v5, %v276_v55 }
  0x9b   :  { %v218_v9 = vadd.f32 %v217_v0, %v216_v56  ;;  %v289_v16 = vrot.slane %v288_v6, 4  ;;  %v225_v17 = vadd.f32 %v224_v7, %v223_v61  ;;  %v188_v18 = vpack.c.bf16 %v153_v60, %v139_v59 }
  0x9c   :  { %v214_v19 = vrot.slane %v213_v8, 1  ;;  %v296_v21 = vrot.slane %v295_v10, 4  ;;  %v472_v24 = vadd.f32 %v284_v11, %v283_v3  ;;  %v478_v26 = vadd.f32 %v207_v14, %v206_v4 }
  0x9d   :  { %v219_v20 = vrot.slane %v218_v9, 2  ;;  %196 = vst [vmem:[%s526_s2 + $0x10] sm:$0xff] %v188_v18  ;;  %v279_v27 = vrot.slane %v470_v15, 1  ;;  %v290_v28 = vadd.f32 %v289_v16, %v288_v6  ;;  %v226_v29 = vrot.slane %v225_v17, 2 }
  0x9e   :  { %v167_v12 = vpop.f32.mrf.mxu2  ;;  %v468_v13 = vpop.f32.mrf.mxu3  ;;  %v262_v30 = vmul.f32 %v139_v59, %v139_v59  ;;  %v484_v34 = vadd.f32 %v214_v19, %v213_v8  ;;  %v297_v36 = vadd.f32 %v296_v21, %v295_v10  ;;  %v263_v38 = vmul.f32 %v153_v60, %v153_v60 }
  0x9f   :  { %v141_v22 = vpop.f32.mrf.mxu0  ;;  %v155_v23 = vpop.f32.mrf.mxu1  ;;  %v189_v25 = vpack.c.bf16 %v468_v13, %v167_v12  ;;  %v220_v35 = vadd.f32 %v219_v20, %v218_v9  ;;  %v286_v43 = vrot.slane %v472_v24, 1  ;;  %v291_v44 = vrot.slane %v290_v28, 2 }
  0xa0   :  { %v230_v31 = vadd.f32 %v141_v22, %v139_v59  ;;  %v270_v32 = vmul.f32 %v141_v22, %v141_v22  ;;  %v192_v33 = vpack.c.bf16 %v155_v23, %v141_v22  ;;  %v237_v37 = vadd.f32 %v155_v23, %v153_v60 }
  0xa1   :  { %197 = vst [vmem:[%s526_s2 + $0x18] sm:$0xff] %v189_v25  ;;  %v271_v41 = vmul.f32 %v155_v23, %v155_v23  ;;  %v227_v47 = vadd.f32 %v226_v29, %v225_v17  ;;  %v221_v52 = vrot.slane %v220_v35, 1  ;;  %v298_v53 = vrot.slane %v297_v36, 2 }
  0xa2   :  { %v231_v39 = vrot.slane %v230_v31, 4  ;;  %v302_v40 = vadd.f32 %v270_v32, %v262_v30  ;;  %200 = vst [vmem:[%s526_s2 + $0x30] sm:$0xff] %v192_v33  ;;  %v238_v45 = vrot.slane %v237_v37, 4  ;;  %v264_v60 = vmul.f32 %v167_v12, %v167_v12 }
  0xa3   :  { %v309_v50 = vadd.f32 %v271_v41, %v263_v38  ;;  %v292_v0 = vadd.f32 %v291_v44, %v290_v28  ;;  %v299_v8 = vadd.f32 %v298_v53, %v297_v36  ;;  %v265_v9 = vmul.f32 %v468_v13, %v468_v13 }
  0xa4   :  { %v232_v48 = vadd.f32 %v231_v39, %v230_v31  ;;  %v303_v49 = vrot.slane %v302_v40, 4  ;;  %v239_v54 = vadd.f32 %v238_v45, %v237_v37  ;;  %v346_v29 = vrot.slane %v484_v34, 7 }
  0xa5   :  { %v310_v58 = vrot.slane %v309_v50, 4  ;;  %v293_v30 = vrot.slane %v292_v0, 1  ;;  %v222_v32 = vadd.f32 %v221_v52, %v220_v35  ;;  %v287_v34 = vadd.f32 %v286_v43, %v472_v24 }
  0xa6   :  { %v169_v42 = vpop.f32.mrf.mxu2  ;;  %v183_v51 = vpop.f32.mrf.mxu3  ;;  %v233_v56 = vrot.slane %v232_v48, 2  ;;  %v304_v57 = vadd.f32 %v303_v49, %v302_v40  ;;  %v240_v61 = vrot.slane %v239_v54, 2 }
  0xa7   :  { %v244_v46 = vadd.f32 %v169_v42, %v167_v12  ;;  %v272_v59 = vmul.f32 %v169_v42, %v169_v42  ;;  %v193_v63 = vpack.c.bf16 %v183_v51, %v169_v42  ;;  %v311_v3 = vadd.f32 %v310_v58, %v309_v50 }
  0xa8   :  { %v234_v1 = vadd.f32 %v233_v56, %v232_v48  ;;  %v305_v2 = vrot.slane %v304_v57, 2  ;;  %v241_v4 = vadd.f32 %v240_v61, %v239_v54  ;;  %v251_v7 = vadd.f32 %v183_v51, %v468_v13 }
  0xa9   :  { %v245_v55 = vrot.slane %v244_v46, 4  ;;  %v316_v6 = vadd.f32 %v272_v59, %v264_v60  ;;  %201 = vst [vmem:[%s526_s2 + $0x38] sm:$0xff] %v193_v63  ;;  %v312_v10 = vrot.slane %v311_v3, 2  ;;  %v273_v11 = vmul.f32 %v183_v51, %v183_v51 }
  0xaa   :  { %v228_v12 = vrot.slane %v227_v47, 1  ;;  %v252_v17 = vrot.slane %v251_v7, 4  ;;  %v235_v18 = vrot.slane %v234_v1, 1  ;;  %v306_v19 = vadd.f32 %v305_v2, %v304_v57 }
  0xab   :  { %v246_v62 = vadd.f32 %v245_v55, %v244_v46  ;;  %v317_v16 = vrot.slane %v316_v6, 4  ;;  %v313_v20 = vadd.f32 %v312_v10, %v311_v3  ;;  %v323_v21 = vadd.f32 %v273_v11, %v265_v9 }
  0xac   :  { %v242_v22 = vrot.slane %v241_v4, 1  ;;  %v253_v28 = vadd.f32 %v252_v17, %v251_v7  ;;  %v300_v13 = vrot.slane %v299_v8, 1  ;;  %v229_v33 = vadd.f32 %v228_v12, %v227_v47 }
  0xad   :  { %v247_v5 = vrot.slane %v246_v62, 2  ;;  %v318_v25 = vadd.f32 %v317_v16, %v316_v6  ;;  %v324_v31 = vrot.slane %v323_v21, 4  ;;  %v236_v38 = vadd.f32 %v235_v18, %v234_v1 }
  0xae   :  { %v254_v37 = vrot.slane %v253_v28, 2  ;;  %v307_v39 = vrot.slane %v306_v19, 1  ;;  %v314_v40 = vrot.slane %v313_v20, 1  ;;  %v243_v42 = vadd.f32 %v242_v22, %v241_v4 }
  0xaf   :  { %v248_v14 = vadd.f32 %v247_v5, %v246_v62  ;;  %v319_v36 = vrot.slane %v318_v25, 2  ;;  %v325_v41 = vadd.f32 %v324_v31, %v323_v21  ;;  %v294_v48 = vadd.f32 %v293_v30, %v292_v0 }
  0xb0   :  { %v255_v46 = vadd.f32 %v254_v37, %v253_v28  ;;  %v301_v49 = vadd.f32 %v300_v13, %v299_v8  ;;  %v347_v35 = vrot.slane %v222_v32, 6  ;;  %v348_v47 = vrot.slane %v229_v33, 5 }
  0xb1   :  { %v249_v23 = vrot.slane %v248_v14, 1  ;;  %v320_v45 = vadd.f32 %v319_v36, %v318_v25  ;;  %v326_v50 = vrot.slane %v325_v41, 2  ;;  %v308_v53 = vadd.f32 %v307_v39, %v306_v19 }
  0xb2   :  { %v256_v52 = vrot.slane %v255_v46, 1  ;;  %v349_v54 = vrot.slane %v236_v38, 4  ;;  %v315_v55 = vadd.f32 %v314_v40, %v313_v20  ;;  %v350_v57 = vrot.slane %v243_v42, 3 }
  0xb3   :  { %v250_v44 = vadd.f32 %v249_v23, %v248_v14  ;;  %v321_v51 = vrot.slane %v320_v45, 1  ;;  %v327_v56 = vadd.f32 %v326_v50, %v325_v41  ;;  %v354_v61 = vrot.slane %v294_v48, 6 }
  0xb4   :  { %v257_v60 = vadd.f32 %v256_v52, %v255_v46  ;;  %v355_v62 = vrot.slane %v301_v49, 5  ;;  %v353_v24 = vrot.slane %v287_v34, 7  ;;  %v363_v43 = vsel %vm362_vm2, %v347_v35, %v348_v47 }
  0xb5   :  { %v322_v58 = vadd.f32 %v321_v51, %v320_v45  ;;  %v351_v59 = vrot.slane %v250_v44, 2  ;;  %v328_v63 = vrot.slane %v327_v56, 1  ;;  %v356_v1 = vrot.slane %v308_v53, 4 }
  0xb6   :  { %v352_v0 = vrot.slane %v257_v60, 1  ;;  %v357_v2 = vrot.slane %v315_v55, 3  ;;  %v280_v5 = vadd.f32 %v279_v27, %v470_v15  ;;  %v361_v6 = vsel %vm360_vm3, %v478_v26, %v346_v29 }
  0xb7   :  { %v358_v3 = vrot.slane %v322_v58, 2  ;;  %v329_v4 = vadd.f32 %v328_v63, %v327_v56  ;;  %v367_v7 = vsel %vm366_vm4, %v349_v54, %v350_v57  ;;  %v365_v9 = vsel %vm364_vm5, %v361_v6, %v363_v43 }
  0xb8   :  { %v369_v8 = vsel %vm368_vm6, %v351_v59, %v352_v0  ;;  %v374_v10 = vsel %vm362_vm2, %v354_v61, %v355_v62  ;;  %v373_v16 = vsel %vm360_vm3, %v280_v5, %v353_v24  ;;  %v376_v15 = vsel %vm366_vm4, %v356_v1, %v357_v2 }
  0xb9   :  { %v359_v11 = vrot.slane %v329_v4, 1  ;;  %v371_v12 = vsel %vm370_vm7, %v367_v7, %v369_v8  ;;  %v375_v26 = vsel %vm364_vm5, %v373_v16, %v374_v10 }
  0xba   :  { %v372_v14 = vsel %vm49_vm0, %v365_v9, %v371_v12 }
  0xbb   :  { %v377_v27 = vsel %vm368_vm6, %v358_v3, %v359_v11  ;;  %382 = vst [vmem:[%s527_s3] sm:$0xff] %v372_v14 }
  0xbc   :  { %v378_v17 = vsel %vm370_vm7, %v376_v15, %v377_v27 }
  0xbd   :  { %v379_v18 = vsel %vm49_vm0, %v375_v26, %v378_v17 }
  0xbe   :  { %383 = vst [vmem:[%s527_s3 + $0x8] sm:$0xff] %v379_v18 }

// kernel: netg_forward.6
= control target key start
LH: loop header
LB: loop body
LE: loop exit
PB: predicated region body
PF: predicated region fallthrough
CT: control target
= control target key end

     0   :  { %s846_s12 = smov 0   ;;  %s848_s13 = smov 0   ;;  %s909_s0 = inlined_call_operand.vmem [shape: bf16[4,32,256], index: 0, kind: input, shape index: {}]   ;;  %s910_s1 = inlined_call_operand.vmem [shape: bf16[4,256,128], index: 1, kind: input, shape index: {}]   ;;  %s911_s2 = inlined_call_operand.vmem [shape: bf16[4,32,128], index: 2, kind: output, shape index: {0}]   ;;  %s912_s3 = inlined_call_operand.vmem [shape: f32[4,1,1,256], index: 3, kind: output, shape index: {1}]  }
   0x1   :  { %s850_s14 = smov 0  }
   0x2 LB: > { %s26_s15 = sadd.s32 1, %s820_s13  ;;  %p638_p0 = scmp.ge.s32.totalorder %s824_s14, 1  ;;  %s824_s14 = sphi %s850_s14, %s14_s14   ;;  %s820_s13 = sphi %s848_s13, %s914_s13   ;;  %s816_s12 = sphi %s846_s12, %s913_s12  }
   0x3   : > { %p28_p1 = scmp.ge.s32.totalorder %s26_s15, 4  ;;  %p174_p2 = scmp.lt.s32.totalorder %s824_s14, 5 }
   0x5   : > { %s916_s15 = smov (%p28_p1, %s26_s15), 0  ;;  %p175_p3 = pnand %p638_p0, %p174_p2 }
   0x6   : > { %p221_p4 = scmp.lt.s32.totalorder (!%p175_p3), %s816_s12, 3 }
   0x7   : > { %178 = sbr.rel (%p175_p3) target bundleno = 210 (0xd2), region = 28 }
   0xc   : > { %s918_s12 = smov (!%p221_p4, %s816_s12), 3  ;;  %v480_v62 = vlaneseq  ;;  %vm477_vm0 = vcmask 1040384  }
   0xd   : > { %s729_s16 = sshll.u32 %s918_s12, 7  ;;  %s728_s20 = sshll.u32 %s918_s12, 5 }
   0xe   : > { %s870_s19 = scalar_lea.vmem %s910_s1, %s729_s16  ;;  %s229_s23 = scalar_lea.vmem %s909_s0, %s728_s20  ;;  %vm482_vm1 = vcmp.lt.s32.totalorder %v480_v62, 256 }
   0xf   : > { %v742_v0 = vld [vmem:[%s870_s19 + $0x38] sm:$0xff]  ;;  %v741_v2 = vld [vmem:[%s870_s19 + $0x30] sm:$0xff]  ;;  %v740_v4 = vld [vmem:[%s870_s19 + $0x28] sm:$0xff]  ;;  %s730_s24 = sshll.u32 %s918_s12, 4  ;;  %s645_s28 = sshll.u32 %s918_s12, 1 }
  0x10   : > { %v750_v1 = vld [vmem:[%s870_s19 + $0x78] sm:$0xff]  ;;  %406 = vmatpush.bf16.msra.mxu0 %v742_v0  ;;  %762 = vmatpush.bf16.msra.mxu2 %v742_v0  ;;  %v749_v3 = vld [vmem:[%s870_s19 + $0x70] sm:$0xff]  ;;  %v748_v5 = vld [vmem:[%s870_s19 + $0x68] sm:$0xff]  ;;  %s244_s27 = scalar_lea.vmem %s911_s2, %s730_s24  ;;  %s253_s4 = scalar_lea.vmem %s912_s3, %s645_s28 }
  0x11   : > { %425 = vmatpush.bf16.msra.mxu1 %v750_v1  ;;  %770 = vmatpush.bf16.msra.mxu3 %v750_v1  ;;  %v739_v6 = vld [vmem:[%s870_s19 + $0x20] sm:$0xff]  ;;  %v738_v8 = vld [vmem:[%s870_s19 + $0x18] sm:$0xff]  ;;  %v737_v10 = vld [vmem:[%s870_s19 + $0x10] sm:$0xff] }
  0x12   : > { %v747_v7 = vld [vmem:[%s870_s19 + $0x60] sm:$0xff]  ;;  %v746_v9 = vld [vmem:[%s870_s19 + $0x58] sm:$0xff]  ;;  %v745_v11 = vld [vmem:[%s870_s19 + $0x50] sm:$0xff] }
  0x13   : > { %v736_v12 = vld [vmem:[%s870_s19 + $0x8] sm:$0xff]  ;;  %v735_v14 = vld [vmem:[%s870_s19] sm:$0xff]  ;;  %v656_v18 = vld [vmem:[%s229_s23 + $0x10] sm:$0xf] }
  0x14   : > { %407 = vmatpush.bf16.msra.mxu0 %v741_v2  ;;  %763 = vmatpush.bf16.msra.mxu2 %v741_v2  ;;  %v744_v13 = vld [vmem:[%s870_s19 + $0x48] sm:$0xff]  ;;  %v743_v15 = vld [vmem:[%s870_s19 + $0x40] sm:$0xff]  ;;  %v734_v19 = vld [vmem:[%s229_s23 + $0x14] sm:$0xf0] }
  0x15   : > { %426 = vmatpush.bf16.msra.mxu1 %v749_v3  ;;  %771 = vmatpush.bf16.msra.mxu3 %v749_v3  ;;  %v648_v16 = vld [vmem:[%s229_s23] sm:$0xf]  ;;  %v732_v17 = vld [vmem:[%s229_s23 + $0x4] sm:$0xf0]  ;;  %v731_v20 = vld [vmem:[%s229_s23 + $0x4] sm:$0xf]  ;;  %v657_v25 = vor.u32 %v734_v19, %v656_v18 }
  0x16   : > { %v650_v21 = vld [vmem:[%s229_s23 + $0x8] sm:$0xf0]  ;;  %v733_v22 = vld [vmem:[%s229_s23 + $0x14] sm:$0xf]  ;;  %v658_v23 = vld [vmem:[%s229_s23 + $0x18] sm:$0xf0]  ;;  %v649_v24 = vor.u32 %v732_v17, %v648_v16 }
  0x17   : > { %v653_v26 = vor.u32 %v731_v20, %v650_v21  ;;  %v661_v27 = vor.u32 %v733_v22, %v658_v23 }
  0x18   : > { %408 = vmatpush.bf16.msra.mxu0 %v740_v4  ;;  %764 = vmatpush.bf16.msra.mxu2 %v740_v4 }
  0x19   : > { %427 = vmatpush.bf16.msra.mxu1 %v748_v5  ;;  %772 = vmatpush.bf16.msra.mxu3 %v748_v5 }
  0x1c   : > { %409 = vmatpush.bf16.msra.mxu0 %v739_v6  ;;  %765 = vmatpush.bf16.msra.mxu2 %v739_v6 }
  0x1d   : > { %428 = vmatpush.bf16.msra.mxu1 %v747_v7  ;;  %773 = vmatpush.bf16.msra.mxu3 %v747_v7 }
  0x20   : > { %410 = vmatpush.bf16.msra.mxu0 %v738_v8  ;;  %766 = vmatpush.bf16.msra.mxu2 %v738_v8 }
  0x21   : > { %429 = vmatpush.bf16.msra.mxu1 %v746_v9  ;;  %774 = vmatpush.bf16.msra.mxu3 %v746_v9 }
  0x24   : > { %411 = vmatpush.bf16.msra.mxu0 %v737_v10  ;;  %767 = vmatpush.bf16.msra.mxu2 %v737_v10 }
  0x25   : > { %430 = vmatpush.bf16.msra.mxu1 %v745_v11  ;;  %775 = vmatpush.bf16.msra.mxu3 %v745_v11 }
  0x28   : > { %412 = vmatpush.bf16.msra.mxu0 %v736_v12  ;;  %768 = vmatpush.bf16.msra.mxu2 %v736_v12 }
  0x29   : > { %431 = vmatpush.bf16.msra.mxu1 %v744_v13  ;;  %776 = vmatpush.bf16.msra.mxu3 %v744_v13 }
  0x2c   : > { %413 = vmatpush.bf16.msra.mxu0 %v735_v14  ;;  %769 = vmatpush.bf16.msra.mxu2 %v735_v14 }
  0x2d   : > { %432 = vmatpush.bf16.msra.mxu1 %v743_v15  ;;  %777 = vmatpush.bf16.msra.mxu3 %v743_v15 }
  0x2f   : > { %414 = vmatmul.bf16.vlgmr.msra.gmra.mxu0 %v649_v24  ;;  %419 = vmatmul.bf16.vlgmr.msra.gmra.mxu2 %v657_v25 }
  0x30   : > { %433 = vmatmul.bf16.vlgmr.msra.gmra.mxu1 %v653_v26  ;;  %438 = vmatmul.bf16.vlgmr.msra.gmra.mxu3 %v661_v27 }
  0xac   : > { %v415_v28 = vpop.f32.mrf.mxu0 }
  0xad   : > { %v434_v29 = vpop.f32.mrf.mxu1 }
  0xae   : > { %v435_v31 = vadd.f32 %v434_v29, %v415_v28 }
  0xb0   : > { %v461_v36 = vmul.f32 %v435_v31, %v435_v31 }
  0xb2   : > { %v420_v30 = vpop.f32.mrf.mxu2 }
  0xb3   : > { %v439_v32 = vpop.f32.mrf.mxu3 }
  0xb4   : > { %v417_v33 = vpop.f32.mrf.mxu0  ;;  %v440_v37 = vadd.f32 %v439_v32, %v420_v30 }
  0xb5   : > { %v436_v34 = vpop.f32.mrf.mxu1 }
  0xb6   : > { %v437_v35 = vadd.f32 %v436_v34, %v417_v33  ;;  %v463_v44 = vmul.f32 %v440_v37, %v440_v37 }
  0xb8   : > { %v754_v38 = vpack.c.bf16 %v437_v35, %v435_v31  ;;  %v452_v39 = vadd.f32 %v437_v35, %v435_v31  ;;  %v462_v40 = vmul.f32 %v437_v35, %v437_v35 }
  0xba   : > { %755 = vst [vmem:[%s244_s27] sm:$0xff] %v754_v38   ;;  %v465_v41 = vadd.f32 %v462_v40, %v461_v36  ;;  %v422_v42 = vpop.f32.mrf.mxu2  ;;  %v453_v46 = vadd.f32 %v452_v39, %v440_v37 }
  0xbb   : > { %v441_v43 = vpop.f32.mrf.mxu3 }
  0xbc   : > { %v442_v45 = vadd.f32 %v441_v43, %v422_v42  ;;  %v466_v50 = vadd.f32 %v465_v41, %v463_v44 }
  0xbe   : > { %v759_v47 = vpack.c.bf16 %v442_v45, %v440_v37  ;;  %v454_v48 = vadd.f32 %v453_v46, %v442_v45  ;;  %v464_v49 = vmul.f32 %v442_v45, %v442_v45 }
  0xc0   : > { %761 = vst [vmem:[%s244_s27 + $0x8] sm:$0xff] %v759_v47   ;;  %v455_v51 = vrot.slane %v454_v48, 4  ;;  %v467_v52 = vadd.f32 %v466_v50, %v464_v49 }
  0xc2   : > { %v456_v53 = vadd.f32 %v455_v51, %v454_v48  ;;  %v468_v54 = vrot.slane %v467_v52, 4 }
  0xc4   : > { %v457_v55 = vrot.slane %v456_v53, 2  ;;  %v469_v56 = vadd.f32 %v468_v54, %v467_v52 }
  0xc6   : > { %v458_v57 = vadd.f32 %v457_v55, %v456_v53  ;;  %v470_v58 = vrot.slane %v469_v56, 2 }
  0xc8   : > { %v471_v59 = vadd.f32 %v470_v58, %v469_v56  ;;  %v459_v60 = vrot.slane %v458_v57, 1 }
  0xca   : > { %v472_v61 = vrot.slane %v471_v59, 1  ;;  %v460_v0 = vadd.f32 %v459_v60, %v458_v57 }
  0xcc   : > { %v473_v63 = vadd.f32 %v472_v61, %v471_v59 }
  0xce   : > { %v476_v1 = vrot.slane %v473_v63, 7 }
  0xd0   : > { %v478_v2 = vsel %vm477_vm0, %v460_v0, %v476_v1 }
  0xd1   : > { %484 = vst.msk [vmem:[%s253_s4] sm:$0x3] %vm482_vm1, %v478_v2 }
  0xd2 PF: > { %s14_s14 = sadd.s32 1, %s824_s14   ;;  %s913_s12 = smov %s820_s13 }
  0xd3   : > { %p11_p5 = scmp.ge.s32.totalorder %s14_s14, 6   ;;  %s914_s13 = smov %s916_s15 }
  0xd5   :  { %13 = sbr.rel (!%p11_p5) target bundleno = 2 (0x2), region = 73 }

// kernel: netg_forward.7
= control target key start
LH: loop header
LB: loop body
LE: loop exit
PB: predicated region body
PF: predicated region fallthrough
CT: control target
= control target key end

     0   :  { %s911_s12 = smov 0   ;;  %s913_s13 = smov 0   ;;  %s985_s0 = inlined_call_operand.vmem [shape: bf16[4,128,128], index: 0, kind: input, shape index: {}]   ;;  %s986_s1 = inlined_call_operand.vmem [shape: bf16[4,128,128], index: 1, kind: input, shape index: {}]   ;;  %s987_s2 = inlined_call_operand.vmem [shape: bf16[4,128,128], index: 2, kind: output, shape index: {0}]   ;;  %s988_s3 = inlined_call_operand.vmem [shape: f32[4,1,1,256], index: 3, kind: output, shape index: {1}]  }
   0x1   :  { %s915_s14 = smov 0  }
   0x2 LB: > { %s26_s15 = sadd.s32 1, %s885_s13  ;;  %p679_p0 = scmp.ge.s32.totalorder %s889_s14, 1  ;;  %s889_s14 = sphi %s915_s14, %s14_s14   ;;  %s885_s13 = sphi %s913_s13, %s990_s13   ;;  %s881_s12 = sphi %s911_s12, %s989_s12  }
   0x3   : > { %p28_p1 = scmp.ge.s32.totalorder %s26_s15, 4  ;;  %p173_p2 = scmp.lt.s32.totalorder %s889_s14, 5 }
   0x5   : > { %s992_s15 = smov (%p28_p1, %s26_s15), 0  ;;  %p174_p3 = pnand %p679_p0, %p173_p2 }
   0x6   : > { %p219_p4 = scmp.lt.s32.totalorder (!%p174_p3), %s881_s12, 3 }
   0x7   : > { %177 = sbr.rel (%p174_p3) target bundleno = 241 (0xf1), region = 28 }
   0xc   : > { %s994_s12 = smov (!%p219_p4, %s881_s12), 3  ;;  %vm521_vm0 = vcmask 1040384  }
   0xd   : > { %s932_s16 = sshll.u32 %s994_s12, 6  ;;  %s686_s26 = sshll.u32 %s994_s12, 1 }
   0xe   : > { %s938_s19 = scalar_lea.vmem %s986_s1, %s932_s16  ;;  %s226_s22 = scalar_lea.vmem %s985_s0, %s932_s16 }
   0xf   : > { %v771_v0 = vld [vmem:[%s938_s19 + $0x38] sm:$0xff]  ;;  %v770_v1 = vld [vmem:[%s938_s19 + $0x30] sm:$0xff]  ;;  %v769_v2 = vld [vmem:[%s938_s19 + $0x28] sm:$0xff]  ;;  %s958_s25 = scalar_lea.vmem %s987_s2, %s932_s16  ;;  %s250_s29 = scalar_lea.vmem %s988_s3, %s686_s26 }
  0x10   : > { %379 = vmatpush.bf16.msra.mxu0 %v771_v0  ;;  %819 = vmatpush.bf16.msra.mxu1 %v771_v0  ;;  %v768_v3 = vld [vmem:[%s938_s19 + $0x20] sm:$0xff]  ;;  %v767_v4 = vld [vmem:[%s938_s19 + $0x18] sm:$0xff]  ;;  %v766_v5 = vld [vmem:[%s938_s19 + $0x10] sm:$0xff] }
  0x11   : > { %820 = vmatpush.bf16.msra.mxu2 %v771_v0  ;;  %821 = vmatpush.bf16.msra.mxu3 %v771_v0  ;;  %v765_v6 = vld [vmem:[%s938_s19 + $0x8] sm:$0xff]  ;;  %v764_v7 = vld [vmem:[%s938_s19] sm:$0xff]  ;;  %v758_v9 = vld [vmem:[%s226_s22 + $0x10] sm:$0xff] }
  0x12   : > { %v756_v8 = vld [vmem:[%s226_s22] sm:$0xff]  ;;  %v762_v11 = vld [vmem:[%s226_s22 + $0x30] sm:$0xff]  ;;  %v757_v12 = vld [vmem:[%s226_s22 + $0x8] sm:$0xff] }
  0x13   : > { %v760_v10 = vld [vmem:[%s226_s22 + $0x20] sm:$0xff]  ;;  %v759_v13 = vld [vmem:[%s226_s22 + $0x18] sm:$0xff]  ;;  %v761_v14 = vld [vmem:[%s226_s22 + $0x28] sm:$0xff] }
  0x14   : > { %380 = vmatpush.bf16.msra.mxu0 %v770_v1  ;;  %822 = vmatpush.bf16.msra.mxu1 %v770_v1  ;;  %v763_v15 = vld [vmem:[%s226_s22 + $0x38] sm:$0xff] }
  0x15   : > { %823 = vmatpush.bf16.msra.mxu2 %v770_v1  ;;  %824 = vmatpush.bf16.msra.mxu3 %v770_v1 }
  0x18   : > { %381 = vmatpush.bf16.msra.mxu0 %v769_v2  ;;  %825 = vmatpush.bf16.msra.mxu1 %v769_v2 }
  0x19   : > { %826 = vmatpush.bf16.msra.mxu2 %v769_v2  ;;  %827 = vmatpush.bf16.msra.mxu3 %v769_v2 }
  0x1c   : > { %382 = vmatpush.bf16.msra.mxu0 %v768_v3  ;;  %828 = vmatpush.bf16.msra.mxu1 %v768_v3 }
  0x1d   : > { %829 = vmatpush.bf16.msra.mxu2 %v768_v3  ;;  %830 = vmatpush.bf16.msra.mxu3 %v768_v3 }
  0x20   : > { %383 = vmatpush.bf16.msra.mxu0 %v767_v4  ;;  %831 = vmatpush.bf16.msra.mxu1 %v767_v4 }
  0x21   : > { %832 = vmatpush.bf16.msra.mxu2 %v767_v4  ;;  %833 = vmatpush.bf16.msra.mxu3 %v767_v4 }
  0x24   : > { %384 = vmatpush.bf16.msra.mxu0 %v766_v5  ;;  %834 = vmatpush.bf16.msra.mxu1 %v766_v5 }
  0x25   : > { %835 = vmatpush.bf16.msra.mxu2 %v766_v5  ;;  %836 = vmatpush.bf16.msra.mxu3 %v766_v5 }
  0x28   : > { %385 = vmatpush.bf16.msra.mxu0 %v765_v6  ;;  %837 = vmatpush.bf16.msra.mxu1 %v765_v6 }
  0x29   : > { %838 = vmatpush.bf16.msra.mxu2 %v765_v6  ;;  %839 = vmatpush.bf16.msra.mxu3 %v765_v6 }
  0x2c   : > { %386 = vmatpush.bf16.msra.mxu0 %v764_v7  ;;  %840 = vmatpush.bf16.msra.mxu1 %v764_v7 }
  0x2d   : > { %841 = vmatpush.bf16.msra.mxu2 %v764_v7  ;;  %842 = vmatpush.bf16.msra.mxu3 %v764_v7 }
  0x2f   : > { %387 = vmatmul.bf16.vlgmr.msra.gmra.mxu0 %v756_v8  ;;  %397 = vmatmul.bf16.vlgmr.msra.gmra.mxu1 %v758_v9 }
  0x30   : > { %407 = vmatmul.bf16.vlgmr.msra.gmra.mxu2 %v760_v10  ;;  %417 = vmatmul.bf16.vlgmr.msra.gmra.mxu3 %v762_v11 }
  0x3f   : > { %392 = vmatmul.bf16.gmra.mxu0 %v757_v12  ;;  %402 = vmatmul.bf16.gmra.mxu1 %v759_v13 }
  0x40   : > { %412 = vmatmul.bf16.gmra.mxu2 %v761_v14  ;;  %422 = vmatmul.bf16.gmra.mxu3 %v763_v15 }
  0xac   : > { %v388_v16 = vpop.f32.mrf.mxu0  ;;  %v398_v17 = vpop.f32.mrf.mxu1 }
  0xad   : > { %v481_v31 = vmul.f32 %v388_v16, %v388_v16  ;;  %v485_v45 = vmul.f32 %v398_v17, %v398_v17 }
  0xb3   : > { %v408_v18 = vpop.f32.mrf.mxu2  ;;  %v952_v19 = vpop.f32.mrf.mxu3 }
  0xb4   : > { %v390_v20 = vpop.f32.mrf.mxu0  ;;  %v400_v21 = vpop.f32.mrf.mxu1  ;;  %v489_v61 = vmul.f32 %v408_v18, %v408_v18  ;;  %v493_v9 = vmul.f32 %v952_v19, %v952_v19 }
  0xb5   : > { %v775_v22 = vpack.c.bf16 %v390_v20, %v388_v16  ;;  %v785_v23 = vpack.c.bf16 %v400_v21, %v398_v17  ;;  %v482_v30 = vmul.f32 %v390_v20, %v390_v20  ;;  %v460_v33 = vadd.f32 %v390_v20, %v388_v16 }
  0xb6   : > { %v486_v48 = vmul.f32 %v400_v21, %v400_v21 }
  0xb7   : > { %776 = vst [vmem:[%s958_s25] sm:$0xff] %v775_v22   ;;  %v497_v34 = vadd.f32 %v482_v30, %v481_v31 }
  0xb8   : > { %813 = vst [vmem:[%s958_s25 + $0x10] sm:$0xff] %v785_v23  }
  0xbb   : > { %v410_v24 = vpop.f32.mrf.mxu2  ;;  %v420_v25 = vpop.f32.mrf.mxu3 }
  0xbc   : > { %v393_v26 = vpop.f32.mrf.mxu0  ;;  %v403_v27 = vpop.f32.mrf.mxu1  ;;  %v795_v28 = vpack.c.bf16 %v410_v24, %v408_v18  ;;  %v805_v29 = vpack.c.bf16 %v420_v25, %v952_v19  ;;  %v490_v0 = vmul.f32 %v410_v24, %v410_v24  ;;  %v494_v12 = vmul.f32 %v420_v25, %v420_v25 }
  0xbd   : > { %v483_v32 = vmul.f32 %v393_v26, %v393_v26  ;;  %v461_v35 = vadd.f32 %v460_v33, %v393_v26  ;;  %v487_v51 = vmul.f32 %v403_v27, %v403_v27  ;;  %v524_v33 = vlaneseq }
  0xbe   : > { %815 = vst [vmem:[%s958_s25 + $0x20] sm:$0xff] %v795_v28  }
  0xbf   : > { %817 = vst [vmem:[%s958_s25 + $0x30] sm:$0xff] %v805_v29   ;;  %v498_v38 = vadd.f32 %v497_v34, %v483_v32  ;;  %vm526_vm1 = vcmp.lt.s32.totalorder %v524_v33, 256 }
  0xc3   : > { %v413_v36 = vpop.f32.mrf.mxu2  ;;  %v423_v37 = vpop.f32.mrf.mxu3 }
  0xc4   : > { %v395_v39 = vpop.f32.mrf.mxu0  ;;  %v405_v40 = vpop.f32.mrf.mxu1  ;;  %v491_v4 = vmul.f32 %v413_v36, %v413_v36  ;;  %v495_v16 = vmul.f32 %v423_v37, %v423_v37 }
  0xc5   : > { %v780_v41 = vpack.c.bf16 %v395_v39, %v393_v26  ;;  %v462_v42 = vadd.f32 %v461_v35, %v395_v39  ;;  %v484_v43 = vmul.f32 %v395_v39, %v395_v39  ;;  %v790_v44 = vpack.c.bf16 %v405_v40, %v403_v27 }
  0xc6   : > { %v488_v59 = vmul.f32 %v405_v40, %v405_v40 }
  0xc7   : > { %812 = vst [vmem:[%s958_s25 + $0x8] sm:$0xff] %v780_v41   ;;  %v463_v46 = vadd.f32 %v462_v42, %v398_v17  ;;  %v499_v47 = vadd.f32 %v498_v38, %v484_v43 }
  0xc8   : > { %814 = vst [vmem:[%s958_s25 + $0x18] sm:$0xff] %v790_v44  }
  0xc9   : > { %v500_v49 = vadd.f32 %v499_v47, %v485_v45  ;;  %v464_v50 = vadd.f32 %v463_v46, %v400_v21 }
  0xcb   : > { %v465_v52 = vadd.f32 %v464_v50, %v403_v27  ;;  %v501_v53 = vadd.f32 %v500_v49, %v486_v48  ;;  %v415_v54 = vpop.f32.mrf.mxu2  ;;  %v425_v55 = vpop.f32.mrf.mxu3 }
  0xcc   : > { %v800_v56 = vpack.c.bf16 %v415_v54, %v413_v36  ;;  %v810_v57 = vpack.c.bf16 %v425_v55, %v423_v37  ;;  %v492_v8 = vmul.f32 %v415_v54, %v415_v54  ;;  %v496_v21 = vmul.f32 %v425_v55, %v425_v55 }
  0xcd   : > { %v466_v58 = vadd.f32 %v465_v52, %v405_v40  ;;  %v502_v60 = vadd.f32 %v501_v53, %v487_v51 }
  0xce   : > { %816 = vst [vmem:[%s958_s25 + $0x28] sm:$0xff] %v800_v56  }
  0xcf   : > { %v467_v62 = vadd.f32 %v466_v58, %v408_v18  ;;  %v503_v63 = vadd.f32 %v502_v60, %v488_v59  ;;  %818 = vst [vmem:[%s958_s25 + $0x38] sm:$0xff] %v810_v57  }
  0xd1   : > { %v504_v1 = vadd.f32 %v503_v63, %v489_v61  ;;  %v468_v2 = vadd.f32 %v467_v62, %v410_v24 }
  0xd3   : > { %v469_v3 = vadd.f32 %v468_v2, %v413_v36  ;;  %v505_v5 = vadd.f32 %v504_v1, %v490_v0 }
  0xd5   : > { %v506_v6 = vadd.f32 %v505_v5, %v491_v4  ;;  %v470_v7 = vadd.f32 %v469_v3, %v415_v54 }
  0xd7   : > { %v471_v10 = vadd.f32 %v470_v7, %v952_v19  ;;  %v507_v11 = vadd.f32 %v506_v6, %v492_v8 }
  0xd9   : > { %v508_v13 = vadd.f32 %v507_v11, %v493_v9  ;;  %v472_v14 = vadd.f32 %v471_v10, %v420_v25 }
  0xdb   : > { %v473_v15 = vadd.f32 %v472_v14, %v423_v37  ;;  %v509_v17 = vadd.f32 %v508_v13, %v494_v12 }
  0xdd   : > { %v510_v18 = vadd.f32 %v509_v17, %v495_v16  ;;  %v474_v20 = vadd.f32 %v473_v15, %v425_v55 }
  0xdf   : > { %v475_v22 = vrot.slane %v474_v20, 4  ;;  %v511_v23 = vadd.f32 %v510_v18, %v496_v21 }
  0xe1   : > { %v476_v24 = vadd.f32 %v475_v22, %v474_v20  ;;  %v512_v26 = vrot.slane %v511_v23, 4 }
  0xe3   : > { %v477_v27 = vrot.slane %v476_v24, 2  ;;  %v513_v28 = vadd.f32 %v512_v26, %v511_v23 }
  0xe5   : > { %v478_v29 = vadd.f32 %v477_v27, %v476_v24  ;;  %v514_v30 = vrot.slane %v513_v28, 2 }
  0xe7   : > { %v515_v19 = vadd.f32 %v514_v30, %v513_v28  ;;  %v479_v31 = vrot.slane %v478_v29, 1 }
  0xe9   : > { %v516_v32 = vrot.slane %v515_v19, 1  ;;  %v480_v34 = vadd.f32 %v479_v31, %v478_v29 }
  0xeb   : > { %v517_v25 = vadd.f32 %v516_v32, %v515_v19 }
  0xed   : > { %v520_v35 = vrot.slane %v517_v25, 7 }
  0xef   : > { %v522_v36 = vsel %vm521_vm0, %v480_v34, %v520_v35 }
  0xf0   : > { %528 = vst.msk [vmem:[%s250_s29] sm:$0x3] %vm526_vm1, %v522_v36 }
  0xf1 PF: > { %s14_s14 = sadd.s32 1, %s889_s14   ;;  %s989_s12 = smov %s885_s13 }
  0xf2   : > { %p11_p5 = scmp.ge.s32.totalorder %s14_s14, 6   ;;  %s990_s13 = smov %s992_s15 }
  0xf4   :  { %13 = sbr.rel (!%p11_p5) target bundleno = 2 (0x2), region = 73 }

// kernel: netg_forward.8
= control target key start
LH: loop header
LB: loop body
LE: loop exit
PB: predicated region body
PF: predicated region fallthrough
CT: control target
= control target key end

     0   :  { %s1761_s12 = smov 0   ;;  %s1763_s13 = smov 0   ;;  %s2194_s0 = inlined_call_operand.vmem [shape: bf16[4,512,64], index: 0, kind: input, shape index: {}]   ;;  %s2195_s1 = inlined_call_operand.vmem [shape: bf16[4,64,128], index: 1, kind: input, shape index: {}]   ;;  %s2196_s2 = inlined_call_operand.vmem [shape: bf16[4,512,128], index: 2, kind: output, shape index: {0}]   ;;  %s2197_s3 = inlined_call_operand.vmem [shape: f32[4,1,1,256], index: 3, kind: output, shape index: {1}]  }
   0x1   :  { %s1765_s14 = smov 0  }
   0x2 LB: > { %s26_s15 = sadd.s32 1, %s1735_s13  ;;  %p1265_p0 = scmp.ge.s32.totalorder %s1739_s14, 1  ;;  %s1739_s14 = sphi %s1765_s14, %s14_s14   ;;  %s1735_s13 = sphi %s1763_s13, %s2199_s13   ;;  %s1731_s12 = sphi %s1761_s12, %s2198_s12  }
   0x3   : > { %p28_p1 = scmp.ge.s32.totalorder %s26_s15, 4  ;;  %p173_p2 = scmp.lt.s32.totalorder %s1739_s14, 5 }
   0x5   : > { %s2201_s15 = smov (%p28_p1, %s26_s15), 0  ;;  %p174_p3 = pnand %p1265_p0, %p173_p2 }
   0x6   : > { %p219_p4 = scmp.lt.s32.totalorder (!%p174_p3), %s1731_s12, 3 }
   0x7   : > { %177 = sbr.rel (%p174_p3) target bundleno = 393 (0x189), region = 28 }
   0xc   : > { %s2203_s12 = smov (!%p219_p4, %s1731_s12), 3  ;;  %vm508_vm0 = vcmask 523264   ;;  %vm1107_vm1 = vcmask 1040384  }
   0xd   : > { %s1452_s16 = sshll.u32 %s2203_s12, 5  ;;  %s1451_s20 = sshll.u32 %s2203_s12, 8 }
   0xe   : > { %s232_s19 = scalar_lea.vmem %s2195_s1, %s1452_s16  ;;  %s1791_s23 = scalar_lea.vmem %s2194_s0, %s1451_s20 }
   0xf   : > { %v1489_v0 = vld [vmem:[%s232_s19 + $0x18] sm:$0xff]  ;;  %v1488_v1 = vld [vmem:[%s232_s19 + $0x10] sm:$0xff]  ;;  %v1487_v2 = vld [vmem:[%s232_s19 + $0x8] sm:$0xff]  ;;  %s1860_s26 = scalar_lea.vmem %s2196_s2, %s1451_s20  ;;  %s1272_s27 = sshll.u32 %s2203_s12, 1 }
  0x10   : > { %609 = vmatpush.bf16.msra.mxu0 %v1489_v0  ;;  %1681 = vmatpush.bf16.msra.mxu1 %v1489_v0  ;;  %v1486_v3 = vld [vmem:[%s232_s19] sm:$0xff]  ;;  %v1455_v6 = vld [vmem:[%s1791_s23 + $0x8] sm:$0xff]  ;;  %v1456_v9 = vld [vmem:[%s1791_s23 + $0x10] sm:$0xff]  ;;  %s250_s30 = scalar_lea.vmem %s2197_s3, %s1272_s27 }
  0x11   : > { %1682 = vmatpush.bf16.msra.mxu2 %v1489_v0  ;;  %1683 = vmatpush.bf16.msra.mxu3 %v1489_v0  ;;  %v1454_v4 = vld [vmem:[%s1791_s23] sm:$0xff]  ;;  %v1463_v7 = vld [vmem:[%s1791_s23 + $0x48] sm:$0xff]  ;;  %v1464_v10 = vld [vmem:[%s1791_s23 + $0x50] sm:$0xff] }
  0x12   : > { %v1462_v5 = vld [vmem:[%s1791_s23 + $0x40] sm:$0xff]  ;;  %v1471_v11 = vld [vmem:[%s1791_s23 + $0x88] sm:$0xff]  ;;  %v1457_v12 = vld [vmem:[%s1791_s23 + $0x18] sm:$0xff] }
  0x13   : > { %v1470_v8 = vld [vmem:[%s1791_s23 + $0x80] sm:$0xff]  ;;  %v1465_v13 = vld [vmem:[%s1791_s23 + $0x58] sm:$0xff]  ;;  %v1472_v14 = vld [vmem:[%s1791_s23 + $0x90] sm:$0xff] }
  0x14   : > { %610 = vmatpush.bf16.msra.mxu0 %v1488_v1  ;;  %1684 = vmatpush.bf16.msra.mxu1 %v1488_v1  ;;  %v1478_v15 = vld [vmem:[%s1791_s23 + $0xc0] sm:$0xff]  ;;  %v1473_v18 = vld [vmem:[%s1791_s23 + $0x98] sm:$0xff]  ;;  %v1479_v19 = vld [vmem:[%s1791_s23 + $0xc8] sm:$0xff] }
  0x15   : > { %1685 = vmatpush.bf16.msra.mxu2 %v1488_v1  ;;  %1686 = vmatpush.bf16.msra.mxu3 %v1488_v1  ;;  %v1458_v16 = vld [vmem:[%s1791_s23 + $0x20] sm:$0xff]  ;;  %v1459_v20 = vld [vmem:[%s1791_s23 + $0x28] sm:$0xff]  ;;  %v1480_v23 = vld [vmem:[%s1791_s23 + $0xd0] sm:$0xff] }
  0x16   : > { %v1466_v17 = vld [vmem:[%s1791_s23 + $0x60] sm:$0xff]  ;;  %v1467_v21 = vld [vmem:[%s1791_s23 + $0x68] sm:$0xff]  ;;  %v1460_v24 = vld [vmem:[%s1791_s23 + $0x30] sm:$0xff] }
  0x17   : > { %v1474_v22 = vld [vmem:[%s1791_s23 + $0xa0] sm:$0xff]  ;;  %v1468_v25 = vld [vmem:[%s1791_s23 + $0x70] sm:$0xff]  ;;  %v1475_v26 = vld [vmem:[%s1791_s23 + $0xa8] sm:$0xff] }
  0x18   : > { %611 = vmatpush.bf16.msra.mxu0 %v1487_v2  ;;  %1687 = vmatpush.bf16.msra.mxu1 %v1487_v2  ;;  %v1481_v27 = vld [vmem:[%s1791_s23 + $0xd8] sm:$0xff]  ;;  %v1476_v30 = vld [vmem:[%s1791_s23 + $0xb0] sm:$0xff]  ;;  %v1482_v31 = vld [vmem:[%s1791_s23 + $0xe0] sm:$0xff] }
  0x19   : > { %1688 = vmatpush.bf16.msra.mxu2 %v1487_v2  ;;  %1689 = vmatpush.bf16.msra.mxu3 %v1487_v2  ;;  %v1461_v28 = vld [vmem:[%s1791_s23 + $0x38] sm:$0xff]  ;;  %v1483_v35 = vld [vmem:[%s1791_s23 + $0xe8] sm:$0xff]  ;;  %v1484_v49 = vld [vmem:[%s1791_s23 + $0xf0] sm:$0xff] }
  0x1a   : > { %v1469_v29 = vld [vmem:[%s1791_s23 + $0x78] sm:$0xff] }
  0x1b   : > { %v1477_v34 = vld [vmem:[%s1791_s23 + $0xb8] sm:$0xff] }
  0x1c   : > { %612 = vmatpush.bf16.msra.mxu0 %v1486_v3  ;;  %1690 = vmatpush.bf16.msra.mxu1 %v1486_v3  ;;  %v1485_v1 = vld [vmem:[%s1791_s23 + $0xf8] sm:$0xff] }
  0x1d   : > { %1691 = vmatpush.bf16.msra.mxu2 %v1486_v3  ;;  %1692 = vmatpush.bf16.msra.mxu3 %v1486_v3 }
  0x1f   : > { %1417 = vmatmul.msk.bf16.vlgmr.msra.gmra.mxu0 %vm508_vm0, %v1454_v4  ;;  %1425 = vmatmul.msk.bf16.vlgmr.msra.gmra.mxu1 %vm508_vm0, %v1462_v5 }
  0x20   : > { %1433 = vmatmul.msk.bf16.vlgmr.msra.gmra.mxu2 %vm508_vm0, %v1470_v8  ;;  %1441 = vmatmul.msk.bf16.vlgmr.msra.gmra.mxu3 %vm508_vm0, %v1478_v15 }
  0x2f   : > { %1418 = vmatmul.msk.bf16.gmra.mxu0 %vm508_vm0, %v1455_v6  ;;  %1426 = vmatmul.msk.bf16.gmra.mxu1 %vm508_vm0, %v1463_v7 }
  0x30   : > { %1434 = vmatmul.msk.bf16.gmra.mxu2 %vm508_vm0, %v1471_v11  ;;  %1442 = vmatmul.msk.bf16.gmra.mxu3 %vm508_vm0, %v1479_v19 }
  0x3f   : > { %1419 = vmatmul.msk.bf16.gmra.mxu0 %vm508_vm0, %v1456_v9  ;;  %1427 = vmatmul.msk.bf16.gmra.mxu1 %vm508_vm0, %v1464_v10 }
  0x40   : > { %1435 = vmatmul.msk.bf16.gmra.mxu2 %vm508_vm0, %v1472_v14  ;;  %1443 = vmatmul.msk.bf16.gmra.mxu3 %vm508_vm0, %v1480_v23 }
  0x4f   : > { %1420 = vmatmul.msk.bf16.gmra.mxu0 %vm508_vm0, %v1457_v12  ;;  %1428 = vmatmul.msk.bf16.gmra.mxu1 %vm508_vm0, %v1465_v13 }
  0x50   : > { %1436 = vmatmul.msk.bf16.gmra.mxu2 %vm508_vm0, %v1473_v18  ;;  %1444 = vmatmul.msk.bf16.gmra.mxu3 %vm508_vm0, %v1481_v27 }
  0x5f   : > { %1421 = vmatmul.msk.bf16.gmra.mxu0 %vm508_vm0, %v1458_v16  ;;  %1429 = vmatmul.msk.bf16.gmra.mxu1 %vm508_vm0, %v1466_v17 }
  0x60   : > { %1437 = vmatmul.msk.bf16.gmra.mxu2 %vm508_vm0, %v1474_v22  ;;  %1445 = vmatmul.msk.bf16.gmra.mxu3 %vm508_vm0, %v1482_v31 }
  0x6f   : > { %1422 = vmatmul.msk.bf16.gmra.mxu0 %vm508_vm0, %v1459_v20  ;;  %1430 = vmatmul.msk.bf16.gmra.mxu1 %vm508_vm0, %v1467_v21 }
  0x70   : > { %1438 = vmatmul.msk.bf16.gmra.mxu2 %vm508_vm0, %v1475_v26  ;;  %1446 = vmatmul.msk.bf16.gmra.mxu3 %vm508_vm0, %v1483_v35 }
  0x7f   : > { %1423 = vmatmul.msk.bf16.gmra.mxu0 %vm508_vm0, %v1460_v24  ;;  %1431 = vmatmul.msk.bf16.gmra.mxu1 %vm508_vm0, %v1468_v25 }
  0x80   : > { %1439 = vmatmul.msk.bf16.gmra.mxu2 %vm508_vm0, %v1476_v30  ;;  %1447 = vmatmul.msk.bf16.gmra.mxu3 %vm508_vm0, %v1484_v49 }
  0x8f   : > { %1424 = vmatmul.msk.bf16.gmra.mxu0 %vm508_vm0, %v1461_v28  ;;  %1432 = vmatmul.msk.bf16.gmra.mxu1 %vm508_vm0, %v1469_v29 }
  0x90   : > { %1440 = vmatmul.msk.bf16.gmra.mxu2 %vm508_vm0, %v1477_v34  ;;  %1448 = vmatmul.msk.bf16.gmra.mxu3 %vm508_vm0, %v1485_v1 }
  0x9c   : > { %v614_v32 = vpop.f32.mrf.mxu0  ;;  %v1849_v33 = vpop.f32.mrf.mxu1 }
  0x9d   : > { %v971_v36 = vmul.f32 %v614_v32, %v614_v32 }
  0xa3   : > { %v1876_v56 = vpop.f32.mrf.mxu2  ;;  %v1912_v17 = vpop.f32.mrf.mxu3 }
  0xa4   : > { %v616_v37 = vpop.f32.mrf.mxu0  ;;  %v1862_v38 = vpop.f32.mrf.mxu1 }
  0xa5   : > { %v1493_v39 = vpack.c.bf16 %v616_v37, %v614_v32  ;;  %v902_v40 = vadd.f32 %v616_v37, %v614_v32  ;;  %v972_v41 = vmul.f32 %v616_v37, %v616_v37  ;;  %v1533_v42 = vpack.c.bf16 %v1862_v38, %v1849_v33 }
  0xa7   : > { %1494 = vst [vmem:[%s1860_s26] sm:$0xff] %v1493_v39   ;;  %v1035_v43 = vadd.f32 %v972_v41, %v971_v36 }
  0xa8   : > { %1657 = vst [vmem:[%s1860_s26 + $0x40] sm:$0xff] %v1533_v42  }
  0xab   : > { %v1882_v62 = vpop.f32.mrf.mxu2  ;;  %v1920_v21 = vpop.f32.mrf.mxu3 }
  0xac   : > { %v619_v44 = vpop.f32.mrf.mxu0  ;;  %v1868_v45 = vpop.f32.mrf.mxu1  ;;  %v1573_v63 = vpack.c.bf16 %v1882_v62, %v1876_v56  ;;  %v1613_v23 = vpack.c.bf16 %v1920_v21, %v1912_v17 }
  0xad   : > { %v903_v46 = vadd.f32 %v902_v40, %v619_v44  ;;  %v973_v47 = vmul.f32 %v619_v44, %v619_v44 }
  0xae   : > { %1665 = vst [vmem:[%s1860_s26 + $0x80] sm:$0xff] %v1573_v63  }
  0xaf   : > { %v1036_v48 = vadd.f32 %v1035_v43, %v973_v47  ;;  %1673 = vst [vmem:[%s1860_s26 + $0xc0] sm:$0xff] %v1613_v23  }
  0xb3   : > { %v1895_v7 = vpop.f32.mrf.mxu2  ;;  %v1934_v29 = vpop.f32.mrf.mxu3 }
  0xb4   : > { %v621_v50 = vpop.f32.mrf.mxu0  ;;  %v1872_v51 = vpop.f32.mrf.mxu1 }
  0xb5   : > { %v1498_v52 = vpack.c.bf16 %v621_v50, %v619_v44  ;;  %v904_v53 = vadd.f32 %v903_v46, %v621_v50  ;;  %v974_v54 = vmul.f32 %v621_v50, %v621_v50  ;;  %v1538_v55 = vpack.c.bf16 %v1872_v51, %v1868_v45 }
  0xb7   : > { %1650 = vst [vmem:[%s1860_s26 + $0x8] sm:$0xff] %v1498_v52   ;;  %v1037_v57 = vadd.f32 %v1036_v48, %v974_v54 }
  0xb8   : > { %1658 = vst [vmem:[%s1860_s26 + $0x48] sm:$0xff] %v1538_v55  }
  0xbb   : > { %v1901_v10 = vpop.f32.mrf.mxu2  ;;  %v1942_v34 = vpop.f32.mrf.mxu3 }
  0xbc   : > { %v624_v58 = vpop.f32.mrf.mxu0  ;;  %v1880_v59 = vpop.f32.mrf.mxu1  ;;  %v1578_v11 = vpack.c.bf16 %v1901_v10, %v1895_v7  ;;  %v1618_v36 = vpack.c.bf16 %v1942_v34, %v1934_v29 }
  0xbd   : > { %v905_v60 = vadd.f32 %v904_v53, %v624_v58  ;;  %v975_v61 = vmul.f32 %v624_v58, %v624_v58 }
  0xbe   : > { %1666 = vst [vmem:[%s1860_s26 + $0x88] sm:$0xff] %v1578_v11  }
  0xbf   : > { %v1886_v0 = vadd.f32 %v1037_v57, %v975_v61  ;;  %1674 = vst [vmem:[%s1860_s26 + $0xc8] sm:$0xff] %v1618_v36  }
  0xc3   : > { %v1910_v16 = vpop.f32.mrf.mxu2  ;;  %v1956_v43 = vpop.f32.mrf.mxu3 }
  0xc4   : > { %v626_v2 = vpop.f32.mrf.mxu0  ;;  %v1891_v3 = vpop.f32.mrf.mxu1 }
  0xc5   : > { %v1503_v4 = vpack.c.bf16 %v626_v2, %v624_v58  ;;  %v906_v5 = vadd.f32 %v905_v60, %v626_v2  ;;  %v1543_v6 = vpack.c.bf16 %v1891_v3, %v1880_v59  ;;  %v976_v49 = vmul.f32 %v626_v2, %v626_v2 }
  0xc7   : > { %1651 = vst [vmem:[%s1860_s26 + $0x10] sm:$0xff] %v1503_v4   ;;  %v1039_v54 = vadd.f32 %v1886_v0, %v976_v49 }
  0xc8   : > { %1659 = vst [vmem:[%s1860_s26 + $0x50] sm:$0xff] %v1543_v6  }
  0xcb   : > { %v1918_v20 = vpop.f32.mrf.mxu2  ;;  %v1964_v48 = vpop.f32.mrf.mxu3 }
  0xcc   : > { %v629_v8 = vpop.f32.mrf.mxu0  ;;  %v1899_v9 = vpop.f32.mrf.mxu1  ;;  %v1583_v22 = vpack.c.bf16 %v1918_v20, %v1910_v16  ;;  %v1623_v52 = vpack.c.bf16 %v1964_v48, %v1956_v43 }
  0xcd   : > { %v977_v53 = vmul.f32 %v629_v8, %v629_v8  ;;  %v907_v57 = vadd.f32 %v906_v5, %v629_v8 }
  0xce   : > { %1667 = vst [vmem:[%s1860_s26 + $0x90] sm:$0xff] %v1583_v22  }
  0xcf   : > { %1675 = vst [vmem:[%s1860_s26 + $0xd0] sm:$0xff] %v1623_v52   ;;  %v1040_v58 = vadd.f32 %v1039_v54, %v977_v53 }
  0xd3   : > { %v1932_v28 = vpop.f32.mrf.mxu2  ;;  %v1979_v11 = vpop.f32.mrf.mxu3 }
  0xd4   : > { %v631_v12 = vpop.f32.mrf.mxu0  ;;  %v1906_v13 = vpop.f32.mrf.mxu1 }
  0xd5   : > { %v1508_v14 = vpack.c.bf16 %v631_v12, %v629_v8  ;;  %v1548_v15 = vpack.c.bf16 %v1906_v13, %v1899_v9  ;;  %v978_v55 = vmul.f32 %v631_v12, %v631_v12  ;;  %v908_v1 = vadd.f32 %v907_v57, %v631_v12 }
  0xd7   : > { %1652 = vst [vmem:[%s1860_s26 + $0x18] sm:$0xff] %v1508_v14   ;;  %v1041_v14 = vadd.f32 %v1040_v58, %v978_v55 }
  0xd8   : > { %1660 = vst [vmem:[%s1860_s26 + $0x58] sm:$0xff] %v1548_v15  }
  0xdb   : > { %v1940_v32 = vpop.f32.mrf.mxu2 }
  0xdc   : > { %v634_v18 = vpop.f32.mrf.mxu0  ;;  %v1916_v19 = vpop.f32.mrf.mxu1  ;;  %v1588_v35 = vpack.c.bf16 %v1940_v32, %v1932_v28 }
  0xdd   : > { %v979_v60 = vmul.f32 %v634_v18, %v634_v18  ;;  %v909_v0 = vadd.f32 %v908_v1, %v634_v18 }
  0xde   : > { %1668 = vst [vmem:[%s1860_s26 + $0x98] sm:$0xff] %v1588_v35  }
  0xdf   : > { %v1042_v5 = vadd.f32 %v1041_v14, %v979_v60 }
  0xe3   : > { %v1954_v42 = vpop.f32.mrf.mxu2 }
  0xe4   : > { %v636_v24 = vpop.f32.mrf.mxu0  ;;  %v1928_v25 = vpop.f32.mrf.mxu1 }
  0xe5   : > { %v1513_v26 = vpack.c.bf16 %v636_v24, %v634_v18  ;;  %v1553_v27 = vpack.c.bf16 %v1928_v25, %v1916_v19  ;;  %v980_v15 = vmul.f32 %v636_v24, %v636_v24  ;;  %v910_v22 = vadd.f32 %v909_v0, %v636_v24 }
  0xe7   : > { %1653 = vst [vmem:[%s1860_s26 + $0x20] sm:$0xff] %v1513_v26   ;;  %v1043_v23 = vadd.f32 %v1042_v5, %v980_v15 }
  0xe8   : > { %1661 = vst [vmem:[%s1860_s26 + $0x60] sm:$0xff] %v1553_v27  }
  0xeb   : > { %v1962_v47 = vpop.f32.mrf.mxu2 }
  0xec   : > { %v639_v30 = vpop.f32.mrf.mxu0  ;;  %v1938_v31 = vpop.f32.mrf.mxu1  ;;  %v1593_v50 = vpack.c.bf16 %v1962_v47, %v1954_v42 }
  0xed   : > { %v981_v8 = vmul.f32 %v639_v30, %v639_v30  ;;  %v911_v12 = vadd.f32 %v910_v22, %v639_v30 }
  0xee   : > { %1669 = vst [vmem:[%s1860_s26 + $0xa0] sm:$0xff] %v1593_v50   ;;  %v1987_v50 = vpop.f32.mrf.mxu3 }
  0xef   : > { %v1044_v27 = vadd.f32 %v1043_v23, %v981_v8  ;;  %v1628_v53 = vpack.c.bf16 %v1987_v50, %v1979_v11  ;;  %v988_v23 = vmul.f32 %v1862_v38, %v1862_v38 }
  0xf1   : > { %1676 = vst [vmem:[%s1860_s26 + $0xd8] sm:$0xff] %v1628_v53  }
  0xf3   : > { %v1977_v6 = vpop.f32.mrf.mxu2 }
  0xf4   : > { %v641_v37 = vpop.f32.mrf.mxu0  ;;  %v1950_v39 = vpop.f32.mrf.mxu1 }
  0xf5   : > { %v1518_v40 = vpack.c.bf16 %v641_v37, %v639_v30  ;;  %v1558_v41 = vpack.c.bf16 %v1950_v39, %v1938_v31  ;;  %v982_v26 = vmul.f32 %v641_v37, %v641_v37 }
  0xf6   : > { %v2001_v5 = vpop.f32.mrf.mxu3 }
  0xf7   : > { %1654 = vst [vmem:[%s1860_s26 + $0x28] sm:$0xff] %v1518_v40   ;;  %v1045_v18 = vadd.f32 %v1044_v27, %v982_v26  ;;  %v989_v27 = vmul.f32 %v1868_v45, %v1868_v45 }
  0xf8   : > { %1662 = vst [vmem:[%s1860_s26 + $0x68] sm:$0xff] %v1558_v41   ;;  %v912_v41 = vadd.f32 %v911_v12, %v641_v37 }
  0xfb   : > { %v1985_v49 = vpop.f32.mrf.mxu2 }
  0xfc   : > { %v644_v44 = vpop.f32.mrf.mxu0  ;;  %v1960_v46 = vpop.f32.mrf.mxu1  ;;  %v1598_v24 = vpack.c.bf16 %v1985_v49, %v1977_v6 }
  0xfd   : > { %v983_v35 = vmul.f32 %v644_v44, %v644_v44  ;;  %v913_v30 = vadd.f32 %v912_v41, %v644_v44  ;;  %v990_v41 = vmul.f32 %v1872_v51, %v1872_v51 }
  0xfe   : > { %1670 = vst [vmem:[%s1860_s26 + $0xa8] sm:$0xff] %v1598_v24   ;;  %v2019_v24 = vpop.f32.mrf.mxu3 }
  0xff   : > { %v1046_v54 = vadd.f32 %v1045_v18, %v983_v35  ;;  %v1633_v53 = vpack.c.bf16 %v2019_v24, %v2001_v5 }
 0x101   : > { %1677 = vst [vmem:[%s1860_s26 + $0xe0] sm:$0xff] %v1633_v53  }
 0x104   : > { %v646_v61 = vpop.f32.mrf.mxu0  ;;  %v1973_v63 = vpop.f32.mrf.mxu1 }
 0x105   : > { %v1523_v2 = vpack.c.bf16 %v646_v61, %v644_v44  ;;  %v1563_v4 = vpack.c.bf16 %v1973_v63, %v1960_v46  ;;  %v984_v52 = vmul.f32 %v646_v61, %v646_v61  ;;  %v914_v57 = vadd.f32 %v913_v30, %v646_v61  ;;  %v1999_v44 = vpop.f32.mrf.mxu2 }
 0x106   : > { %v987_v61 = vmul.f32 %v1849_v33, %v1849_v33  ;;  %v1000_v53 = vmul.f32 %v1973_v63, %v1973_v63 }
 0x107   : > { %1655 = vst [vmem:[%s1860_s26 + $0x30] sm:$0xff] %v1523_v2   ;;  %v1047_v37 = vadd.f32 %v1046_v54, %v984_v52 }
 0x108   : > { %1663 = vst [vmem:[%s1860_s26 + $0x70] sm:$0xff] %v1563_v4  }
 0x10c   : > { %v649_v36 = vpop.f32.mrf.mxu0  ;;  %v1983_v40 = vpop.f32.mrf.mxu1 }
 0x10d   : > { %v985_v55 = vmul.f32 %v649_v36, %v649_v36  ;;  %v915_v58 = vadd.f32 %v914_v57, %v649_v36  ;;  %v2017_v52 = vpop.f32.mrf.mxu2 }
 0x10f   : > { %v1048_v60 = vadd.f32 %v1047_v37, %v985_v55  ;;  %v993_v37 = vmul.f32 %v1899_v9, %v1899_v9 }
 0x114   : > { %v651_v1 = vpop.f32.mrf.mxu0  ;;  %v1995_v2 = vpop.f32.mrf.mxu1 }
 0x115   : > { %v1528_v4 = vpack.c.bf16 %v651_v1, %v649_v36  ;;  %v916_v14 = vadd.f32 %v915_v58, %v651_v1  ;;  %v986_v15 = vmul.f32 %v651_v1, %v651_v1  ;;  %v1568_v0 = vpack.c.bf16 %v1995_v2, %v1983_v40 }
 0x116   : > { %v994_v1 = vmul.f32 %v1906_v13, %v1906_v13 }
 0x117   : > { %1656 = vst [vmem:[%s1860_s26 + $0x38] sm:$0xff] %v1528_v4   ;;  %v917_v8 = vadd.f32 %v916_v14, %v1849_v33  ;;  %v1049_v22 = vadd.f32 %v1048_v60, %v986_v15  ;;  %v2039_v14 = vpop.f32.mrf.mxu2  ;;  %v2041_v15 = vpop.f32.mrf.mxu3 }
 0x118   : > { %1664 = vst [vmem:[%s1860_s26 + $0x78] sm:$0xff] %v1568_v0  }
 0x119   : > { %v918_v26 = vadd.f32 %v917_v8, %v1862_v38  ;;  %v1050_v12 = vadd.f32 %v1049_v22, %v987_v61  ;;  %v1603_v38 = vpack.c.bf16 %v2017_v52, %v1999_v44  ;;  %v996_v8 = vmul.f32 %v1928_v25, %v1928_v25 }
 0x11b   : > { %v919_v35 = vadd.f32 %v918_v26, %v1868_v45  ;;  %v1051_v36 = vadd.f32 %v1050_v12, %v988_v23  ;;  %v991_v45 = vmul.f32 %v1880_v59, %v1880_v59  ;;  %1671 = vst [vmem:[%s1860_s26 + $0xb0] sm:$0xff] %v1603_v38   ;;  %v998_v12 = vmul.f32 %v1950_v39, %v1950_v39 }
 0x11d   : > { %v920_v33 = vadd.f32 %v919_v35, %v1872_v51  ;;  %v1052_v18 = vadd.f32 %v1051_v36, %v989_v27  ;;  %v992_v51 = vmul.f32 %v1891_v3, %v1891_v3 }
 0x11f   : > { %v921_v30 = vadd.f32 %v920_v33, %v1880_v59  ;;  %v1053_v54 = vadd.f32 %v1052_v18, %v990_v41  ;;  %v2055_v35 = vpop.f32.mrf.mxu2  ;;  %v2057_v36 = vpop.f32.mrf.mxu3  ;;  %v999_v33 = vmul.f32 %v1960_v46, %v1960_v46 }
 0x120   : > { %v1638_v41 = vpack.c.bf16 %v2057_v36, %v2041_v15 }
 0x121   : > { %v922_v55 = vadd.f32 %v921_v30, %v1891_v3  ;;  %v1054_v57 = vadd.f32 %v1053_v54, %v991_v45  ;;  %v995_v3 = vmul.f32 %v1916_v19, %v1916_v19  ;;  %v1001_v54 = vmul.f32 %v1983_v40, %v1983_v40 }
 0x122   : > { %1678 = vst [vmem:[%s1860_s26 + $0xe8] sm:$0xff] %v1638_v41   ;;  %v1011_v41 = vmul.f32 %v1954_v42, %v1954_v42 }
 0x123   : > { %v1055_v58 = vadd.f32 %v1054_v57, %v992_v51  ;;  %v923_v60 = vadd.f32 %v922_v55, %v1899_v9 }
 0x125   : > { %v924_v59 = vadd.f32 %v923_v60, %v1906_v13  ;;  %v1056_v4 = vadd.f32 %v1055_v58, %v993_v37  ;;  %v997_v13 = vmul.f32 %v1938_v31, %v1938_v31  ;;  %v1003_v37 = vmul.f32 %v1876_v56, %v1876_v56 }
 0x126   : > { %v1004_v60 = vmul.f32 %v1882_v62, %v1882_v62 }
 0x127   : > { %v925_v0 = vadd.f32 %v924_v59, %v1916_v19  ;;  %v1057_v61 = vadd.f32 %v1056_v4, %v994_v1  ;;  %v2077_v57 = vpop.f32.mrf.mxu3  ;;  %v1005_v59 = vmul.f32 %v1895_v7, %v1895_v7 }
 0x129   : > { %v926_v9 = vadd.f32 %v925_v0, %v1928_v25  ;;  %v1058_v22 = vadd.f32 %v1057_v61, %v995_v3  ;;  %v1608_v25 = vpack.c.bf16 %v2055_v35, %v2039_v14  ;;  %v1006_v3 = vmul.f32 %v1901_v10, %v1901_v10 }
 0x12b   : > { %v927_v23 = vadd.f32 %v926_v9, %v1938_v31  ;;  %v1059_v26 = vadd.f32 %v1058_v22, %v996_v8  ;;  %1672 = vst [vmem:[%s1860_s26 + $0xb8] sm:$0xff] %v1608_v25  }
 0x12d   : > { %v928_v19 = vadd.f32 %v927_v23, %v1950_v39  ;;  %v1060_v27 = vadd.f32 %v1059_v26, %v997_v13 }
 0x12f   : > { %v929_v31 = vadd.f32 %v928_v19, %v1960_v46  ;;  %v1061_v18 = vadd.f32 %v1060_v27, %v998_v12  ;;  %v1002_v46 = vmul.f32 %v1995_v2, %v1995_v2  ;;  %v2091_v61 = vpop.f32.mrf.mxu3  ;;  %v1010_v19 = vmul.f32 %v1940_v32, %v1940_v32 }
 0x130   : > { %v1643_v8 = vpack.c.bf16 %v2091_v61, %v2077_v57 }
 0x131   : > { %v1062_v38 = vadd.f32 %v1061_v18, %v999_v33  ;;  %v930_v39 = vadd.f32 %v929_v31, %v1973_v63  ;;  %v1012_v33 = vmul.f32 %v1962_v47, %v1962_v47 }
 0x132   : > { %1679 = vst [vmem:[%s1860_s26 + $0xf0] sm:$0xff] %v1643_v8  }
 0x133   : > { %v1063_v45 = vadd.f32 %v1062_v38, %v1000_v53  ;;  %v931_v30 = vadd.f32 %v930_v39, %v1983_v40  ;;  %v1013_v38 = vmul.f32 %v1977_v6, %v1977_v6 }
 0x135   : > { %v1064_v51 = vadd.f32 %v1063_v45, %v1001_v54  ;;  %v932_v55 = vadd.f32 %v931_v30, %v1995_v2  ;;  %v1014_v45 = vmul.f32 %v1985_v49, %v1985_v49 }
 0x137   : > { %v933_v63 = vadd.f32 %v932_v55, %v1876_v56  ;;  %v1065_v58 = vadd.f32 %v1064_v51, %v1002_v46  ;;  %v2108_v25 = vpop.f32.mrf.mxu3 }
 0x139   : > { %v934_v40 = vadd.f32 %v933_v63, %v1882_v62  ;;  %v1066_v1 = vadd.f32 %v1065_v58, %v1003_v37  ;;  %v1007_v62 = vmul.f32 %v1910_v16, %v1910_v16  ;;  %v1016_v37 = vmul.f32 %v2017_v52, %v2017_v52 }
 0x13a   : > { %v1017_v58 = vmul.f32 %v2039_v14, %v2039_v14 }
 0x13b   : > { %v935_v2 = vadd.f32 %v934_v40, %v1895_v7  ;;  %v1067_v4 = vadd.f32 %v1066_v1, %v1004_v60  ;;  %v1008_v7 = vmul.f32 %v1918_v20, %v1918_v20  ;;  %v1018_v1 = vmul.f32 %v2055_v35, %v2055_v35 }
 0x13d   : > { %v936_v0 = vadd.f32 %v935_v2, %v1901_v10  ;;  %v1068_v56 = vadd.f32 %v1067_v4, %v1005_v59  ;;  %v1009_v10 = vmul.f32 %v1932_v28, %v1932_v28 }
 0x13f   : > { %v937_v9 = vadd.f32 %v936_v0, %v1910_v16  ;;  %v1069_v22 = vadd.f32 %v1068_v56, %v1006_v3  ;;  %v771_v30 = vpop.f32.mrf.mxu3 }
 0x140   : > { %v1648_v54 = vpack.c.bf16 %v771_v30, %v2108_v25 }
 0x141   : > { %v938_v13 = vadd.f32 %v937_v9, %v1918_v20  ;;  %v1070_v23 = vadd.f32 %v1069_v22, %v1007_v62 }
 0x142   : > { %1680 = vst [vmem:[%s1860_s26 + $0xf8] sm:$0xff] %v1648_v54   ;;  %v1034_v54 = vmul.f32 %v771_v30, %v771_v30 }
 0x143   : > { %v1071_v26 = vadd.f32 %v1070_v23, %v1008_v7  ;;  %v939_v12 = vadd.f32 %v938_v13, %v1932_v28 }
 0x145   : > { %v940_v27 = vadd.f32 %v939_v12, %v1940_v32  ;;  %v1072_v16 = vadd.f32 %v1071_v26, %v1009_v10 }
 0x147   : > { %v941_v20 = vadd.f32 %v940_v27, %v1954_v42  ;;  %v1073_v31 = vadd.f32 %v1072_v16, %v1010_v19 }
 0x149   : > { %v942_v28 = vadd.f32 %v941_v20, %v1962_v47  ;;  %v1074_v18 = vadd.f32 %v1073_v31, %v1011_v41  ;;  %v1015_v47 = vmul.f32 %v1999_v44, %v1999_v44 }
 0x14b   : > { %v943_v32 = vadd.f32 %v942_v28, %v1977_v6  ;;  %v1075_v39 = vadd.f32 %v1074_v18, %v1012_v33  ;;  %v1030_v33 = vmul.f32 %v2057_v36, %v2057_v36 }
 0x14d   : > { %v944_v53 = vadd.f32 %v943_v32, %v1985_v49  ;;  %v1076_v42 = vadd.f32 %v1075_v39, %v1013_v38  ;;  %v1031_v38 = vmul.f32 %v2077_v57, %v2077_v57  ;;  %v1032_v39 = vmul.f32 %v2091_v61, %v2091_v61 }
 0x14f   : > { %v1077_v51 = vadd.f32 %v1076_v42, %v1014_v45  ;;  %v945_v55 = vadd.f32 %v944_v53, %v1999_v44  ;;  %v1019_v44 = vmul.f32 %v1912_v17, %v1912_v17  ;;  %v1033_v45 = vmul.f32 %v2108_v25, %v2108_v25 }
 0x151   : > { %v1078_v46 = vadd.f32 %v1077_v51, %v1015_v47  ;;  %v946_v6 = vadd.f32 %v945_v55, %v2017_v52  ;;  %v1020_v52 = vmul.f32 %v1920_v21, %v1920_v21 }
 0x153   : > { %v1079_v63 = vadd.f32 %v1078_v46, %v1016_v37  ;;  %v947_v49 = vadd.f32 %v946_v6, %v2039_v14  ;;  %v1021_v14 = vmul.f32 %v1934_v29, %v1934_v29 }
 0x155   : > { %v1080_v60 = vadd.f32 %v1079_v63, %v1017_v58  ;;  %v948_v40 = vadd.f32 %v947_v49, %v2055_v35  ;;  %v1022_v35 = vmul.f32 %v1942_v34, %v1942_v34 }
 0x157   : > { %v949_v59 = vadd.f32 %v948_v40, %v1912_v17  ;;  %v1081_v2 = vadd.f32 %v1080_v60, %v1018_v1  ;;  %v1023_v17 = vmul.f32 %v1956_v43, %v1956_v43  ;;  %v1110_v60 = vlaneseq }
 0x159   : > { %v950_v4 = vadd.f32 %v949_v59, %v1920_v21  ;;  %v1082_v3 = vadd.f32 %v1081_v2, %v1019_v44  ;;  %v1024_v21 = vmul.f32 %v1964_v48, %v1964_v48  ;;  %vm1112_vm2 = vcmp.lt.s32.totalorder %v1110_v60, 256 }
 0x15b   : > { %v951_v0 = vadd.f32 %v950_v4, %v1934_v29  ;;  %v1083_v56 = vadd.f32 %v1082_v3, %v1020_v52  ;;  %v1025_v29 = vmul.f32 %v1979_v11, %v1979_v11 }
 0x15d   : > { %v952_v8 = vadd.f32 %v951_v0, %v1942_v34  ;;  %v1084_v62 = vadd.f32 %v1083_v56, %v1021_v14  ;;  %v1026_v34 = vmul.f32 %v1987_v50, %v1987_v50 }
 0x15f   : > { %v953_v9 = vadd.f32 %v952_v8, %v1956_v43  ;;  %v1085_v22 = vadd.f32 %v1084_v62, %v1022_v35  ;;  %v1027_v43 = vmul.f32 %v2001_v5, %v2001_v5 }
 0x161   : > { %v954_v7 = vadd.f32 %v953_v9, %v1964_v48  ;;  %v1086_v13 = vadd.f32 %v1085_v22, %v1023_v17  ;;  %v1028_v48 = vmul.f32 %v2019_v24, %v2019_v24 }
 0x163   : > { %v1087_v23 = vadd.f32 %v1086_v13, %v1024_v21  ;;  %v955_v10 = vadd.f32 %v954_v7, %v1979_v11  ;;  %v1029_v11 = vmul.f32 %v2041_v15, %v2041_v15 }
 0x165   : > { %v956_v26 = vadd.f32 %v955_v10, %v1987_v50  ;;  %v1088_v12 = vadd.f32 %v1087_v23, %v1025_v29 }
 0x167   : > { %v957_v19 = vadd.f32 %v956_v26, %v2001_v5  ;;  %v1089_v27 = vadd.f32 %v1088_v12, %v1026_v34 }
 0x169   : > { %v958_v16 = vadd.f32 %v957_v19, %v2019_v24  ;;  %v1090_v41 = vadd.f32 %v1089_v27, %v1027_v43 }
 0x16b   : > { %v959_v20 = vadd.f32 %v958_v16, %v2041_v15  ;;  %v1091_v31 = vadd.f32 %v1090_v41, %v1028_v48 }
 0x16d   : > { %v960_v50 = vadd.f32 %v959_v20, %v2057_v36  ;;  %v1092_v28 = vadd.f32 %v1091_v31, %v1029_v11 }
 0x16f   : > { %v1093_v5 = vadd.f32 %v1092_v28, %v1030_v33  ;;  %v961_v18 = vadd.f32 %v960_v50, %v2077_v57 }
 0x171   : > { %v1094_v24 = vadd.f32 %v1093_v5, %v1031_v38  ;;  %v962_v32 = vadd.f32 %v961_v18, %v2091_v61 }
 0x173   : > { %v1095_v15 = vadd.f32 %v1094_v24, %v1032_v39  ;;  %v963_v53 = vadd.f32 %v962_v32, %v2108_v25 }
 0x175   : > { %v1096_v36 = vadd.f32 %v1095_v15, %v1033_v45  ;;  %v964_v42 = vadd.f32 %v963_v53, %v771_v30 }
 0x177   : > { %v965_v51 = vrot.slane %v964_v42, 4  ;;  %v1097_v55 = vadd.f32 %v1096_v36, %v1034_v54 }
 0x179   : > { %v966_v47 = vadd.f32 %v965_v51, %v964_v42  ;;  %v1098_v57 = vrot.slane %v1097_v55, 4 }
 0x17b   : > { %v967_v46 = vrot.slane %v966_v47, 2  ;;  %v1099_v6 = vadd.f32 %v1098_v57, %v1097_v55 }
 0x17d   : > { %v968_v37 = vadd.f32 %v967_v46, %v966_v47  ;;  %v1100_v63 = vrot.slane %v1099_v6, 2 }
 0x17f   : > { %v1101_v49 = vadd.f32 %v1100_v63, %v1099_v6  ;;  %v969_v61 = vrot.slane %v968_v37, 1 }
 0x181   : > { %v1102_v58 = vrot.slane %v1101_v49, 1  ;;  %v970_v25 = vadd.f32 %v969_v61, %v968_v37 }
 0x183   : > { %v1103_v40 = vadd.f32 %v1102_v58, %v1101_v49 }
 0x185   : > { %v1106_v30 = vrot.slane %v1103_v40, 7 }
 0x187   : > { %v1108_v1 = vsel %vm1107_vm1, %v970_v25, %v1106_v30 }
 0x188   : > { %1114 = vst.msk [vmem:[%s250_s30] sm:$0x3] %vm1112_vm2, %v1108_v1 }
 0x189 PF: > { %s14_s14 = sadd.s32 1, %s1739_s14   ;;  %s2198_s12 = smov %s1735_s13 }
 0x18a   : > { %p11_p5 = scmp.ge.s32.totalorder %s14_s14, 6   ;;  %s2199_s13 = smov %s2201_s15 }
 0x18c   :  { %13 = sbr.rel (!%p11_p5) target bundleno = 2 (0x2), region = 73 }

// kernel: netg_forward.9
= control target key start
LH: loop header
LB: loop body
LE: loop exit
PB: predicated region body
PF: predicated region fallthrough
CT: control target
= control target key end

     0   :  { %s4137_s9 = smov 0   ;;  %s4139_s10 = smov 0   ;;  %s4950_s0 = inlined_call_operand.vmem [shape: bf16[4,2048,32], index: 0, kind: input, shape index: {}]   ;;  %s4951_s1 = inlined_call_operand.vmem [shape: bf16[4,32,3], index: 1, kind: input, shape index: {}]   ;;  %s4952_s2 = inlined_call_operand.vmem [shape: f32[4,2048,3], index: 2, kind: output, shape index: {}]  }
   0x1   :  { %s4141_s11 = smov 0  }
   0x2 LB: > { %s24_s12 = sadd.s32 1, %s4116_s10  ;;  %p2766_p0 = scmp.ge.s32.totalorder %s4120_s11, 1  ;;  %s4120_s11 = sphi %s4141_s11, %s12_s11   ;;  %s4116_s10 = sphi %s4139_s10, %s4954_s10   ;;  %s4112_s9 = sphi %s4137_s9, %s4953_s9  }
   0x3   : > { %p26_p1 = scmp.ge.s32.totalorder %s24_s12, 4  ;;  %p143_p2 = scmp.lt.s32.totalorder %s4120_s11, 5 }
   0x5   : > { %s4956_s12 = smov (%p26_p1, %s24_s12), 0  ;;  %p144_p3 = pnand %p2766_p0, %p143_p2 }
   0x6   : > { %p179_p4 = scmp.lt.s32.totalorder (!%p144_p3), %s4112_s9, 3 }
   0x7   : > { %147 = sbr.rel (%p144_p3) target bundleno = 669 (0x29d), region = 28 }
   0xc   : > { %s4958_s9 = smov (!%p179_p4, %s4112_s9), 3  ;;  %vm1116_vm0 = vcmask 261120   ;;  %vm2406_vm1 = vcmask 23552  }
   0xd   : > { %s3424_s13 = sshll.u32 %s4958_s9, 4  ;;  %s3423_s17 = sshll.u32 %s4958_s9, 10 }
   0xe   : > { %s192_s16 = scalar_lea.vmem %s4951_s1, %s3424_s13  ;;  %s4165_s20 = scalar_lea.vmem %s4950_s0, %s3423_s17 }
   0xf   : > { %v3555_v0 = vld [vmem:[%s192_s16 + $0x8] sm:$0xff]  ;;  %v3554_v1 = vld [vmem:[%s192_s16] sm:$0xff]  ;;  %v3428_v10 = vld [vmem:[%s4165_s20 + $0x10] sm:$0xff]  ;;  %s3425_s21 = sshll.u32 %s4958_s9, 11 }
  0x10   : > { %1507 = vmatpush.bf16.msra.mxu0 %v3555_v0  ;;  %3556 = vmatpush.bf16.msra.mxu1 %v3555_v0  ;;  %v3426_v2 = vld [vmem:[%s4165_s20] sm:$0xff]  ;;  %v3427_v6 = vld [vmem:[%s4165_s20 + $0x8] sm:$0xff]  ;;  %v3460_v11 = vld [vmem:[%s4165_s20 + $0x110] sm:$0xff]  ;;  %s4243_s24 = scalar_lea.vmem %s4952_s2, %s3425_s21 }
  0x11   : > { %3557 = vmatpush.bf16.msra.mxu2 %v3555_v0  ;;  %3558 = vmatpush.bf16.msra.mxu3 %v3555_v0  ;;  %v3458_v3 = vld [vmem:[%s4165_s20 + $0x100] sm:$0xff]  ;;  %v3459_v7 = vld [vmem:[%s4165_s20 + $0x108] sm:$0xff]  ;;  %v3492_v12 = vld [vmem:[%s4165_s20 + $0x210] sm:$0xff] }
  0x12   : > { %v3490_v4 = vld [vmem:[%s4165_s20 + $0x200] sm:$0xff]  ;;  %v3491_v8 = vld [vmem:[%s4165_s20 + $0x208] sm:$0xff]  ;;  %v3524_v13 = vld [vmem:[%s4165_s20 + $0x310] sm:$0xff] }
  0x13   : > { %v3522_v5 = vld [vmem:[%s4165_s20 + $0x300] sm:$0xff]  ;;  %v3523_v9 = vld [vmem:[%s4165_s20 + $0x308] sm:$0xff]  ;;  %v3429_v14 = vld [vmem:[%s4165_s20 + $0x18] sm:$0xff] }
  0x14   : > { %1508 = vmatpush.bf16.msra.mxu0 %v3554_v1  ;;  %3559 = vmatpush.bf16.msra.mxu1 %v3554_v1  ;;  %v3461_v15 = vld [vmem:[%s4165_s20 + $0x118] sm:$0xff]  ;;  %v3430_v18 = vld [vmem:[%s4165_s20 + $0x20] sm:$0xff]  ;;  %v3431_v22 = vld [vmem:[%s4165_s20 + $0x28] sm:$0xff] }
  0x15   : > { %3560 = vmatpush.bf16.msra.mxu2 %v3554_v1  ;;  %3561 = vmatpush.bf16.msra.mxu3 %v3554_v1  ;;  %v3493_v16 = vld [vmem:[%s4165_s20 + $0x218] sm:$0xff]  ;;  %v3462_v19 = vld [vmem:[%s4165_s20 + $0x120] sm:$0xff]  ;;  %v3463_v23 = vld [vmem:[%s4165_s20 + $0x128] sm:$0xff] }
  0x16   : > { %v3525_v17 = vld [vmem:[%s4165_s20 + $0x318] sm:$0xff]  ;;  %v3494_v20 = vld [vmem:[%s4165_s20 + $0x220] sm:$0xff]  ;;  %v3495_v24 = vld [vmem:[%s4165_s20 + $0x228] sm:$0xff] }
  0x17   : > { %3293 = vmatmul.msk.bf16.vlgmr.msra.gmra.mxu0 %vm1116_vm0, %v3426_v2  ;;  %3325 = vmatmul.msk.bf16.vlgmr.msra.gmra.mxu1 %vm1116_vm0, %v3458_v3  ;;  %v3526_v21 = vld [vmem:[%s4165_s20 + $0x320] sm:$0xff]  ;;  %v3527_v25 = vld [vmem:[%s4165_s20 + $0x328] sm:$0xff]  ;;  %v3432_v26 = vld [vmem:[%s4165_s20 + $0x30] sm:$0xff] }
  0x18   : > { %3357 = vmatmul.msk.bf16.vlgmr.msra.gmra.mxu2 %vm1116_vm0, %v3490_v4  ;;  %3389 = vmatmul.msk.bf16.vlgmr.msra.gmra.mxu3 %vm1116_vm0, %v3522_v5  ;;  %v3464_v27 = vld [vmem:[%s4165_s20 + $0x130] sm:$0xff]  ;;  %v3433_v30 = vld [vmem:[%s4165_s20 + $0x38] sm:$0xff]  ;;  %v3434_v34 = vld [vmem:[%s4165_s20 + $0x40] sm:$0xff] }
  0x19   : > { %v3496_v28 = vld [vmem:[%s4165_s20 + $0x230] sm:$0xff]  ;;  %v3465_v31 = vld [vmem:[%s4165_s20 + $0x138] sm:$0xff]  ;;  %v3466_v35 = vld [vmem:[%s4165_s20 + $0x140] sm:$0xff] }
  0x1a   : > { %v3528_v29 = vld [vmem:[%s4165_s20 + $0x330] sm:$0xff]  ;;  %v3497_v32 = vld [vmem:[%s4165_s20 + $0x238] sm:$0xff]  ;;  %v3498_v38 = vld [vmem:[%s4165_s20 + $0x240] sm:$0xff] }
  0x1b   : > { %v3529_v33 = vld [vmem:[%s4165_s20 + $0x338] sm:$0xff]  ;;  %v3530_v39 = vld [vmem:[%s4165_s20 + $0x340] sm:$0xff]  ;;  %v3435_v50 = vld [vmem:[%s4165_s20 + $0x48] sm:$0xff] }
  0x1c   : > { %v3467_v51 = vld [vmem:[%s4165_s20 + $0x148] sm:$0xff] }
  0x1d   : > { %v3499_v55 = vld [vmem:[%s4165_s20 + $0x248] sm:$0xff] }
  0x1e   : > { %v3531_v56 = vld [vmem:[%s4165_s20 + $0x348] sm:$0xff] }
  0x27   : > { %3294 = vmatmul.msk.bf16.gmra.mxu0 %vm1116_vm0, %v3427_v6  ;;  %3326 = vmatmul.msk.bf16.gmra.mxu1 %vm1116_vm0, %v3459_v7  ;;  %v3436_v6 = vld [vmem:[%s4165_s20 + $0x50] sm:$0xff] }
  0x28   : > { %3358 = vmatmul.msk.bf16.gmra.mxu2 %vm1116_vm0, %v3491_v8  ;;  %3390 = vmatmul.msk.bf16.gmra.mxu3 %vm1116_vm0, %v3523_v9  ;;  %v3468_v7 = vld [vmem:[%s4165_s20 + $0x150] sm:$0xff] }
  0x37   : > { %3295 = vmatmul.msk.bf16.gmra.mxu0 %vm1116_vm0, %v3428_v10  ;;  %3327 = vmatmul.msk.bf16.gmra.mxu1 %vm1116_vm0, %v3460_v11  ;;  %v3500_v11 = vld [vmem:[%s4165_s20 + $0x250] sm:$0xff] }
  0x38   : > { %3359 = vmatmul.msk.bf16.gmra.mxu2 %vm1116_vm0, %v3492_v12  ;;  %3391 = vmatmul.msk.bf16.gmra.mxu3 %vm1116_vm0, %v3524_v13  ;;  %v3532_v12 = vld [vmem:[%s4165_s20 + $0x350] sm:$0xff] }
  0x47   : > { %3296 = vmatmul.msk.bf16.gmra.mxu0 %vm1116_vm0, %v3429_v14  ;;  %3328 = vmatmul.msk.bf16.gmra.mxu1 %vm1116_vm0, %v3461_v15 }
  0x48   : > { %3360 = vmatmul.msk.bf16.gmra.mxu2 %vm1116_vm0, %v3493_v16  ;;  %3392 = vmatmul.msk.bf16.gmra.mxu3 %vm1116_vm0, %v3525_v17 }
  0x57   : > { %3297 = vmatmul.msk.bf16.gmra.mxu0 %vm1116_vm0, %v3430_v18  ;;  %3329 = vmatmul.msk.bf16.gmra.mxu1 %vm1116_vm0, %v3462_v19 }
  0x58   : > { %3361 = vmatmul.msk.bf16.gmra.mxu2 %vm1116_vm0, %v3494_v20  ;;  %3393 = vmatmul.msk.bf16.gmra.mxu3 %vm1116_vm0, %v3526_v21 }
  0x67   : > { %3298 = vmatmul.msk.bf16.gmra.mxu0 %vm1116_vm0, %v3431_v22  ;;  %3330 = vmatmul.msk.bf16.gmra.mxu1 %vm1116_vm0, %v3463_v23 }
  0x68   : > { %3362 = vmatmul.msk.bf16.gmra.mxu2 %vm1116_vm0, %v3495_v24  ;;  %3394 = vmatmul.msk.bf16.gmra.mxu3 %vm1116_vm0, %v3527_v25 }
  0x77   : > { %3299 = vmatmul.msk.bf16.gmra.mxu0 %vm1116_vm0, %v3432_v26  ;;  %3331 = vmatmul.msk.bf16.gmra.mxu1 %vm1116_vm0, %v3464_v27  ;;  %v3437_v26 = vld [vmem:[%s4165_s20 + $0x58] sm:$0xff] }
  0x78   : > { %3363 = vmatmul.msk.bf16.gmra.mxu2 %vm1116_vm0, %v3496_v28  ;;  %3395 = vmatmul.msk.bf16.gmra.mxu3 %vm1116_vm0, %v3528_v29  ;;  %v3469_v27 = vld [vmem:[%s4165_s20 + $0x158] sm:$0xff] }
  0x87   : > { %3300 = vmatmul.msk.bf16.gmra.mxu0 %vm1116_vm0, %v3433_v30  ;;  %3332 = vmatmul.msk.bf16.gmra.mxu1 %vm1116_vm0, %v3465_v31  ;;  %v3501_v31 = vld [vmem:[%s4165_s20 + $0x258] sm:$0xff] }
  0x88   : > { %3364 = vmatmul.msk.bf16.gmra.mxu2 %vm1116_vm0, %v3497_v32  ;;  %3396 = vmatmul.msk.bf16.gmra.mxu3 %vm1116_vm0, %v3529_v33  ;;  %v3533_v32 = vld [vmem:[%s4165_s20 + $0x358] sm:$0xff] }
  0x94   : > { %v1510_v36 = vpop.f32.mrf.mxu0  ;;  %v1670_v37 = vpop.f32.mrf.mxu1 }
  0x95   : > { %3586 = vtanh.f32 %v1510_v36 }
  0x96   : > { %3588 = vtanh.f32 %v1670_v37 }
  0x97   : > { %3301 = vmatmul.msk.bf16.gmra.mxu0 %vm1116_vm0, %v3434_v34  ;;  %3333 = vmatmul.msk.bf16.gmra.mxu1 %vm1116_vm0, %v3466_v35 }
  0x98   : > { %3365 = vmatmul.msk.bf16.gmra.mxu2 %vm1116_vm0, %v3498_v38  ;;  %3397 = vmatmul.msk.bf16.gmra.mxu3 %vm1116_vm0, %v3530_v39 }
  0x9b   : > { %v3587_v40 = vpop.eup %3586  ;;  %v1830_v41 = vpop.f32.mrf.mxu2 }
  0x9c   : > { %v1990_v42 = vpop.f32.mrf.mxu3  ;;  %v3589_v43 = vpop.eup %3588  ;;  %2407 = vst.msk [vmem:[%s4243_s24] sm:$0xff] %vm2406_vm1, %v3587_v40  ;;  %3590 = vtanh.f32 %v1830_v41 }
  0x9d   : > { %v1512_v44 = vpop.f32.mrf.mxu0  ;;  %v1672_v45 = vpop.f32.mrf.mxu1  ;;  %2471 = vst.msk [vmem:[%s4243_s24 + $0x200] sm:$0xff] %vm2406_vm1, %v3589_v43  ;;  %3592 = vtanh.f32 %v1990_v42 }
  0x9e   : > { %3594 = vtanh.f32 %v1512_v44 }
  0x9f   : > { %3596 = vtanh.f32 %v1672_v45 }
  0xa2   : > { %v3591_v46 = vpop.eup %3590 }
  0xa3   : > { %v3593_v47 = vpop.eup %3592  ;;  %2535 = vst.msk [vmem:[%s4243_s24 + $0x400] sm:$0xff] %vm2406_vm1, %v3591_v46  ;;  %v1832_v48 = vpop.f32.mrf.mxu2  ;;  %v3438_v46 = vld [vmem:[%s4165_s20 + $0x60] sm:$0xff] }
  0xa4   : > { %v1992_v49 = vpop.f32.mrf.mxu3  ;;  %v3595_v52 = vpop.eup %3594  ;;  %2599 = vst.msk [vmem:[%s4243_s24 + $0x600] sm:$0xff] %vm2406_vm1, %v3593_v47  ;;  %3598 = vtanh.f32 %v1832_v48  ;;  %v3470_v47 = vld [vmem:[%s4165_s20 + $0x160] sm:$0xff] }
  0xa5   : > { %v1515_v53 = vpop.f32.mrf.mxu0  ;;  %v1675_v54 = vpop.f32.mrf.mxu1  ;;  %2408 = vst.msk [vmem:[%s4243_s24 + $0x8] sm:$0xff] %vm2406_vm1, %v3595_v52  ;;  %3600 = vtanh.f32 %v1992_v49  ;;  %v3534_v52 = vld [vmem:[%s4165_s20 + $0x360] sm:$0xff] }
  0xa6   : > { %v3597_v57 = vpop.eup %3596  ;;  %3602 = vtanh.f32 %v1515_v53 }
  0xa7   : > { %2472 = vst.msk [vmem:[%s4243_s24 + $0x208] sm:$0xff] %vm2406_vm1, %v3597_v57  ;;  %3604 = vtanh.f32 %v1675_v54  ;;  %3302 = vmatmul.msk.bf16.gmra.mxu0 %vm1116_vm0, %v3435_v50  ;;  %3334 = vmatmul.msk.bf16.gmra.mxu1 %vm1116_vm0, %v3467_v51  ;;  %v3502_v51 = vld [vmem:[%s4165_s20 + $0x260] sm:$0xff] }
  0xa8   : > { %3366 = vmatmul.msk.bf16.gmra.mxu2 %vm1116_vm0, %v3499_v55  ;;  %3398 = vmatmul.msk.bf16.gmra.mxu3 %vm1116_vm0, %v3531_v56 }
  0xaa   : > { %v3599_v58 = vpop.eup %3598 }
  0xab   : > { %v3601_v59 = vpop.eup %3600  ;;  %2536 = vst.msk [vmem:[%s4243_s24 + $0x408] sm:$0xff] %vm2406_vm1, %v3599_v58  ;;  %v1835_v60 = vpop.f32.mrf.mxu2 }
  0xac   : > { %v1995_v61 = vpop.f32.mrf.mxu3  ;;  %v3603_v62 = vpop.eup %3602  ;;  %2600 = vst.msk [vmem:[%s4243_s24 + $0x608] sm:$0xff] %vm2406_vm1, %v3601_v59  ;;  %3606 = vtanh.f32 %v1835_v60 }
  0xad   : > { %v1517_v63 = vpop.f32.mrf.mxu0  ;;  %v1677_v0 = vpop.f32.mrf.mxu1  ;;  %2409 = vst.msk [vmem:[%s4243_s24 + $0x10] sm:$0xff] %vm2406_vm1, %v3603_v62  ;;  %3608 = vtanh.f32 %v1995_v61 }
  0xae   : > { %v3605_v1 = vpop.eup %3604  ;;  %3610 = vtanh.f32 %v1517_v63 }
  0xaf   : > { %2473 = vst.msk [vmem:[%s4243_s24 + $0x210] sm:$0xff] %vm2406_vm1, %v3605_v1  ;;  %3612 = vtanh.f32 %v1677_v0 }
  0xb2   : > { %v3607_v2 = vpop.eup %3606 }
  0xb3   : > { %v3609_v3 = vpop.eup %3608  ;;  %2537 = vst.msk [vmem:[%s4243_s24 + $0x410] sm:$0xff] %vm2406_vm1, %v3607_v2  ;;  %v1837_v4 = vpop.f32.mrf.mxu2  ;;  %v3439_v2 = vld [vmem:[%s4165_s20 + $0x68] sm:$0xff] }
  0xb4   : > { %v1997_v5 = vpop.f32.mrf.mxu3  ;;  %v3611_v8 = vpop.eup %3610  ;;  %2601 = vst.msk [vmem:[%s4243_s24 + $0x610] sm:$0xff] %vm2406_vm1, %v3609_v3  ;;  %3614 = vtanh.f32 %v1837_v4  ;;  %v3471_v3 = vld [vmem:[%s4165_s20 + $0x168] sm:$0xff] }
  0xb5   : > { %v1520_v9 = vpop.f32.mrf.mxu0  ;;  %v1680_v10 = vpop.f32.mrf.mxu1  ;;  %2410 = vst.msk [vmem:[%s4243_s24 + $0x18] sm:$0xff] %vm2406_vm1, %v3611_v8  ;;  %3616 = vtanh.f32 %v1997_v5  ;;  %v3535_v8 = vld [vmem:[%s4165_s20 + $0x368] sm:$0xff] }
  0xb6   : > { %v3613_v13 = vpop.eup %3612  ;;  %3618 = vtanh.f32 %v1520_v9 }
  0xb7   : > { %2474 = vst.msk [vmem:[%s4243_s24 + $0x218] sm:$0xff] %vm2406_vm1, %v3613_v13  ;;  %3620 = vtanh.f32 %v1680_v10  ;;  %3303 = vmatmul.msk.bf16.gmra.mxu0 %vm1116_vm0, %v3436_v6  ;;  %3335 = vmatmul.msk.bf16.gmra.mxu1 %vm1116_vm0, %v3468_v7  ;;  %v3503_v7 = vld [vmem:[%s4165_s20 + $0x268] sm:$0xff] }
  0xb8   : > { %3367 = vmatmul.msk.bf16.gmra.mxu2 %vm1116_vm0, %v3500_v11  ;;  %3399 = vmatmul.msk.bf16.gmra.mxu3 %vm1116_vm0, %v3532_v12 }
  0xba   : > { %v3615_v14 = vpop.eup %3614 }
  0xbb   : > { %v3617_v15 = vpop.eup %3616  ;;  %2538 = vst.msk [vmem:[%s4243_s24 + $0x418] sm:$0xff] %vm2406_vm1, %v3615_v14  ;;  %v1840_v16 = vpop.f32.mrf.mxu2 }
  0xbc   : > { %v2000_v17 = vpop.f32.mrf.mxu3  ;;  %v3619_v18 = vpop.eup %3618  ;;  %2602 = vst.msk [vmem:[%s4243_s24 + $0x618] sm:$0xff] %vm2406_vm1, %v3617_v15  ;;  %3622 = vtanh.f32 %v1840_v16 }
  0xbd   : > { %v1522_v19 = vpop.f32.mrf.mxu0  ;;  %v1682_v20 = vpop.f32.mrf.mxu1  ;;  %2411 = vst.msk [vmem:[%s4243_s24 + $0x20] sm:$0xff] %vm2406_vm1, %v3619_v18  ;;  %3624 = vtanh.f32 %v2000_v17 }
  0xbe   : > { %v3621_v21 = vpop.eup %3620  ;;  %3626 = vtanh.f32 %v1522_v19 }
  0xbf   : > { %2475 = vst.msk [vmem:[%s4243_s24 + $0x220] sm:$0xff] %vm2406_vm1, %v3621_v21  ;;  %3628 = vtanh.f32 %v1682_v20 }
  0xc2   : > { %v3623_v22 = vpop.eup %3622 }
  0xc3   : > { %v3625_v23 = vpop.eup %3624  ;;  %2539 = vst.msk [vmem:[%s4243_s24 + $0x420] sm:$0xff] %vm2406_vm1, %v3623_v22  ;;  %v1842_v24 = vpop.f32.mrf.mxu2  ;;  %v3440_v22 = vld [vmem:[%s4165_s20 + $0x70] sm:$0xff] }
  0xc4   : > { %v2002_v25 = vpop.f32.mrf.mxu3  ;;  %v3627_v28 = vpop.eup %3626  ;;  %2603 = vst.msk [vmem:[%s4243_s24 + $0x620] sm:$0xff] %vm2406_vm1, %v3625_v23  ;;  %3630 = vtanh.f32 %v1842_v24  ;;  %v3472_v23 = vld [vmem:[%s4165_s20 + $0x170] sm:$0xff] }
  0xc5   : > { %v1525_v29 = vpop.f32.mrf.mxu0  ;;  %v1685_v30 = vpop.f32.mrf.mxu1  ;;  %2412 = vst.msk [vmem:[%s4243_s24 + $0x28] sm:$0xff] %vm2406_vm1, %v3627_v28  ;;  %3632 = vtanh.f32 %v2002_v25  ;;  %v3536_v28 = vld [vmem:[%s4165_s20 + $0x370] sm:$0xff] }
  0xc6   : > { %v3629_v33 = vpop.eup %3628  ;;  %3634 = vtanh.f32 %v1525_v29 }
  0xc7   : > { %2476 = vst.msk [vmem:[%s4243_s24 + $0x228] sm:$0xff] %vm2406_vm1, %v3629_v33  ;;  %3636 = vtanh.f32 %v1685_v30  ;;  %3304 = vmatmul.msk.bf16.gmra.mxu0 %vm1116_vm0, %v3437_v26  ;;  %3336 = vmatmul.msk.bf16.gmra.mxu1 %vm1116_vm0, %v3469_v27  ;;  %v3504_v27 = vld [vmem:[%s4165_s20 + $0x270] sm:$0xff] }
  0xc8   : > { %3368 = vmatmul.msk.bf16.gmra.mxu2 %vm1116_vm0, %v3501_v31  ;;  %3400 = vmatmul.msk.bf16.gmra.mxu3 %vm1116_vm0, %v3533_v32 }
  0xca   : > { %v3631_v34 = vpop.eup %3630 }
  0xcb   : > { %v3633_v35 = vpop.eup %3632  ;;  %2540 = vst.msk [vmem:[%s4243_s24 + $0x428] sm:$0xff] %vm2406_vm1, %v3631_v34  ;;  %v1845_v36 = vpop.f32.mrf.mxu2 }
  0xcc   : > { %v2005_v37 = vpop.f32.mrf.mxu3  ;;  %v3635_v38 = vpop.eup %3634  ;;  %2604 = vst.msk [vmem:[%s4243_s24 + $0x628] sm:$0xff] %vm2406_vm1, %v3633_v35  ;;  %3638 = vtanh.f32 %v1845_v36 }
  0xcd   : > { %v1527_v39 = vpop.f32.mrf.mxu0  ;;  %v1687_v40 = vpop.f32.mrf.mxu1  ;;  %2413 = vst.msk [vmem:[%s4243_s24 + $0x30] sm:$0xff] %vm2406_vm1, %v3635_v38  ;;  %3640 = vtanh.f32 %v2005_v37 }
  0xce   : > { %v3637_v41 = vpop.eup %3636  ;;  %3642 = vtanh.f32 %v1527_v39 }
  0xcf   : > { %2477 = vst.msk [vmem:[%s4243_s24 + $0x230] sm:$0xff] %vm2406_vm1, %v3637_v41  ;;  %3644 = vtanh.f32 %v1687_v40 }
  0xd2   : > { %v3639_v42 = vpop.eup %3638 }
  0xd3   : > { %v3641_v43 = vpop.eup %3640  ;;  %2541 = vst.msk [vmem:[%s4243_s24 + $0x430] sm:$0xff] %vm2406_vm1, %v3639_v42  ;;  %v1847_v44 = vpop.f32.mrf.mxu2  ;;  %v3441_v42 = vld [vmem:[%s4165_s20 + $0x78] sm:$0xff] }
  0xd4   : > { %v2007_v45 = vpop.f32.mrf.mxu3  ;;  %v3643_v48 = vpop.eup %3642  ;;  %2605 = vst.msk [vmem:[%s4243_s24 + $0x630] sm:$0xff] %vm2406_vm1, %v3641_v43  ;;  %3646 = vtanh.f32 %v1847_v44  ;;  %v3473_v43 = vld [vmem:[%s4165_s20 + $0x178] sm:$0xff] }
  0xd5   : > { %v1530_v49 = vpop.f32.mrf.mxu0  ;;  %v1690_v50 = vpop.f32.mrf.mxu1  ;;  %2414 = vst.msk [vmem:[%s4243_s24 + $0x38] sm:$0xff] %vm2406_vm1, %v3643_v48  ;;  %3648 = vtanh.f32 %v2007_v45  ;;  %v3537_v48 = vld [vmem:[%s4165_s20 + $0x378] sm:$0xff] }
  0xd6   : > { %v3645_v53 = vpop.eup %3644  ;;  %3650 = vtanh.f32 %v1530_v49 }
  0xd7   : > { %2478 = vst.msk [vmem:[%s4243_s24 + $0x238] sm:$0xff] %vm2406_vm1, %v3645_v53  ;;  %3652 = vtanh.f32 %v1690_v50  ;;  %3305 = vmatmul.msk.bf16.gmra.mxu0 %vm1116_vm0, %v3438_v46  ;;  %3337 = vmatmul.msk.bf16.gmra.mxu1 %vm1116_vm0, %v3470_v47  ;;  %v3505_v47 = vld [vmem:[%s4165_s20 + $0x278] sm:$0xff] }
  0xd8   : > { %3369 = vmatmul.msk.bf16.gmra.mxu2 %vm1116_vm0, %v3502_v51  ;;  %3401 = vmatmul.msk.bf16.gmra.mxu3 %vm1116_vm0, %v3534_v52 }
  0xda   : > { %v3647_v54 = vpop.eup %3646 }
  0xdb   : > { %v3649_v55 = vpop.eup %3648  ;;  %2542 = vst.msk [vmem:[%s4243_s24 + $0x438] sm:$0xff] %vm2406_vm1, %v3647_v54  ;;  %v1850_v56 = vpop.f32.mrf.mxu2 }
  0xdc   : > { %v2010_v57 = vpop.f32.mrf.mxu3  ;;  %v3651_v58 = vpop.eup %3650  ;;  %2606 = vst.msk [vmem:[%s4243_s24 + $0x638] sm:$0xff] %vm2406_vm1, %v3649_v55  ;;  %3654 = vtanh.f32 %v1850_v56 }
  0xdd   : > { %v1532_v59 = vpop.f32.mrf.mxu0  ;;  %v1692_v60 = vpop.f32.mrf.mxu1  ;;  %2415 = vst.msk [vmem:[%s4243_s24 + $0x40] sm:$0xff] %vm2406_vm1, %v3651_v58  ;;  %3656 = vtanh.f32 %v2010_v57 }
  0xde   : > { %v3653_v61 = vpop.eup %3652  ;;  %3658 = vtanh.f32 %v1532_v59 }
  0xdf   : > { %2479 = vst.msk [vmem:[%s4243_s24 + $0x240] sm:$0xff] %vm2406_vm1, %v3653_v61  ;;  %3660 = vtanh.f32 %v1692_v60 }
  0xe2   : > { %v3655_v62 = vpop.eup %3654 }
  0xe3   : > { %v3657_v63 = vpop.eup %3656  ;;  %2543 = vst.msk [vmem:[%s4243_s24 + $0x440] sm:$0xff] %vm2406_vm1, %v3655_v62  ;;  %v1852_v0 = vpop.f32.mrf.mxu2  ;;  %v3442_v62 = vld [vmem:[%s4165_s20 + $0x80] sm:$0xff] }
  0xe4   : > { %v2012_v1 = vpop.f32.mrf.mxu3  ;;  %v3659_v4 = vpop.eup %3658  ;;  %2607 = vst.msk [vmem:[%s4243_s24 + $0x640] sm:$0xff] %vm2406_vm1, %v3657_v63  ;;  %3662 = vtanh.f32 %v1852_v0  ;;  %v3474_v63 = vld [vmem:[%s4165_s20 + $0x180] sm:$0xff] }
  0xe5   : > { %v1535_v5 = vpop.f32.mrf.mxu0  ;;  %v1695_v6 = vpop.f32.mrf.mxu1  ;;  %2416 = vst.msk [vmem:[%s4243_s24 + $0x48] sm:$0xff] %vm2406_vm1, %v3659_v4  ;;  %3664 = vtanh.f32 %v2012_v1  ;;  %v3538_v4 = vld [vmem:[%s4165_s20 + $0x380] sm:$0xff] }
  0xe6   : > { %v3661_v9 = vpop.eup %3660  ;;  %3666 = vtanh.f32 %v1535_v5 }
  0xe7   : > { %2480 = vst.msk [vmem:[%s4243_s24 + $0x248] sm:$0xff] %vm2406_vm1, %v3661_v9  ;;  %3668 = vtanh.f32 %v1695_v6  ;;  %3306 = vmatmul.msk.bf16.gmra.mxu0 %vm1116_vm0, %v3439_v2  ;;  %3338 = vmatmul.msk.bf16.gmra.mxu1 %vm1116_vm0, %v3471_v3  ;;  %v3506_v3 = vld [vmem:[%s4165_s20 + $0x280] sm:$0xff] }
  0xe8   : > { %3370 = vmatmul.msk.bf16.gmra.mxu2 %vm1116_vm0, %v3503_v7  ;;  %3402 = vmatmul.msk.bf16.gmra.mxu3 %vm1116_vm0, %v3535_v8 }
  0xea   : > { %v3663_v10 = vpop.eup %3662 }
  0xeb   : > { %v3665_v11 = vpop.eup %3664  ;;  %2544 = vst.msk [vmem:[%s4243_s24 + $0x448] sm:$0xff] %vm2406_vm1, %v3663_v10  ;;  %v1855_v12 = vpop.f32.mrf.mxu2 }
  0xec   : > { %v2015_v13 = vpop.f32.mrf.mxu3  ;;  %v3667_v14 = vpop.eup %3666  ;;  %2608 = vst.msk [vmem:[%s4243_s24 + $0x648] sm:$0xff] %vm2406_vm1, %v3665_v11  ;;  %3670 = vtanh.f32 %v1855_v12 }
  0xed   : > { %v1537_v15 = vpop.f32.mrf.mxu0  ;;  %v1697_v16 = vpop.f32.mrf.mxu1  ;;  %2417 = vst.msk [vmem:[%s4243_s24 + $0x50] sm:$0xff] %vm2406_vm1, %v3667_v14  ;;  %3672 = vtanh.f32 %v2015_v13 }
  0xee   : > { %v3669_v17 = vpop.eup %3668  ;;  %3674 = vtanh.f32 %v1537_v15 }
  0xef   : > { %2481 = vst.msk [vmem:[%s4243_s24 + $0x250] sm:$0xff] %vm2406_vm1, %v3669_v17  ;;  %3676 = vtanh.f32 %v1697_v16 }
  0xf2   : > { %v3671_v18 = vpop.eup %3670 }
  0xf3   : > { %v3673_v19 = vpop.eup %3672  ;;  %2545 = vst.msk [vmem:[%s4243_s24 + $0x450] sm:$0xff] %vm2406_vm1, %v3671_v18  ;;  %v1857_v20 = vpop.f32.mrf.mxu2  ;;  %v3443_v18 = vld [vmem:[%s4165_s20 + $0x88] sm:$0xff] }
  0xf4   : > { %v2017_v21 = vpop.f32.mrf.mxu3  ;;  %v3675_v24 = vpop.eup %3674  ;;  %2609 = vst.msk [vmem:[%s4243_s24 + $0x650] sm:$0xff] %vm2406_vm1, %v3673_v19  ;;  %3678 = vtanh.f32 %v1857_v20  ;;  %v3475_v19 = vld [vmem:[%s4165_s20 + $0x188] sm:$0xff] }
  0xf5   : > { %v1540_v25 = vpop.f32.mrf.mxu0  ;;  %v1700_v26 = vpop.f32.mrf.mxu1  ;;  %2418 = vst.msk [vmem:[%s4243_s24 + $0x58] sm:$0xff] %vm2406_vm1, %v3675_v24  ;;  %3680 = vtanh.f32 %v2017_v21  ;;  %v3539_v24 = vld [vmem:[%s4165_s20 + $0x388] sm:$0xff] }
  0xf6   : > { %v3677_v29 = vpop.eup %3676  ;;  %3682 = vtanh.f32 %v1540_v25 }
  0xf7   : > { %2482 = vst.msk [vmem:[%s4243_s24 + $0x258] sm:$0xff] %vm2406_vm1, %v3677_v29  ;;  %3684 = vtanh.f32 %v1700_v26  ;;  %3307 = vmatmul.msk.bf16.gmra.mxu0 %vm1116_vm0, %v3440_v22  ;;  %3339 = vmatmul.msk.bf16.gmra.mxu1 %vm1116_vm0, %v3472_v23  ;;  %v3507_v23 = vld [vmem:[%s4165_s20 + $0x288] sm:$0xff] }
  0xf8   : > { %3371 = vmatmul.msk.bf16.gmra.mxu2 %vm1116_vm0, %v3504_v27  ;;  %3403 = vmatmul.msk.bf16.gmra.mxu3 %vm1116_vm0, %v3536_v28 }
  0xfa   : > { %v3679_v30 = vpop.eup %3678 }
  0xfb   : > { %v3681_v31 = vpop.eup %3680  ;;  %2546 = vst.msk [vmem:[%s4243_s24 + $0x458] sm:$0xff] %vm2406_vm1, %v3679_v30  ;;  %v1860_v32 = vpop.f32.mrf.mxu2 }
  0xfc   : > { %v2020_v33 = vpop.f32.mrf.mxu3  ;;  %v3683_v34 = vpop.eup %3682  ;;  %2610 = vst.msk [vmem:[%s4243_s24 + $0x658] sm:$0xff] %vm2406_vm1, %v3681_v31  ;;  %3686 = vtanh.f32 %v1860_v32 }
  0xfd   : > { %v1542_v35 = vpop.f32.mrf.mxu0  ;;  %v1702_v36 = vpop.f32.mrf.mxu1  ;;  %2419 = vst.msk [vmem:[%s4243_s24 + $0x60] sm:$0xff] %vm2406_vm1, %v3683_v34  ;;  %3688 = vtanh.f32 %v2020_v33 }
  0xfe   : > { %v3685_v37 = vpop.eup %3684  ;;  %3690 = vtanh.f32 %v1542_v35 }
  0xff   : > { %2483 = vst.msk [vmem:[%s4243_s24 + $0x260] sm:$0xff] %vm2406_vm1, %v3685_v37  ;;  %3692 = vtanh.f32 %v1702_v36 }
 0x102   : > { %v3687_v38 = vpop.eup %3686 }
 0x103   : > { %v3689_v39 = vpop.eup %3688  ;;  %2547 = vst.msk [vmem:[%s4243_s24 + $0x460] sm:$0xff] %vm2406_vm1, %v3687_v38  ;;  %v1862_v40 = vpop.f32.mrf.mxu2  ;;  %v3444_v38 = vld [vmem:[%s4165_s20 + $0x90] sm:$0xff] }
 0x104   : > { %v2022_v41 = vpop.f32.mrf.mxu3  ;;  %v3691_v44 = vpop.eup %3690  ;;  %2611 = vst.msk [vmem:[%s4243_s24 + $0x660] sm:$0xff] %vm2406_vm1, %v3689_v39  ;;  %3694 = vtanh.f32 %v1862_v40  ;;  %v3476_v39 = vld [vmem:[%s4165_s20 + $0x190] sm:$0xff] }
 0x105   : > { %v1545_v45 = vpop.f32.mrf.mxu0  ;;  %v1705_v46 = vpop.f32.mrf.mxu1  ;;  %2420 = vst.msk [vmem:[%s4243_s24 + $0x68] sm:$0xff] %vm2406_vm1, %v3691_v44  ;;  %3696 = vtanh.f32 %v2022_v41  ;;  %v3540_v44 = vld [vmem:[%s4165_s20 + $0x390] sm:$0xff] }
 0x106   : > { %v3693_v49 = vpop.eup %3692  ;;  %3698 = vtanh.f32 %v1545_v45 }
 0x107   : > { %2484 = vst.msk [vmem:[%s4243_s24 + $0x268] sm:$0xff] %vm2406_vm1, %v3693_v49  ;;  %3700 = vtanh.f32 %v1705_v46  ;;  %3308 = vmatmul.msk.bf16.gmra.mxu0 %vm1116_vm0, %v3441_v42  ;;  %3340 = vmatmul.msk.bf16.gmra.mxu1 %vm1116_vm0, %v3473_v43  ;;  %v3508_v43 = vld [vmem:[%s4165_s20 + $0x290] sm:$0xff] }
 0x108   : > { %3372 = vmatmul.msk.bf16.gmra.mxu2 %vm1116_vm0, %v3505_v47  ;;  %3404 = vmatmul.msk.bf16.gmra.mxu3 %vm1116_vm0, %v3537_v48 }
 0x10a   : > { %v3695_v50 = vpop.eup %3694 }
 0x10b   : > { %v3697_v51 = vpop.eup %3696  ;;  %2548 = vst.msk [vmem:[%s4243_s24 + $0x468] sm:$0xff] %vm2406_vm1, %v3695_v50  ;;  %v1865_v52 = vpop.f32.mrf.mxu2 }
 0x10c   : > { %v2025_v53 = vpop.f32.mrf.mxu3  ;;  %v3699_v54 = vpop.eup %3698  ;;  %2612 = vst.msk [vmem:[%s4243_s24 + $0x668] sm:$0xff] %vm2406_vm1, %v3697_v51  ;;  %3702 = vtanh.f32 %v1865_v52 }
 0x10d   : > { %v1547_v55 = vpop.f32.mrf.mxu0  ;;  %v1707_v56 = vpop.f32.mrf.mxu1  ;;  %2421 = vst.msk [vmem:[%s4243_s24 + $0x70] sm:$0xff] %vm2406_vm1, %v3699_v54  ;;  %3704 = vtanh.f32 %v2025_v53 }
 0x10e   : > { %v3701_v57 = vpop.eup %3700  ;;  %3706 = vtanh.f32 %v1547_v55 }
 0x10f   : > { %2485 = vst.msk [vmem:[%s4243_s24 + $0x270] sm:$0xff] %vm2406_vm1, %v3701_v57  ;;  %3708 = vtanh.f32 %v1707_v56 }
 0x112   : > { %v3703_v58 = vpop.eup %3702 }
 0x113   : > { %v3705_v59 = vpop.eup %3704  ;;  %2549 = vst.msk [vmem:[%s4243_s24 + $0x470] sm:$0xff] %vm2406_vm1, %v3703_v58  ;;  %v1867_v60 = vpop.f32.mrf.mxu2  ;;  %v3445_v58 = vld [vmem:[%s4165_s20 + $0x98] sm:$0xff] }
 0x114   : > { %v2027_v61 = vpop.f32.mrf.mxu3  ;;  %v3707_v0 = vpop.eup %3706  ;;  %2613 = vst.msk [vmem:[%s4243_s24 + $0x670] sm:$0xff] %vm2406_vm1, %v3705_v59  ;;  %3710 = vtanh.f32 %v1867_v60  ;;  %v3477_v59 = vld [vmem:[%s4165_s20 + $0x198] sm:$0xff] }
 0x115   : > { %v1550_v1 = vpop.f32.mrf.mxu0  ;;  %v1710_v2 = vpop.f32.mrf.mxu1  ;;  %2422 = vst.msk [vmem:[%s4243_s24 + $0x78] sm:$0xff] %vm2406_vm1, %v3707_v0  ;;  %3712 = vtanh.f32 %v2027_v61  ;;  %v3541_v0 = vld [vmem:[%s4165_s20 + $0x398] sm:$0xff] }
 0x116   : > { %v3709_v5 = vpop.eup %3708  ;;  %3714 = vtanh.f32 %v1550_v1 }
 0x117   : > { %2486 = vst.msk [vmem:[%s4243_s24 + $0x278] sm:$0xff] %vm2406_vm1, %v3709_v5  ;;  %3716 = vtanh.f32 %v1710_v2  ;;  %3309 = vmatmul.msk.bf16.gmra.mxu0 %vm1116_vm0, %v3442_v62  ;;  %3341 = vmatmul.msk.bf16.gmra.mxu1 %vm1116_vm0, %v3474_v63  ;;  %v3509_v63 = vld [vmem:[%s4165_s20 + $0x298] sm:$0xff] }
 0x118   : > { %3373 = vmatmul.msk.bf16.gmra.mxu2 %vm1116_vm0, %v3506_v3  ;;  %3405 = vmatmul.msk.bf16.gmra.mxu3 %vm1116_vm0, %v3538_v4 }
 0x11a   : > { %v3711_v6 = vpop.eup %3710 }
 0x11b   : > { %v3713_v7 = vpop.eup %3712  ;;  %2550 = vst.msk [vmem:[%s4243_s24 + $0x478] sm:$0xff] %vm2406_vm1, %v3711_v6  ;;  %v1870_v8 = vpop.f32.mrf.mxu2 }
 0x11c   : > { %v2030_v9 = vpop.f32.mrf.mxu3  ;;  %v3715_v10 = vpop.eup %3714  ;;  %2614 = vst.msk [vmem:[%s4243_s24 + $0x678] sm:$0xff] %vm2406_vm1, %v3713_v7  ;;  %3718 = vtanh.f32 %v1870_v8 }
 0x11d   : > { %v1552_v11 = vpop.f32.mrf.mxu0  ;;  %v1712_v12 = vpop.f32.mrf.mxu1  ;;  %2423 = vst.msk [vmem:[%s4243_s24 + $0x80] sm:$0xff] %vm2406_vm1, %v3715_v10  ;;  %3720 = vtanh.f32 %v2030_v9 }
 0x11e   : > { %v3717_v13 = vpop.eup %3716  ;;  %3722 = vtanh.f32 %v1552_v11 }
 0x11f   : > { %2487 = vst.msk [vmem:[%s4243_s24 + $0x280] sm:$0xff] %vm2406_vm1, %v3717_v13  ;;  %3724 = vtanh.f32 %v1712_v12 }
 0x122   : > { %v3719_v14 = vpop.eup %3718 }
 0x123   : > { %v3721_v15 = vpop.eup %3720  ;;  %2551 = vst.msk [vmem:[%s4243_s24 + $0x480] sm:$0xff] %vm2406_vm1, %v3719_v14  ;;  %v1872_v16 = vpop.f32.mrf.mxu2  ;;  %v3446_v14 = vld [vmem:[%s4165_s20 + $0xa0] sm:$0xff] }
 0x124   : > { %v2032_v17 = vpop.f32.mrf.mxu3  ;;  %v3723_v20 = vpop.eup %3722  ;;  %2615 = vst.msk [vmem:[%s4243_s24 + $0x680] sm:$0xff] %vm2406_vm1, %v3721_v15  ;;  %3726 = vtanh.f32 %v1872_v16  ;;  %v3478_v15 = vld [vmem:[%s4165_s20 + $0x1a0] sm:$0xff] }
 0x125   : > { %v1555_v21 = vpop.f32.mrf.mxu0  ;;  %v1715_v22 = vpop.f32.mrf.mxu1  ;;  %2424 = vst.msk [vmem:[%s4243_s24 + $0x88] sm:$0xff] %vm2406_vm1, %v3723_v20  ;;  %3728 = vtanh.f32 %v2032_v17  ;;  %v3542_v20 = vld [vmem:[%s4165_s20 + $0x3a0] sm:$0xff] }
 0x126   : > { %v3725_v25 = vpop.eup %3724  ;;  %3730 = vtanh.f32 %v1555_v21 }
 0x127   : > { %2488 = vst.msk [vmem:[%s4243_s24 + $0x288] sm:$0xff] %vm2406_vm1, %v3725_v25  ;;  %3732 = vtanh.f32 %v1715_v22  ;;  %3310 = vmatmul.msk.bf16.gmra.mxu0 %vm1116_vm0, %v3443_v18  ;;  %3342 = vmatmul.msk.bf16.gmra.mxu1 %vm1116_vm0, %v3475_v19  ;;  %v3510_v19 = vld [vmem:[%s4165_s20 + $0x2a0] sm:$0xff] }
 0x128   : > { %3374 = vmatmul.msk.bf16.gmra.mxu2 %vm1116_vm0, %v3507_v23  ;;  %3406 = vmatmul.msk.bf16.gmra.mxu3 %vm1116_vm0, %v3539_v24 }
 0x12a   : > { %v3727_v26 = vpop.eup %3726 }
 0x12b   : > { %v3729_v27 = vpop.eup %3728  ;;  %2552 = vst.msk [vmem:[%s4243_s24 + $0x488] sm:$0xff] %vm2406_vm1, %v3727_v26  ;;  %v1875_v28 = vpop.f32.mrf.mxu2 }
 0x12c   : > { %v2035_v29 = vpop.f32.mrf.mxu3  ;;  %v3731_v30 = vpop.eup %3730  ;;  %2616 = vst.msk [vmem:[%s4243_s24 + $0x688] sm:$0xff] %vm2406_vm1, %v3729_v27  ;;  %3734 = vtanh.f32 %v1875_v28 }
 0x12d   : > { %v1557_v31 = vpop.f32.mrf.mxu0  ;;  %v1717_v32 = vpop.f32.mrf.mxu1  ;;  %2425 = vst.msk [vmem:[%s4243_s24 + $0x90] sm:$0xff] %vm2406_vm1, %v3731_v30  ;;  %3736 = vtanh.f32 %v2035_v29 }
 0x12e   : > { %v3733_v33 = vpop.eup %3732  ;;  %3738 = vtanh.f32 %v1557_v31 }
 0x12f   : > { %2489 = vst.msk [vmem:[%s4243_s24 + $0x290] sm:$0xff] %vm2406_vm1, %v3733_v33  ;;  %3740 = vtanh.f32 %v1717_v32 }
 0x132   : > { %v3735_v34 = vpop.eup %3734 }
 0x133   : > { %v3737_v35 = vpop.eup %3736  ;;  %2553 = vst.msk [vmem:[%s4243_s24 + $0x490] sm:$0xff] %vm2406_vm1, %v3735_v34  ;;  %v1877_v36 = vpop.f32.mrf.mxu2  ;;  %v3447_v34 = vld [vmem:[%s4165_s20 + $0xa8] sm:$0xff] }
 0x134   : > { %v2037_v37 = vpop.f32.mrf.mxu3  ;;  %v3739_v40 = vpop.eup %3738  ;;  %2617 = vst.msk [vmem:[%s4243_s24 + $0x690] sm:$0xff] %vm2406_vm1, %v3737_v35  ;;  %3742 = vtanh.f32 %v1877_v36  ;;  %v3479_v35 = vld [vmem:[%s4165_s20 + $0x1a8] sm:$0xff] }
 0x135   : > { %v1560_v41 = vpop.f32.mrf.mxu0  ;;  %v1720_v42 = vpop.f32.mrf.mxu1  ;;  %2426 = vst.msk [vmem:[%s4243_s24 + $0x98] sm:$0xff] %vm2406_vm1, %v3739_v40  ;;  %3744 = vtanh.f32 %v2037_v37  ;;  %v3543_v40 = vld [vmem:[%s4165_s20 + $0x3a8] sm:$0xff] }
 0x136   : > { %v3741_v45 = vpop.eup %3740  ;;  %3746 = vtanh.f32 %v1560_v41 }
 0x137   : > { %2490 = vst.msk [vmem:[%s4243_s24 + $0x298] sm:$0xff] %vm2406_vm1, %v3741_v45  ;;  %3748 = vtanh.f32 %v1720_v42  ;;  %3311 = vmatmul.msk.bf16.gmra.mxu0 %vm1116_vm0, %v3444_v38  ;;  %3343 = vmatmul.msk.bf16.gmra.mxu1 %vm1116_vm0, %v3476_v39  ;;  %v3511_v39 = vld [vmem:[%s4165_s20 + $0x2a8] sm:$0xff] }
 0x138   : > { %3375 = vmatmul.msk.bf16.gmra.mxu2 %vm1116_vm0, %v3508_v43  ;;  %3407 = vmatmul.msk.bf16.gmra.mxu3 %vm1116_vm0, %v3540_v44 }
 0x13a   : > { %v3743_v46 = vpop.eup %3742 }
 0x13b   : > { %v3745_v47 = vpop.eup %3744  ;;  %2554 = vst.msk [vmem:[%s4243_s24 + $0x498] sm:$0xff] %vm2406_vm1, %v3743_v46  ;;  %v1880_v48 = vpop.f32.mrf.mxu2 }
 0x13c   : > { %v2040_v49 = vpop.f32.mrf.mxu3  ;;  %v3747_v50 = vpop.eup %3746  ;;  %2618 = vst.msk [vmem:[%s4243_s24 + $0x698] sm:$0xff] %vm2406_vm1, %v3745_v47  ;;  %3750 = vtanh.f32 %v1880_v48 }
 0x13d   : > { %v1562_v51 = vpop.f32.mrf.mxu0  ;;  %v1722_v52 = vpop.f32.mrf.mxu1  ;;  %2427 = vst.msk [vmem:[%s4243_s24 + $0xa0] sm:$0xff] %vm2406_vm1, %v3747_v50  ;;  %3752 = vtanh.f32 %v2040_v49 }
 0x13e   : > { %v3749_v53 = vpop.eup %3748  ;;  %3754 = vtanh.f32 %v1562_v51 }
 0x13f   : > { %2491 = vst.msk [vmem:[%s4243_s24 + $0x2a0] sm:$0xff] %vm2406_vm1, %v3749_v53  ;;  %3756 = vtanh.f32 %v1722_v52 }
 0x142   : > { %v3751_v54 = vpop.eup %3750 }
 0x143   : > { %v3753_v55 = vpop.eup %3752  ;;  %2555 = vst.msk [vmem:[%s4243_s24 + $0x4a0] sm:$0xff] %vm2406_vm1, %v3751_v54  ;;  %v1882_v56 = vpop.f32.mrf.mxu2  ;;  %v3448_v54 = vld [vmem:[%s4165_s20 + $0xb0] sm:$0xff] }
 0x144   : > { %v2042_v57 = vpop.f32.mrf.mxu3  ;;  %v3755_v60 = vpop.eup %3754  ;;  %2619 = vst.msk [vmem:[%s4243_s24 + $0x6a0] sm:$0xff] %vm2406_vm1, %v3753_v55  ;;  %3758 = vtanh.f32 %v1882_v56  ;;  %v3480_v55 = vld [vmem:[%s4165_s20 + $0x1b0] sm:$0xff] }
 0x145   : > { %v1565_v61 = vpop.f32.mrf.mxu0  ;;  %v1725_v62 = vpop.f32.mrf.mxu1  ;;  %2428 = vst.msk [vmem:[%s4243_s24 + $0xa8] sm:$0xff] %vm2406_vm1, %v3755_v60  ;;  %3760 = vtanh.f32 %v2042_v57  ;;  %v3544_v60 = vld [vmem:[%s4165_s20 + $0x3b0] sm:$0xff] }
 0x146   : > { %v3757_v1 = vpop.eup %3756  ;;  %3762 = vtanh.f32 %v1565_v61 }
 0x147   : > { %2492 = vst.msk [vmem:[%s4243_s24 + $0x2a8] sm:$0xff] %vm2406_vm1, %v3757_v1  ;;  %3764 = vtanh.f32 %v1725_v62  ;;  %3312 = vmatmul.msk.bf16.gmra.mxu0 %vm1116_vm0, %v3445_v58  ;;  %3344 = vmatmul.msk.bf16.gmra.mxu1 %vm1116_vm0, %v3477_v59  ;;  %v3512_v59 = vld [vmem:[%s4165_s20 + $0x2b0] sm:$0xff] }
 0x148   : > { %3376 = vmatmul.msk.bf16.gmra.mxu2 %vm1116_vm0, %v3509_v63  ;;  %3408 = vmatmul.msk.bf16.gmra.mxu3 %vm1116_vm0, %v3541_v0 }
 0x14a   : > { %v3759_v2 = vpop.eup %3758 }
 0x14b   : > { %v3761_v3 = vpop.eup %3760  ;;  %2556 = vst.msk [vmem:[%s4243_s24 + $0x4a8] sm:$0xff] %vm2406_vm1, %v3759_v2  ;;  %v1885_v4 = vpop.f32.mrf.mxu2 }
 0x14c   : > { %v2045_v5 = vpop.f32.mrf.mxu3  ;;  %v3763_v6 = vpop.eup %3762  ;;  %2620 = vst.msk [vmem:[%s4243_s24 + $0x6a8] sm:$0xff] %vm2406_vm1, %v3761_v3  ;;  %3766 = vtanh.f32 %v1885_v4 }
 0x14d   : > { %v1567_v7 = vpop.f32.mrf.mxu0  ;;  %v1727_v8 = vpop.f32.mrf.mxu1  ;;  %2429 = vst.msk [vmem:[%s4243_s24 + $0xb0] sm:$0xff] %vm2406_vm1, %v3763_v6  ;;  %3768 = vtanh.f32 %v2045_v5 }
 0x14e   : > { %v3765_v9 = vpop.eup %3764  ;;  %3770 = vtanh.f32 %v1567_v7 }
 0x14f   : > { %2493 = vst.msk [vmem:[%s4243_s24 + $0x2b0] sm:$0xff] %vm2406_vm1, %v3765_v9  ;;  %3772 = vtanh.f32 %v1727_v8 }
 0x152   : > { %v3767_v10 = vpop.eup %3766 }
 0x153   : > { %v3769_v11 = vpop.eup %3768  ;;  %2557 = vst.msk [vmem:[%s4243_s24 + $0x4b0] sm:$0xff] %vm2406_vm1, %v3767_v10  ;;  %v1887_v12 = vpop.f32.mrf.mxu2  ;;  %v3449_v10 = vld [vmem:[%s4165_s20 + $0xb8] sm:$0xff] }
 0x154   : > { %v2047_v13 = vpop.f32.mrf.mxu3  ;;  %v3771_v16 = vpop.eup %3770  ;;  %2621 = vst.msk [vmem:[%s4243_s24 + $0x6b0] sm:$0xff] %vm2406_vm1, %v3769_v11  ;;  %3774 = vtanh.f32 %v1887_v12  ;;  %v3481_v11 = vld [vmem:[%s4165_s20 + $0x1b8] sm:$0xff] }
 0x155   : > { %v1570_v17 = vpop.f32.mrf.mxu0  ;;  %v1730_v18 = vpop.f32.mrf.mxu1  ;;  %2430 = vst.msk [vmem:[%s4243_s24 + $0xb8] sm:$0xff] %vm2406_vm1, %v3771_v16  ;;  %3776 = vtanh.f32 %v2047_v13  ;;  %v3545_v16 = vld [vmem:[%s4165_s20 + $0x3b8] sm:$0xff] }
 0x156   : > { %v3773_v21 = vpop.eup %3772  ;;  %3778 = vtanh.f32 %v1570_v17 }
 0x157   : > { %2494 = vst.msk [vmem:[%s4243_s24 + $0x2b8] sm:$0xff] %vm2406_vm1, %v3773_v21  ;;  %3780 = vtanh.f32 %v1730_v18  ;;  %3313 = vmatmul.msk.bf16.gmra.mxu0 %vm1116_vm0, %v3446_v14  ;;  %3345 = vmatmul.msk.bf16.gmra.mxu1 %vm1116_vm0, %v3478_v15  ;;  %v3513_v15 = vld [vmem:[%s4165_s20 + $0x2b8] sm:$0xff] }
 0x158   : > { %3377 = vmatmul.msk.bf16.gmra.mxu2 %vm1116_vm0, %v3510_v19  ;;  %3409 = vmatmul.msk.bf16.gmra.mxu3 %vm1116_vm0, %v3542_v20 }
 0x15a   : > { %v3775_v22 = vpop.eup %3774 }
 0x15b   : > { %v3777_v23 = vpop.eup %3776  ;;  %2558 = vst.msk [vmem:[%s4243_s24 + $0x4b8] sm:$0xff] %vm2406_vm1, %v3775_v22  ;;  %v1890_v24 = vpop.f32.mrf.mxu2 }
 0x15c   : > { %v2050_v25 = vpop.f32.mrf.mxu3  ;;  %v3779_v26 = vpop.eup %3778  ;;  %2622 = vst.msk [vmem:[%s4243_s24 + $0x6b8] sm:$0xff] %vm2406_vm1, %v3777_v23  ;;  %3782 = vtanh.f32 %v1890_v24 }
 0x15d   : > { %v1572_v27 = vpop.f32.mrf.mxu0  ;;  %v1732_v28 = vpop.f32.mrf.mxu1  ;;  %2431 = vst.msk [vmem:[%s4243_s24 + $0xc0] sm:$0xff] %vm2406_vm1, %v3779_v26  ;;  %3784 = vtanh.f32 %v2050_v25 }
 0x15e   : > { %v3781_v29 = vpop.eup %3780  ;;  %3786 = vtanh.f32 %v1572_v27 }
 0x15f   : > { %2495 = vst.msk [vmem:[%s4243_s24 + $0x2c0] sm:$0xff] %vm2406_vm1, %v3781_v29  ;;  %3788 = vtanh.f32 %v1732_v28 }
 0x162   : > { %v3783_v30 = vpop.eup %3782 }
 0x163   : > { %v3785_v31 = vpop.eup %3784  ;;  %2559 = vst.msk [vmem:[%s4243_s24 + $0x4c0] sm:$0xff] %vm2406_vm1, %v3783_v30  ;;  %v1892_v32 = vpop.f32.mrf.mxu2  ;;  %v3450_v30 = vld [vmem:[%s4165_s20 + $0xc0] sm:$0xff] }
 0x164   : > { %v2052_v33 = vpop.f32.mrf.mxu3  ;;  %v3787_v36 = vpop.eup %3786  ;;  %2623 = vst.msk [vmem:[%s4243_s24 + $0x6c0] sm:$0xff] %vm2406_vm1, %v3785_v31  ;;  %3790 = vtanh.f32 %v1892_v32  ;;  %v3482_v31 = vld [vmem:[%s4165_s20 + $0x1c0] sm:$0xff] }
 0x165   : > { %v1575_v37 = vpop.f32.mrf.mxu0  ;;  %v1735_v38 = vpop.f32.mrf.mxu1  ;;  %2432 = vst.msk [vmem:[%s4243_s24 + $0xc8] sm:$0xff] %vm2406_vm1, %v3787_v36  ;;  %3792 = vtanh.f32 %v2052_v33  ;;  %v3546_v36 = vld [vmem:[%s4165_s20 + $0x3c0] sm:$0xff] }
 0x166   : > { %v3789_v41 = vpop.eup %3788  ;;  %3794 = vtanh.f32 %v1575_v37 }
 0x167   : > { %2496 = vst.msk [vmem:[%s4243_s24 + $0x2c8] sm:$0xff] %vm2406_vm1, %v3789_v41  ;;  %3796 = vtanh.f32 %v1735_v38  ;;  %3314 = vmatmul.msk.bf16.gmra.mxu0 %vm1116_vm0, %v3447_v34  ;;  %3346 = vmatmul.msk.bf16.gmra.mxu1 %vm1116_vm0, %v3479_v35  ;;  %v3514_v35 = vld [vmem:[%s4165_s20 + $0x2c0] sm:$0xff] }
 0x168   : > { %3378 = vmatmul.msk.bf16.gmra.mxu2 %vm1116_vm0, %v3511_v39  ;;  %3410 = vmatmul.msk.bf16.gmra.mxu3 %vm1116_vm0, %v3543_v40 }
 0x16a   : > { %v3791_v42 = vpop.eup %3790 }
 0x16b   : > { %v3793_v43 = vpop.eup %3792  ;;  %2560 = vst.msk [vmem:[%s4243_s24 + $0x4c8] sm:$0xff] %vm2406_vm1, %v3791_v42  ;;  %v1895_v44 = vpop.f32.mrf.mxu2 }
 0x16c   : > { %v2055_v45 = vpop.f32.mrf.mxu3  ;;  %v3795_v46 = vpop.eup %3794  ;;  %2624 = vst.msk [vmem:[%s4243_s24 + $0x6c8] sm:$0xff] %vm2406_vm1, %v3793_v43  ;;  %3798 = vtanh.f32 %v1895_v44 }
 0x16d   : > { %v1577_v47 = vpop.f32.mrf.mxu0  ;;  %v1737_v48 = vpop.f32.mrf.mxu1  ;;  %2433 = vst.msk [vmem:[%s4243_s24 + $0xd0] sm:$0xff] %vm2406_vm1, %v3795_v46  ;;  %3800 = vtanh.f32 %v2055_v45 }
 0x16e   : > { %v3797_v49 = vpop.eup %3796  ;;  %3802 = vtanh.f32 %v1577_v47 }
 0x16f   : > { %2497 = vst.msk [vmem:[%s4243_s24 + $0x2d0] sm:$0xff] %vm2406_vm1, %v3797_v49  ;;  %3804 = vtanh.f32 %v1737_v48 }
 0x172   : > { %v3799_v50 = vpop.eup %3798 }
 0x173   : > { %v3801_v51 = vpop.eup %3800  ;;  %2561 = vst.msk [vmem:[%s4243_s24 + $0x4d0] sm:$0xff] %vm2406_vm1, %v3799_v50  ;;  %v1897_v52 = vpop.f32.mrf.mxu2  ;;  %v3451_v50 = vld [vmem:[%s4165_s20 + $0xc8] sm:$0xff] }
 0x174   : > { %v2057_v53 = vpop.f32.mrf.mxu3  ;;  %v3803_v56 = vpop.eup %3802  ;;  %2625 = vst.msk [vmem:[%s4243_s24 + $0x6d0] sm:$0xff] %vm2406_vm1, %v3801_v51  ;;  %3806 = vtanh.f32 %v1897_v52  ;;  %v3483_v51 = vld [vmem:[%s4165_s20 + $0x1c8] sm:$0xff] }
 0x175   : > { %v1580_v57 = vpop.f32.mrf.mxu0  ;;  %v1740_v58 = vpop.f32.mrf.mxu1  ;;  %2434 = vst.msk [vmem:[%s4243_s24 + $0xd8] sm:$0xff] %vm2406_vm1, %v3803_v56  ;;  %3808 = vtanh.f32 %v2057_v53  ;;  %v3547_v56 = vld [vmem:[%s4165_s20 + $0x3c8] sm:$0xff] }
 0x176   : > { %v3805_v61 = vpop.eup %3804  ;;  %3810 = vtanh.f32 %v1580_v57 }
 0x177   : > { %2498 = vst.msk [vmem:[%s4243_s24 + $0x2d8] sm:$0xff] %vm2406_vm1, %v3805_v61  ;;  %3812 = vtanh.f32 %v1740_v58  ;;  %3315 = vmatmul.msk.bf16.gmra.mxu0 %vm1116_vm0, %v3448_v54  ;;  %3347 = vmatmul.msk.bf16.gmra.mxu1 %vm1116_vm0, %v3480_v55  ;;  %v3515_v55 = vld [vmem:[%s4165_s20 + $0x2c8] sm:$0xff] }
 0x178   : > { %3379 = vmatmul.msk.bf16.gmra.mxu2 %vm1116_vm0, %v3512_v59  ;;  %3411 = vmatmul.msk.bf16.gmra.mxu3 %vm1116_vm0, %v3544_v60 }
 0x17a   : > { %v3807_v62 = vpop.eup %3806 }
 0x17b   : > { %v3809_v63 = vpop.eup %3808  ;;  %2562 = vst.msk [vmem:[%s4243_s24 + $0x4d8] sm:$0xff] %vm2406_vm1, %v3807_v62  ;;  %v1900_v0 = vpop.f32.mrf.mxu2 }
 0x17c   : > { %v2060_v1 = vpop.f32.mrf.mxu3  ;;  %v3811_v2 = vpop.eup %3810  ;;  %2626 = vst.msk [vmem:[%s4243_s24 + $0x6d8] sm:$0xff] %vm2406_vm1, %v3809_v63  ;;  %3814 = vtanh.f32 %v1900_v0 }
 0x17d   : > { %v1582_v3 = vpop.f32.mrf.mxu0  ;;  %v1742_v4 = vpop.f32.mrf.mxu1  ;;  %2435 = vst.msk [vmem:[%s4243_s24 + $0xe0] sm:$0xff] %vm2406_vm1, %v3811_v2  ;;  %3816 = vtanh.f32 %v2060_v1 }
 0x17e   : > { %v3813_v5 = vpop.eup %3812  ;;  %3818 = vtanh.f32 %v1582_v3 }
 0x17f   : > { %2499 = vst.msk [vmem:[%s4243_s24 + $0x2e0] sm:$0xff] %vm2406_vm1, %v3813_v5  ;;  %3820 = vtanh.f32 %v1742_v4 }
 0x182   : > { %v3815_v6 = vpop.eup %3814 }
 0x183   : > { %v3817_v7 = vpop.eup %3816  ;;  %2563 = vst.msk [vmem:[%s4243_s24 + $0x4e0] sm:$0xff] %vm2406_vm1, %v3815_v6  ;;  %v1902_v8 = vpop.f32.mrf.mxu2  ;;  %v3452_v6 = vld [vmem:[%s4165_s20 + $0xd0] sm:$0xff] }
 0x184   : > { %v2062_v9 = vpop.f32.mrf.mxu3  ;;  %v3819_v12 = vpop.eup %3818  ;;  %2627 = vst.msk [vmem:[%s4243_s24 + $0x6e0] sm:$0xff] %vm2406_vm1, %v3817_v7  ;;  %3822 = vtanh.f32 %v1902_v8  ;;  %v3484_v7 = vld [vmem:[%s4165_s20 + $0x1d0] sm:$0xff] }
 0x185   : > { %v1585_v13 = vpop.f32.mrf.mxu0  ;;  %v1745_v14 = vpop.f32.mrf.mxu1  ;;  %2436 = vst.msk [vmem:[%s4243_s24 + $0xe8] sm:$0xff] %vm2406_vm1, %v3819_v12  ;;  %3824 = vtanh.f32 %v2062_v9  ;;  %v3548_v12 = vld [vmem:[%s4165_s20 + $0x3d0] sm:$0xff] }
 0x186   : > { %v3821_v17 = vpop.eup %3820  ;;  %3826 = vtanh.f32 %v1585_v13 }
 0x187   : > { %2500 = vst.msk [vmem:[%s4243_s24 + $0x2e8] sm:$0xff] %vm2406_vm1, %v3821_v17  ;;  %3828 = vtanh.f32 %v1745_v14  ;;  %3316 = vmatmul.msk.bf16.gmra.mxu0 %vm1116_vm0, %v3449_v10  ;;  %3348 = vmatmul.msk.bf16.gmra.mxu1 %vm1116_vm0, %v3481_v11  ;;  %v3516_v11 = vld [vmem:[%s4165_s20 + $0x2d0] sm:$0xff] }
 0x188   : > { %3380 = vmatmul.msk.bf16.gmra.mxu2 %vm1116_vm0, %v3513_v15  ;;  %3412 = vmatmul.msk.bf16.gmra.mxu3 %vm1116_vm0, %v3545_v16 }
 0x18a   : > { %v3823_v18 = vpop.eup %3822 }
 0x18b   : > { %v3825_v19 = vpop.eup %3824  ;;  %2564 = vst.msk [vmem:[%s4243_s24 + $0x4e8] sm:$0xff] %vm2406_vm1, %v3823_v18  ;;  %v1905_v20 = vpop.f32.mrf.mxu2 }
 0x18c   : > { %v2065_v21 = vpop.f32.mrf.mxu3  ;;  %v3827_v22 = vpop.eup %3826  ;;  %2628 = vst.msk [vmem:[%s4243_s24 + $0x6e8] sm:$0xff] %vm2406_vm1, %v3825_v19  ;;  %3830 = vtanh.f32 %v1905_v20 }
 0x18d   : > { %v1587_v23 = vpop.f32.mrf.mxu0  ;;  %v1747_v24 = vpop.f32.mrf.mxu1  ;;  %2437 = vst.msk [vmem:[%s4243_s24 + $0xf0] sm:$0xff] %vm2406_vm1, %v3827_v22  ;;  %3832 = vtanh.f32 %v2065_v21 }
 0x18e   : > { %v3829_v25 = vpop.eup %3828  ;;  %3834 = vtanh.f32 %v1587_v23 }
 0x18f   : > { %2501 = vst.msk [vmem:[%s4243_s24 + $0x2f0] sm:$0xff] %vm2406_vm1, %v3829_v25  ;;  %3836 = vtanh.f32 %v1747_v24 }
 0x192   : > { %v3831_v26 = vpop.eup %3830 }
 0x193   : > { %v3833_v27 = vpop.eup %3832  ;;  %2565 = vst.msk [vmem:[%s4243_s24 + $0x4f0] sm:$0xff] %vm2406_vm1, %v3831_v26  ;;  %v1907_v28 = vpop.f32.mrf.mxu2  ;;  %v3453_v26 = vld [vmem:[%s4165_s20 + $0xd8] sm:$0xff] }
 0x194   : > { %v2067_v29 = vpop.f32.mrf.mxu3  ;;  %v3835_v32 = vpop.eup %3834  ;;  %2629 = vst.msk [vmem:[%s4243_s24 + $0x6f0] sm:$0xff] %vm2406_vm1, %v3833_v27  ;;  %3838 = vtanh.f32 %v1907_v28  ;;  %v3485_v27 = vld [vmem:[%s4165_s20 + $0x1d8] sm:$0xff] }
 0x195   : > { %v1590_v33 = vpop.f32.mrf.mxu0  ;;  %v1750_v34 = vpop.f32.mrf.mxu1  ;;  %2438 = vst.msk [vmem:[%s4243_s24 + $0xf8] sm:$0xff] %vm2406_vm1, %v3835_v32  ;;  %3840 = vtanh.f32 %v2067_v29  ;;  %v3549_v32 = vld [vmem:[%s4165_s20 + $0x3d8] sm:$0xff] }
 0x196   : > { %v3837_v37 = vpop.eup %3836  ;;  %3842 = vtanh.f32 %v1590_v33 }
 0x197   : > { %2502 = vst.msk [vmem:[%s4243_s24 + $0x2f8] sm:$0xff] %vm2406_vm1, %v3837_v37  ;;  %3844 = vtanh.f32 %v1750_v34  ;;  %3317 = vmatmul.msk.bf16.gmra.mxu0 %vm1116_vm0, %v3450_v30  ;;  %3349 = vmatmul.msk.bf16.gmra.mxu1 %vm1116_vm0, %v3482_v31  ;;  %v3517_v31 = vld [vmem:[%s4165_s20 + $0x2d8] sm:$0xff] }
 0x198   : > { %3381 = vmatmul.msk.bf16.gmra.mxu2 %vm1116_vm0, %v3514_v35  ;;  %3413 = vmatmul.msk.bf16.gmra.mxu3 %vm1116_vm0, %v3546_v36 }
 0x19a   : > { %v3839_v38 = vpop.eup %3838 }
 0x19b   : > { %v3841_v39 = vpop.eup %3840  ;;  %2566 = vst.msk [vmem:[%s4243_s24 + $0x4f8] sm:$0xff] %vm2406_vm1, %v3839_v38  ;;  %v1910_v40 = vpop.f32.mrf.mxu2 }
 0x19c   : > { %v2070_v41 = vpop.f32.mrf.mxu3  ;;  %v3843_v42 = vpop.eup %3842  ;;  %2630 = vst.msk [vmem:[%s4243_s24 + $0x6f8] sm:$0xff] %vm2406_vm1, %v3841_v39  ;;  %3846 = vtanh.f32 %v1910_v40 }
 0x19d   : > { %v1592_v43 = vpop.f32.mrf.mxu0  ;;  %v1752_v44 = vpop.f32.mrf.mxu1  ;;  %2439 = vst.msk [vmem:[%s4243_s24 + $0x100] sm:$0xff] %vm2406_vm1, %v3843_v42  ;;  %3848 = vtanh.f32 %v2070_v41 }
 0x19e   : > { %v3845_v45 = vpop.eup %3844  ;;  %3850 = vtanh.f32 %v1592_v43 }
 0x19f   : > { %2503 = vst.msk [vmem:[%s4243_s24 + $0x300] sm:$0xff] %vm2406_vm1, %v3845_v45  ;;  %3852 = vtanh.f32 %v1752_v44 }
 0x1a2   : > { %v3847_v46 = vpop.eup %3846 }
 0x1a3   : > { %v3849_v47 = vpop.eup %3848  ;;  %2567 = vst.msk [vmem:[%s4243_s24 + $0x500] sm:$0xff] %vm2406_vm1, %v3847_v46  ;;  %v1912_v48 = vpop.f32.mrf.mxu2  ;;  %v3454_v46 = vld [vmem:[%s4165_s20 + $0xe0] sm:$0xff] }
 0x1a4   : > { %v2072_v49 = vpop.f32.mrf.mxu3  ;;  %v3851_v52 = vpop.eup %3850  ;;  %2631 = vst.msk [vmem:[%s4243_s24 + $0x700] sm:$0xff] %vm2406_vm1, %v3849_v47  ;;  %3854 = vtanh.f32 %v1912_v48  ;;  %v3486_v47 = vld [vmem:[%s4165_s20 + $0x1e0] sm:$0xff] }
 0x1a5   : > { %v1595_v53 = vpop.f32.mrf.mxu0  ;;  %v1755_v54 = vpop.f32.mrf.mxu1  ;;  %2440 = vst.msk [vmem:[%s4243_s24 + $0x108] sm:$0xff] %vm2406_vm1, %v3851_v52  ;;  %3856 = vtanh.f32 %v2072_v49  ;;  %v3550_v52 = vld [vmem:[%s4165_s20 + $0x3e0] sm:$0xff] }
 0x1a6   : > { %v3853_v57 = vpop.eup %3852  ;;  %3858 = vtanh.f32 %v1595_v53 }
 0x1a7   : > { %2504 = vst.msk [vmem:[%s4243_s24 + $0x308] sm:$0xff] %vm2406_vm1, %v3853_v57  ;;  %3860 = vtanh.f32 %v1755_v54  ;;  %3318 = vmatmul.msk.bf16.gmra.mxu0 %vm1116_vm0, %v3451_v50  ;;  %3350 = vmatmul.msk.bf16.gmra.mxu1 %vm1116_vm0, %v3483_v51  ;;  %v3518_v51 = vld [vmem:[%s4165_s20 + $0x2e0] sm:$0xff] }
 0x1a8   : > { %3382 = vmatmul.msk.bf16.gmra.mxu2 %vm1116_vm0, %v3515_v55  ;;  %3414 = vmatmul.msk.bf16.gmra.mxu3 %vm1116_vm0, %v3547_v56 }
 0x1aa   : > { %v3855_v58 = vpop.eup %3854 }
 0x1ab   : > { %v3857_v59 = vpop.eup %3856  ;;  %2568 = vst.msk [vmem:[%s4243_s24 + $0x508] sm:$0xff] %vm2406_vm1, %v3855_v58  ;;  %v1915_v60 = vpop.f32.mrf.mxu2 }
 0x1ac   : > { %v2075_v61 = vpop.f32.mrf.mxu3  ;;  %v3859_v62 = vpop.eup %3858  ;;  %2632 = vst.msk [vmem:[%s4243_s24 + $0x708] sm:$0xff] %vm2406_vm1, %v3857_v59  ;;  %3862 = vtanh.f32 %v1915_v60 }
 0x1ad   : > { %v1597_v63 = vpop.f32.mrf.mxu0  ;;  %v1757_v0 = vpop.f32.mrf.mxu1  ;;  %2441 = vst.msk [vmem:[%s4243_s24 + $0x110] sm:$0xff] %vm2406_vm1, %v3859_v62  ;;  %3864 = vtanh.f32 %v2075_v61 }
 0x1ae   : > { %v3861_v1 = vpop.eup %3860  ;;  %3866 = vtanh.f32 %v1597_v63 }
 0x1af   : > { %2505 = vst.msk [vmem:[%s4243_s24 + $0x310] sm:$0xff] %vm2406_vm1, %v3861_v1  ;;  %3868 = vtanh.f32 %v1757_v0 }
 0x1b2   : > { %v3863_v2 = vpop.eup %3862 }
 0x1b3   : > { %v3865_v3 = vpop.eup %3864  ;;  %2569 = vst.msk [vmem:[%s4243_s24 + $0x510] sm:$0xff] %vm2406_vm1, %v3863_v2  ;;  %v1917_v4 = vpop.f32.mrf.mxu2  ;;  %v3455_v2 = vld [vmem:[%s4165_s20 + $0xe8] sm:$0xff] }
 0x1b4   : > { %v2077_v5 = vpop.f32.mrf.mxu3  ;;  %v3867_v8 = vpop.eup %3866  ;;  %2633 = vst.msk [vmem:[%s4243_s24 + $0x710] sm:$0xff] %vm2406_vm1, %v3865_v3  ;;  %3870 = vtanh.f32 %v1917_v4  ;;  %v3487_v3 = vld [vmem:[%s4165_s20 + $0x1e8] sm:$0xff] }
 0x1b5   : > { %v1600_v9 = vpop.f32.mrf.mxu0  ;;  %v1760_v10 = vpop.f32.mrf.mxu1  ;;  %2442 = vst.msk [vmem:[%s4243_s24 + $0x118] sm:$0xff] %vm2406_vm1, %v3867_v8  ;;  %3872 = vtanh.f32 %v2077_v5  ;;  %v3551_v8 = vld [vmem:[%s4165_s20 + $0x3e8] sm:$0xff] }
 0x1b6   : > { %v3869_v13 = vpop.eup %3868  ;;  %3874 = vtanh.f32 %v1600_v9 }
 0x1b7   : > { %2506 = vst.msk [vmem:[%s4243_s24 + $0x318] sm:$0xff] %vm2406_vm1, %v3869_v13  ;;  %3876 = vtanh.f32 %v1760_v10  ;;  %3319 = vmatmul.msk.bf16.gmra.mxu0 %vm1116_vm0, %v3452_v6  ;;  %3351 = vmatmul.msk.bf16.gmra.mxu1 %vm1116_vm0, %v3484_v7  ;;  %v3519_v7 = vld [vmem:[%s4165_s20 + $0x2e8] sm:$0xff] }
 0x1b8   : > { %3383 = vmatmul.msk.bf16.gmra.mxu2 %vm1116_vm0, %v3516_v11  ;;  %3415 = vmatmul.msk.bf16.gmra.mxu3 %vm1116_vm0, %v3548_v12 }
 0x1ba   : > { %v3871_v14 = vpop.eup %3870 }
 0x1bb   : > { %v3873_v15 = vpop.eup %3872  ;;  %2570 = vst.msk [vmem:[%s4243_s24 + $0x518] sm:$0xff] %vm2406_vm1, %v3871_v14  ;;  %v1920_v16 = vpop.f32.mrf.mxu2 }
 0x1bc   : > { %v2080_v17 = vpop.f32.mrf.mxu3  ;;  %v3875_v18 = vpop.eup %3874  ;;  %2634 = vst.msk [vmem:[%s4243_s24 + $0x718] sm:$0xff] %vm2406_vm1, %v3873_v15  ;;  %3878 = vtanh.f32 %v1920_v16 }
 0x1bd   : > { %v1602_v19 = vpop.f32.mrf.mxu0  ;;  %v1762_v20 = vpop.f32.mrf.mxu1  ;;  %2443 = vst.msk [vmem:[%s4243_s24 + $0x120] sm:$0xff] %vm2406_vm1, %v3875_v18  ;;  %3880 = vtanh.f32 %v2080_v17 }
 0x1be   : > { %v3877_v21 = vpop.eup %3876  ;;  %3882 = vtanh.f32 %v1602_v19 }
 0x1bf   : > { %2507 = vst.msk [vmem:[%s4243_s24 + $0x320] sm:$0xff] %vm2406_vm1, %v3877_v21  ;;  %3884 = vtanh.f32 %v1762_v20 }
 0x1c2   : > { %v3879_v22 = vpop.eup %3878 }
 0x1c3   : > { %v3881_v23 = vpop.eup %3880  ;;  %2571 = vst.msk [vmem:[%s4243_s24 + $0x520] sm:$0xff] %vm2406_vm1, %v3879_v22  ;;  %v1922_v24 = vpop.f32.mrf.mxu2  ;;  %v3456_v22 = vld [vmem:[%s4165_s20 + $0xf0] sm:$0xff] }
 0x1c4   : > { %v2082_v25 = vpop.f32.mrf.mxu3  ;;  %v3883_v28 = vpop.eup %3882  ;;  %2635 = vst.msk [vmem:[%s4243_s24 + $0x720] sm:$0xff] %vm2406_vm1, %v3881_v23  ;;  %3886 = vtanh.f32 %v1922_v24  ;;  %v3488_v23 = vld [vmem:[%s4165_s20 + $0x1f0] sm:$0xff] }
 0x1c5   : > { %v1605_v29 = vpop.f32.mrf.mxu0  ;;  %v1765_v30 = vpop.f32.mrf.mxu1  ;;  %2444 = vst.msk [vmem:[%s4243_s24 + $0x128] sm:$0xff] %vm2406_vm1, %v3883_v28  ;;  %3888 = vtanh.f32 %v2082_v25  ;;  %v3552_v28 = vld [vmem:[%s4165_s20 + $0x3f0] sm:$0xff] }
 0x1c6   : > { %v3885_v33 = vpop.eup %3884  ;;  %3890 = vtanh.f32 %v1605_v29 }
 0x1c7   : > { %2508 = vst.msk [vmem:[%s4243_s24 + $0x328] sm:$0xff] %vm2406_vm1, %v3885_v33  ;;  %3892 = vtanh.f32 %v1765_v30  ;;  %3320 = vmatmul.msk.bf16.gmra.mxu0 %vm1116_vm0, %v3453_v26  ;;  %3352 = vmatmul.msk.bf16.gmra.mxu1 %vm1116_vm0, %v3485_v27  ;;  %v3520_v27 = vld [vmem:[%s4165_s20 + $0x2f0] sm:$0xff] }
 0x1c8   : > { %3384 = vmatmul.msk.bf16.gmra.mxu2 %vm1116_vm0, %v3517_v31  ;;  %3416 = vmatmul.msk.bf16.gmra.mxu3 %vm1116_vm0, %v3549_v32 }
 0x1ca   : > { %v3887_v34 = vpop.eup %3886 }
 0x1cb   : > { %v3889_v35 = vpop.eup %3888  ;;  %2572 = vst.msk [vmem:[%s4243_s24 + $0x528] sm:$0xff] %vm2406_vm1, %v3887_v34  ;;  %v1925_v36 = vpop.f32.mrf.mxu2 }
 0x1cc   : > { %v2085_v37 = vpop.f32.mrf.mxu3  ;;  %v3891_v38 = vpop.eup %3890  ;;  %2636 = vst.msk [vmem:[%s4243_s24 + $0x728] sm:$0xff] %vm2406_vm1, %v3889_v35  ;;  %3894 = vtanh.f32 %v1925_v36 }
 0x1cd   : > { %v1607_v39 = vpop.f32.mrf.mxu0  ;;  %v1767_v40 = vpop.f32.mrf.mxu1  ;;  %2445 = vst.msk [vmem:[%s4243_s24 + $0x130] sm:$0xff] %vm2406_vm1, %v3891_v38  ;;  %3896 = vtanh.f32 %v2085_v37 }
 0x1ce   : > { %v3893_v41 = vpop.eup %3892  ;;  %3898 = vtanh.f32 %v1607_v39 }
 0x1cf   : > { %2509 = vst.msk [vmem:[%s4243_s24 + $0x330] sm:$0xff] %vm2406_vm1, %v3893_v41  ;;  %3900 = vtanh.f32 %v1767_v40 }
 0x1d2   : > { %v3895_v42 = vpop.eup %3894 }
 0x1d3   : > { %v3897_v43 = vpop.eup %3896  ;;  %2573 = vst.msk [vmem:[%s4243_s24 + $0x530] sm:$0xff] %vm2406_vm1, %v3895_v42  ;;  %v1927_v44 = vpop.f32.mrf.mxu2  ;;  %v3457_v42 = vld [vmem:[%s4165_s20 + $0xf8] sm:$0xff] }
 0x1d4   : > { %v2087_v45 = vpop.f32.mrf.mxu3  ;;  %v3899_v48 = vpop.eup %3898  ;;  %2637 = vst.msk [vmem:[%s4243_s24 + $0x730] sm:$0xff] %vm2406_vm1, %v3897_v43  ;;  %3902 = vtanh.f32 %v1927_v44  ;;  %v3489_v43 = vld [vmem:[%s4165_s20 + $0x1f8] sm:$0xff] }
 0x1d5   : > { %v1610_v49 = vpop.f32.mrf.mxu0  ;;  %v1770_v50 = vpop.f32.mrf.mxu1  ;;  %2446 = vst.msk [vmem:[%s4243_s24 + $0x138] sm:$0xff] %vm2406_vm1, %v3899_v48  ;;  %3904 = vtanh.f32 %v2087_v45  ;;  %v3553_v48 = vld [vmem:[%s4165_s20 + $0x3f8] sm:$0xff] }
 0x1d6   : > { %v3901_v53 = vpop.eup %3900  ;;  %3906 = vtanh.f32 %v1610_v49 }
 0x1d7   : > { %2510 = vst.msk [vmem:[%s4243_s24 + $0x338] sm:$0xff] %vm2406_vm1, %v3901_v53  ;;  %3908 = vtanh.f32 %v1770_v50  ;;  %3321 = vmatmul.msk.bf16.gmra.mxu0 %vm1116_vm0, %v3454_v46  ;;  %3353 = vmatmul.msk.bf16.gmra.mxu1 %vm1116_vm0, %v3486_v47  ;;  %v3521_v47 = vld [vmem:[%s4165_s20 + $0x2f8] sm:$0xff] }
 0x1d8   : > { %3385 = vmatmul.msk.bf16.gmra.mxu2 %vm1116_vm0, %v3518_v51  ;;  %3417 = vmatmul.msk.bf16.gmra.mxu3 %vm1116_vm0, %v3550_v52 }
 0x1da   : > { %v3903_v54 = vpop.eup %3902 }
 0x1db   : > { %v3905_v55 = vpop.eup %3904  ;;  %2574 = vst.msk [vmem:[%s4243_s24 + $0x538] sm:$0xff] %vm2406_vm1, %v3903_v54  ;;  %v1930_v56 = vpop.f32.mrf.mxu2 }
 0x1dc   : > { %v2090_v57 = vpop.f32.mrf.mxu3  ;;  %v3907_v58 = vpop.eup %3906  ;;  %2638 = vst.msk [vmem:[%s4243_s24 + $0x738] sm:$0xff] %vm2406_vm1, %v3905_v55  ;;  %3910 = vtanh.f32 %v1930_v56 }
 0x1dd   : > { %v1612_v59 = vpop.f32.mrf.mxu0  ;;  %v1772_v60 = vpop.f32.mrf.mxu1  ;;  %2447 = vst.msk [vmem:[%s4243_s24 + $0x140] sm:$0xff] %vm2406_vm1, %v3907_v58  ;;  %3912 = vtanh.f32 %v2090_v57 }
 0x1de   : > { %v3909_v61 = vpop.eup %3908  ;;  %3914 = vtanh.f32 %v1612_v59 }
 0x1df   : > { %2511 = vst.msk [vmem:[%s4243_s24 + $0x340] sm:$0xff] %vm2406_vm1, %v3909_v61  ;;  %3916 = vtanh.f32 %v1772_v60 }
 0x1e2   : > { %v3911_v62 = vpop.eup %3910 }
 0x1e3   : > { %v3913_v63 = vpop.eup %3912  ;;  %2575 = vst.msk [vmem:[%s4243_s24 + $0x540] sm:$0xff] %vm2406_vm1, %v3911_v62  ;;  %v1932_v0 = vpop.f32.mrf.mxu2 }
 0x1e4   : > { %v2092_v1 = vpop.f32.mrf.mxu3  ;;  %v3915_v4 = vpop.eup %3914  ;;  %2639 = vst.msk [vmem:[%s4243_s24 + $0x740] sm:$0xff] %vm2406_vm1, %v3913_v63  ;;  %3918 = vtanh.f32 %v1932_v0 }
 0x1e5   : > { %v1615_v5 = vpop.f32.mrf.mxu0  ;;  %v1775_v6 = vpop.f32.mrf.mxu1  ;;  %2448 = vst.msk [vmem:[%s4243_s24 + $0x148] sm:$0xff] %vm2406_vm1, %v3915_v4  ;;  %3920 = vtanh.f32 %v2092_v1 }
 0x1e6   : > { %v3917_v9 = vpop.eup %3916  ;;  %3922 = vtanh.f32 %v1615_v5 }
 0x1e7   : > { %2512 = vst.msk [vmem:[%s4243_s24 + $0x348] sm:$0xff] %vm2406_vm1, %v3917_v9  ;;  %3924 = vtanh.f32 %v1775_v6  ;;  %3322 = vmatmul.msk.bf16.gmra.mxu0 %vm1116_vm0, %v3455_v2  ;;  %3354 = vmatmul.msk.bf16.gmra.mxu1 %vm1116_vm0, %v3487_v3 }
 0x1e8   : > { %3386 = vmatmul.msk.bf16.gmra.mxu2 %vm1116_vm0, %v3519_v7  ;;  %3418 = vmatmul.msk.bf16.gmra.mxu3 %vm1116_vm0, %v3551_v8 }
 0x1ea   : > { %v3919_v10 = vpop.eup %3918 }
 0x1eb   : > { %v3921_v11 = vpop.eup %3920  ;;  %2576 = vst.msk [vmem:[%s4243_s24 + $0x548] sm:$0xff] %vm2406_vm1, %v3919_v10  ;;  %v1935_v12 = vpop.f32.mrf.mxu2 }
 0x1ec   : > { %v2095_v13 = vpop.f32.mrf.mxu3  ;;  %v3923_v14 = vpop.eup %3922  ;;  %2640 = vst.msk [vmem:[%s4243_s24 + $0x748] sm:$0xff] %vm2406_vm1, %v3921_v11  ;;  %3926 = vtanh.f32 %v1935_v12 }
 0x1ed   : > { %v1617_v15 = vpop.f32.mrf.mxu0  ;;  %v1777_v16 = vpop.f32.mrf.mxu1  ;;  %2449 = vst.msk [vmem:[%s4243_s24 + $0x150] sm:$0xff] %vm2406_vm1, %v3923_v14  ;;  %3928 = vtanh.f32 %v2095_v13 }
 0x1ee   : > { %v3925_v17 = vpop.eup %3924  ;;  %3930 = vtanh.f32 %v1617_v15 }
 0x1ef   : > { %2513 = vst.msk [vmem:[%s4243_s24 + $0x350] sm:$0xff] %vm2406_vm1, %v3925_v17  ;;  %3932 = vtanh.f32 %v1777_v16 }
 0x1f2   : > { %v3927_v18 = vpop.eup %3926 }
 0x1f3   : > { %v3929_v19 = vpop.eup %3928  ;;  %2577 = vst.msk [vmem:[%s4243_s24 + $0x550] sm:$0xff] %vm2406_vm1, %v3927_v18  ;;  %v1937_v20 = vpop.f32.mrf.mxu2 }
 0x1f4   : > { %v2097_v21 = vpop.f32.mrf.mxu3  ;;  %v3931_v24 = vpop.eup %3930  ;;  %2641 = vst.msk [vmem:[%s4243_s24 + $0x750] sm:$0xff] %vm2406_vm1, %v3929_v19  ;;  %3934 = vtanh.f32 %v1937_v20 }
 0x1f5   : > { %v1620_v25 = vpop.f32.mrf.mxu0  ;;  %v1780_v26 = vpop.f32.mrf.mxu1  ;;  %2450 = vst.msk [vmem:[%s4243_s24 + $0x158] sm:$0xff] %vm2406_vm1, %v3931_v24  ;;  %3936 = vtanh.f32 %v2097_v21 }
 0x1f6   : > { %v3933_v29 = vpop.eup %3932  ;;  %3938 = vtanh.f32 %v1620_v25 }
 0x1f7   : > { %2514 = vst.msk [vmem:[%s4243_s24 + $0x358] sm:$0xff] %vm2406_vm1, %v3933_v29  ;;  %3940 = vtanh.f32 %v1780_v26  ;;  %3323 = vmatmul.msk.bf16.gmra.mxu0 %vm1116_vm0, %v3456_v22  ;;  %3355 = vmatmul.msk.bf16.gmra.mxu1 %vm1116_vm0, %v3488_v23 }
 0x1f8   : > { %3387 = vmatmul.msk.bf16.gmra.mxu2 %vm1116_vm0, %v3520_v27  ;;  %3419 = vmatmul.msk.bf16.gmra.mxu3 %vm1116_vm0, %v3552_v28 }
 0x1fa   : > { %v3935_v30 = vpop.eup %3934 }
 0x1fb   : > { %v3937_v31 = vpop.eup %3936  ;;  %2578 = vst.msk [vmem:[%s4243_s24 + $0x558] sm:$0xff] %vm2406_vm1, %v3935_v30  ;;  %v1940_v32 = vpop.f32.mrf.mxu2 }
 0x1fc   : > { %v2100_v33 = vpop.f32.mrf.mxu3  ;;  %v3939_v34 = vpop.eup %3938  ;;  %2642 = vst.msk [vmem:[%s4243_s24 + $0x758] sm:$0xff] %vm2406_vm1, %v3937_v31  ;;  %3942 = vtanh.f32 %v1940_v32 }
 0x1fd   : > { %v1622_v35 = vpop.f32.mrf.mxu0  ;;  %v1782_v36 = vpop.f32.mrf.mxu1  ;;  %2451 = vst.msk [vmem:[%s4243_s24 + $0x160] sm:$0xff] %vm2406_vm1, %v3939_v34  ;;  %3944 = vtanh.f32 %v2100_v33 }
 0x1fe   : > { %v3941_v37 = vpop.eup %3940  ;;  %3946 = vtanh.f32 %v1622_v35 }
 0x1ff   : > { %2515 = vst.msk [vmem:[%s4243_s24 + $0x360] sm:$0xff] %vm2406_vm1, %v3941_v37  ;;  %3948 = vtanh.f32 %v1782_v36 }
 0x202   : > { %v3943_v38 = vpop.eup %3942 }
 0x203   : > { %v3945_v39 = vpop.eup %3944  ;;  %2579 = vst.msk [vmem:[%s4243_s24 + $0x560] sm:$0xff] %vm2406_vm1, %v3943_v38  ;;  %v1942_v40 = vpop.f32.mrf.mxu2 }
 0x204   : > { %v2102_v41 = vpop.f32.mrf.mxu3  ;;  %v3947_v44 = vpop.eup %3946  ;;  %2643 = vst.msk [vmem:[%s4243_s24 + $0x760] sm:$0xff] %vm2406_vm1, %v3945_v39  ;;  %3950 = vtanh.f32 %v1942_v40 }
 0x205   : > { %v1625_v45 = vpop.f32.mrf.mxu0  ;;  %v1785_v46 = vpop.f32.mrf.mxu1  ;;  %2452 = vst.msk [vmem:[%s4243_s24 + $0x168] sm:$0xff] %vm2406_vm1, %v3947_v44  ;;  %3952 = vtanh.f32 %v2102_v41 }
 0x206   : > { %v3949_v49 = vpop.eup %3948  ;;  %3954 = vtanh.f32 %v1625_v45 }
 0x207   : > { %2516 = vst.msk [vmem:[%s4243_s24 + $0x368] sm:$0xff] %vm2406_vm1, %v3949_v49  ;;  %3956 = vtanh.f32 %v1785_v46  ;;  %3324 = vmatmul.msk.bf16.gmra.mxu0 %vm1116_vm0, %v3457_v42  ;;  %3356 = vmatmul.msk.bf16.gmra.mxu1 %vm1116_vm0, %v3489_v43 }
 0x208   : > { %3388 = vmatmul.msk.bf16.gmra.mxu2 %vm1116_vm0, %v3521_v47  ;;  %3420 = vmatmul.msk.bf16.gmra.mxu3 %vm1116_vm0, %v3553_v48 }
 0x20a   : > { %v3951_v50 = vpop.eup %3950 }
 0x20b   : > { %v3953_v51 = vpop.eup %3952  ;;  %2580 = vst.msk [vmem:[%s4243_s24 + $0x568] sm:$0xff] %vm2406_vm1, %v3951_v50  ;;  %v1945_v52 = vpop.f32.mrf.mxu2 }
 0x20c   : > { %v2105_v53 = vpop.f32.mrf.mxu3  ;;  %v3955_v54 = vpop.eup %3954  ;;  %2644 = vst.msk [vmem:[%s4243_s24 + $0x768] sm:$0xff] %vm2406_vm1, %v3953_v51  ;;  %3958 = vtanh.f32 %v1945_v52 }
 0x20d   : > { %v1627_v55 = vpop.f32.mrf.mxu0  ;;  %v1787_v56 = vpop.f32.mrf.mxu1  ;;  %2453 = vst.msk [vmem:[%s4243_s24 + $0x170] sm:$0xff] %vm2406_vm1, %v3955_v54  ;;  %3960 = vtanh.f32 %v2105_v53 }
 0x20e   : > { %v3957_v57 = vpop.eup %3956  ;;  %3962 = vtanh.f32 %v1627_v55 }
 0x20f   : > { %2517 = vst.msk [vmem:[%s4243_s24 + $0x370] sm:$0xff] %vm2406_vm1, %v3957_v57  ;;  %3964 = vtanh.f32 %v1787_v56 }
 0x212   : > { %v3959_v58 = vpop.eup %3958 }
 0x213   : > { %v3961_v59 = vpop.eup %3960  ;;  %2581 = vst.msk [vmem:[%s4243_s24 + $0x570] sm:$0xff] %vm2406_vm1, %v3959_v58  ;;  %v1947_v60 = vpop.f32.mrf.mxu2 }
 0x214   : > { %v2107_v61 = vpop.f32.mrf.mxu3  ;;  %v3963_v62 = vpop.eup %3962  ;;  %2645 = vst.msk [vmem:[%s4243_s24 + $0x770] sm:$0xff] %vm2406_vm1, %v3961_v59  ;;  %3966 = vtanh.f32 %v1947_v60 }
 0x215   : > { %v1630_v63 = vpop.f32.mrf.mxu0  ;;  %v1790_v0 = vpop.f32.mrf.mxu1  ;;  %2454 = vst.msk [vmem:[%s4243_s24 + $0x178] sm:$0xff] %vm2406_vm1, %v3963_v62  ;;  %3968 = vtanh.f32 %v2107_v61 }
 0x216   : > { %v3965_v1 = vpop.eup %3964  ;;  %3970 = vtanh.f32 %v1630_v63 }
 0x217   : > { %2518 = vst.msk [vmem:[%s4243_s24 + $0x378] sm:$0xff] %vm2406_vm1, %v3965_v1  ;;  %3972 = vtanh.f32 %v1790_v0 }
 0x21a   : > { %v3967_v2 = vpop.eup %3966 }
 0x21b   : > { %v3969_v3 = vpop.eup %3968  ;;  %2582 = vst.msk [vmem:[%s4243_s24 + $0x578] sm:$0xff] %vm2406_vm1, %v3967_v2  ;;  %v1950_v4 = vpop.f32.mrf.mxu2 }
 0x21c   : > { %v2110_v5 = vpop.f32.mrf.mxu3  ;;  %v3971_v6 = vpop.eup %3970  ;;  %2646 = vst.msk [vmem:[%s4243_s24 + $0x778] sm:$0xff] %vm2406_vm1, %v3969_v3  ;;  %3974 = vtanh.f32 %v1950_v4 }
 0x21d   : > { %v1632_v7 = vpop.f32.mrf.mxu0  ;;  %v1792_v8 = vpop.f32.mrf.mxu1  ;;  %2455 = vst.msk [vmem:[%s4243_s24 + $0x180] sm:$0xff] %vm2406_vm1, %v3971_v6  ;;  %3976 = vtanh.f32 %v2110_v5 }
 0x21e   : > { %v3973_v9 = vpop.eup %3972  ;;  %3978 = vtanh.f32 %v1632_v7 }
 0x21f   : > { %2519 = vst.msk [vmem:[%s4243_s24 + $0x380] sm:$0xff] %vm2406_vm1, %v3973_v9  ;;  %3980 = vtanh.f32 %v1792_v8 }
 0x222   : > { %v3975_v10 = vpop.eup %3974 }
 0x223   : > { %v3977_v11 = vpop.eup %3976  ;;  %2583 = vst.msk [vmem:[%s4243_s24 + $0x580] sm:$0xff] %vm2406_vm1, %v3975_v10  ;;  %v1952_v12 = vpop.f32.mrf.mxu2 }
 0x224   : > { %v2112_v13 = vpop.f32.mrf.mxu3  ;;  %v3979_v14 = vpop.eup %3978  ;;  %2647 = vst.msk [vmem:[%s4243_s24 + $0x780] sm:$0xff] %vm2406_vm1, %v3977_v11  ;;  %3982 = vtanh.f32 %v1952_v12 }
 0x225   : > { %v1635_v15 = vpop.f32.mrf.mxu0  ;;  %v1795_v16 = vpop.f32.mrf.mxu1  ;;  %2456 = vst.msk [vmem:[%s4243_s24 + $0x188] sm:$0xff] %vm2406_vm1, %v3979_v14  ;;  %3984 = vtanh.f32 %v2112_v13 }
 0x226   : > { %v3981_v17 = vpop.eup %3980  ;;  %3986 = vtanh.f32 %v1635_v15 }
 0x227   : > { %2520 = vst.msk [vmem:[%s4243_s24 + $0x388] sm:$0xff] %vm2406_vm1, %v3981_v17  ;;  %3988 = vtanh.f32 %v1795_v16 }
 0x22a   : > { %v3983_v18 = vpop.eup %3982 }
 0x22b   : > { %v3985_v19 = vpop.eup %3984  ;;  %2584 = vst.msk [vmem:[%s4243_s24 + $0x588] sm:$0xff] %vm2406_vm1, %v3983_v18  ;;  %v1955_v20 = vpop.f32.mrf.mxu2 }
 0x22c   : > { %v2115_v21 = vpop.f32.mrf.mxu3  ;;  %v3987_v22 = vpop.eup %3986  ;;  %2648 = vst.msk [vmem:[%s4243_s24 + $0x788] sm:$0xff] %vm2406_vm1, %v3985_v19  ;;  %3990 = vtanh.f32 %v1955_v20 }
 0x22d   : > { %v1637_v23 = vpop.f32.mrf.mxu0  ;;  %v1797_v24 = vpop.f32.mrf.mxu1  ;;  %2457 = vst.msk [vmem:[%s4243_s24 + $0x190] sm:$0xff] %vm2406_vm1, %v3987_v22  ;;  %3992 = vtanh.f32 %v2115_v21 }
 0x22e   : > { %v3989_v25 = vpop.eup %3988  ;;  %3994 = vtanh.f32 %v1637_v23 }
 0x22f   : > { %2521 = vst.msk [vmem:[%s4243_s24 + $0x390] sm:$0xff] %vm2406_vm1, %v3989_v25  ;;  %3996 = vtanh.f32 %v1797_v24 }
 0x232   : > { %v3991_v26 = vpop.eup %3990 }
 0x233   : > { %v3993_v27 = vpop.eup %3992  ;;  %2585 = vst.msk [vmem:[%s4243_s24 + $0x590] sm:$0xff] %vm2406_vm1, %v3991_v26  ;;  %v1957_v28 = vpop.f32.mrf.mxu2 }
 0x234   : > { %v2117_v29 = vpop.f32.mrf.mxu3  ;;  %v3995_v30 = vpop.eup %3994  ;;  %2649 = vst.msk [vmem:[%s4243_s24 + $0x790] sm:$0xff] %vm2406_vm1, %v3993_v27  ;;  %3998 = vtanh.f32 %v1957_v28 }
 0x235   : > { %v1640_v31 = vpop.f32.mrf.mxu0  ;;  %v1800_v32 = vpop.f32.mrf.mxu1  ;;  %2458 = vst.msk [vmem:[%s4243_s24 + $0x198] sm:$0xff] %vm2406_vm1, %v3995_v30  ;;  %4000 = vtanh.f32 %v2117_v29 }
 0x236   : > { %v3997_v33 = vpop.eup %3996  ;;  %4002 = vtanh.f32 %v1640_v31 }
 0x237   : > { %2522 = vst.msk [vmem:[%s4243_s24 + $0x398] sm:$0xff] %vm2406_vm1, %v3997_v33  ;;  %4004 = vtanh.f32 %v1800_v32 }
 0x23a   : > { %v3999_v34 = vpop.eup %3998 }
 0x23b   : > { %v4001_v35 = vpop.eup %4000  ;;  %2586 = vst.msk [vmem:[%s4243_s24 + $0x598] sm:$0xff] %vm2406_vm1, %v3999_v34  ;;  %v1960_v36 = vpop.f32.mrf.mxu2 }
 0x23c   : > { %v2120_v37 = vpop.f32.mrf.mxu3  ;;  %v4003_v38 = vpop.eup %4002  ;;  %2650 = vst.msk [vmem:[%s4243_s24 + $0x798] sm:$0xff] %vm2406_vm1, %v4001_v35  ;;  %4006 = vtanh.f32 %v1960_v36 }
 0x23d   : > { %v1642_v39 = vpop.f32.mrf.mxu0  ;;  %v1802_v40 = vpop.f32.mrf.mxu1  ;;  %2459 = vst.msk [vmem:[%s4243_s24 + $0x1a0] sm:$0xff] %vm2406_vm1, %v4003_v38  ;;  %4008 = vtanh.f32 %v2120_v37 }
 0x23e   : > { %v4005_v41 = vpop.eup %4004  ;;  %4010 = vtanh.f32 %v1642_v39 }
 0x23f   : > { %2523 = vst.msk [vmem:[%s4243_s24 + $0x3a0] sm:$0xff] %vm2406_vm1, %v4005_v41  ;;  %4012 = vtanh.f32 %v1802_v40 }
 0x242   : > { %v4007_v42 = vpop.eup %4006 }
 0x243   : > { %v4009_v43 = vpop.eup %4008  ;;  %2587 = vst.msk [vmem:[%s4243_s24 + $0x5a0] sm:$0xff] %vm2406_vm1, %v4007_v42  ;;  %v1962_v44 = vpop.f32.mrf.mxu2 }
 0x244   : > { %v2122_v45 = vpop.f32.mrf.mxu3  ;;  %v4011_v46 = vpop.eup %4010  ;;  %2651 = vst.msk [vmem:[%s4243_s24 + $0x7a0] sm:$0xff] %vm2406_vm1, %v4009_v43  ;;  %4014 = vtanh.f32 %v1962_v44 }
 0x245   : > { %v1645_v47 = vpop.f32.mrf.mxu0  ;;  %v1805_v48 = vpop.f32.mrf.mxu1  ;;  %2460 = vst.msk [vmem:[%s4243_s24 + $0x1a8] sm:$0xff] %vm2406_vm1, %v4011_v46  ;;  %4016 = vtanh.f32 %v2122_v45 }
 0x246   : > { %v4013_v49 = vpop.eup %4012  ;;  %4018 = vtanh.f32 %v1645_v47 }
 0x247   : > { %2524 = vst.msk [vmem:[%s4243_s24 + $0x3a8] sm:$0xff] %vm2406_vm1, %v4013_v49  ;;  %4020 = vtanh.f32 %v1805_v48 }
 0x24a   : > { %v4015_v50 = vpop.eup %4014 }
 0x24b   : > { %v4017_v51 = vpop.eup %4016  ;;  %2588 = vst.msk [vmem:[%s4243_s24 + $0x5a8] sm:$0xff] %vm2406_vm1, %v4015_v50  ;;  %v1965_v52 = vpop.f32.mrf.mxu2 }
 0x24c   : > { %v2125_v53 = vpop.f32.mrf.mxu3  ;;  %v4019_v54 = vpop.eup %4018  ;;  %2652 = vst.msk [vmem:[%s4243_s24 + $0x7a8] sm:$0xff] %vm2406_vm1, %v4017_v51  ;;  %4022 = vtanh.f32 %v1965_v52 }
 0x24d   : > { %v1647_v55 = vpop.f32.mrf.mxu0  ;;  %v1807_v56 = vpop.f32.mrf.mxu1  ;;  %2461 = vst.msk [vmem:[%s4243_s24 + $0x1b0] sm:$0xff] %vm2406_vm1, %v4019_v54  ;;  %4024 = vtanh.f32 %v2125_v53 }
 0x24e   : > { %v4021_v57 = vpop.eup %4020  ;;  %4026 = vtanh.f32 %v1647_v55 }
 0x24f   : > { %2525 = vst.msk [vmem:[%s4243_s24 + $0x3b0] sm:$0xff] %vm2406_vm1, %v4021_v57  ;;  %4028 = vtanh.f32 %v1807_v56 }
 0x252   : > { %v4023_v58 = vpop.eup %4022 }
 0x253   : > { %v4025_v59 = vpop.eup %4024  ;;  %2589 = vst.msk [vmem:[%s4243_s24 + $0x5b0] sm:$0xff] %vm2406_vm1, %v4023_v58  ;;  %v1967_v60 = vpop.f32.mrf.mxu2 }
 0x254   : > { %v2127_v61 = vpop.f32.mrf.mxu3  ;;  %v4027_v62 = vpop.eup %4026  ;;  %2653 = vst.msk [vmem:[%s4243_s24 + $0x7b0] sm:$0xff] %vm2406_vm1, %v4025_v59  ;;  %4030 = vtanh.f32 %v1967_v60 }
 0x255   : > { %v1650_v63 = vpop.f32.mrf.mxu0  ;;  %v1810_v0 = vpop.f32.mrf.mxu1  ;;  %2462 = vst.msk [vmem:[%s4243_s24 + $0x1b8] sm:$0xff] %vm2406_vm1, %v4027_v62  ;;  %4032 = vtanh.f32 %v2127_v61 }
 0x256   : > { %v4029_v1 = vpop.eup %4028  ;;  %4034 = vtanh.f32 %v1650_v63 }
 0x257   : > { %2526 = vst.msk [vmem:[%s4243_s24 + $0x3b8] sm:$0xff] %vm2406_vm1, %v4029_v1  ;;  %4036 = vtanh.f32 %v1810_v0 }
 0x25a   : > { %v4031_v2 = vpop.eup %4030 }
 0x25b   : > { %v4033_v3 = vpop.eup %4032  ;;  %2590 = vst.msk [vmem:[%s4243_s24 + $0x5b8] sm:$0xff] %vm2406_vm1, %v4031_v2  ;;  %v1970_v4 = vpop.f32.mrf.mxu2 }
 0x25c   : > { %v2130_v5 = vpop.f32.mrf.mxu3  ;;  %v4035_v6 = vpop.eup %4034  ;;  %2654 = vst.msk [vmem:[%s4243_s24 + $0x7b8] sm:$0xff] %vm2406_vm1, %v4033_v3  ;;  %4038 = vtanh.f32 %v1970_v4 }
 0x25d   : > { %v1652_v7 = vpop.f32.mrf.mxu0  ;;  %v1812_v8 = vpop.f32.mrf.mxu1  ;;  %2463 = vst.msk [vmem:[%s4243_s24 + $0x1c0] sm:$0xff] %vm2406_vm1, %v4035_v6  ;;  %4040 = vtanh.f32 %v2130_v5 }
 0x25e   : > { %v4037_v9 = vpop.eup %4036  ;;  %4042 = vtanh.f32 %v1652_v7 }
 0x25f   : > { %2527 = vst.msk [vmem:[%s4243_s24 + $0x3c0] sm:$0xff] %vm2406_vm1, %v4037_v9  ;;  %4044 = vtanh.f32 %v1812_v8 }
 0x262   : > { %v4039_v10 = vpop.eup %4038 }
 0x263   : > { %v4041_v11 = vpop.eup %4040  ;;  %2591 = vst.msk [vmem:[%s4243_s24 + $0x5c0] sm:$0xff] %vm2406_vm1, %v4039_v10  ;;  %v1972_v12 = vpop.f32.mrf.mxu2 }
 0x264   : > { %v2132_v13 = vpop.f32.mrf.mxu3  ;;  %v4043_v14 = vpop.eup %4042  ;;  %2655 = vst.msk [vmem:[%s4243_s24 + $0x7c0] sm:$0xff] %vm2406_vm1, %v4041_v11  ;;  %4046 = vtanh.f32 %v1972_v12 }
 0x265   : > { %v1655_v15 = vpop.f32.mrf.mxu0  ;;  %v1815_v16 = vpop.f32.mrf.mxu1  ;;  %2464 = vst.msk [vmem:[%s4243_s24 + $0x1c8] sm:$0xff] %vm2406_vm1, %v4043_v14  ;;  %4048 = vtanh.f32 %v2132_v13 }
 0x266   : > { %v4045_v17 = vpop.eup %4044  ;;  %4050 = vtanh.f32 %v1655_v15 }
 0x267   : > { %2528 = vst.msk [vmem:[%s4243_s24 + $0x3c8] sm:$0xff] %vm2406_vm1, %v4045_v17  ;;  %4052 = vtanh.f32 %v1815_v16 }
 0x26a   : > { %v4047_v18 = vpop.eup %4046 }
 0x26b   : > { %v4049_v19 = vpop.eup %4048  ;;  %2592 = vst.msk [vmem:[%s4243_s24 + $0x5c8] sm:$0xff] %vm2406_vm1, %v4047_v18  ;;  %v1975_v20 = vpop.f32.mrf.mxu2 }
 0x26c   : > { %v2135_v21 = vpop.f32.mrf.mxu3  ;;  %v4051_v22 = vpop.eup %4050  ;;  %2656 = vst.msk [vmem:[%s4243_s24 + $0x7c8] sm:$0xff] %vm2406_vm1, %v4049_v19  ;;  %4054 = vtanh.f32 %v1975_v20 }
 0x26d   : > { %v1657_v23 = vpop.f32.mrf.mxu0  ;;  %v1817_v24 = vpop.f32.mrf.mxu1  ;;  %2465 = vst.msk [vmem:[%s4243_s24 + $0x1d0] sm:$0xff] %vm2406_vm1, %v4051_v22  ;;  %4056 = vtanh.f32 %v2135_v21 }
 0x26e   : > { %v4053_v25 = vpop.eup %4052  ;;  %4058 = vtanh.f32 %v1657_v23 }
 0x26f   : > { %2529 = vst.msk [vmem:[%s4243_s24 + $0x3d0] sm:$0xff] %vm2406_vm1, %v4053_v25  ;;  %4060 = vtanh.f32 %v1817_v24 }
 0x272   : > { %v4055_v26 = vpop.eup %4054 }
 0x273   : > { %v4057_v27 = vpop.eup %4056  ;;  %2593 = vst.msk [vmem:[%s4243_s24 + $0x5d0] sm:$0xff] %vm2406_vm1, %v4055_v26  ;;  %v1977_v28 = vpop.f32.mrf.mxu2 }
 0x274   : > { %v2137_v29 = vpop.f32.mrf.mxu3  ;;  %v4059_v30 = vpop.eup %4058  ;;  %2657 = vst.msk [vmem:[%s4243_s24 + $0x7d0] sm:$0xff] %vm2406_vm1, %v4057_v27  ;;  %4062 = vtanh.f32 %v1977_v28 }
 0x275   : > { %v1660_v31 = vpop.f32.mrf.mxu0  ;;  %v1820_v32 = vpop.f32.mrf.mxu1  ;;  %2466 = vst.msk [vmem:[%s4243_s24 + $0x1d8] sm:$0xff] %vm2406_vm1, %v4059_v30  ;;  %4064 = vtanh.f32 %v2137_v29 }
 0x276   : > { %v4061_v33 = vpop.eup %4060  ;;  %4066 = vtanh.f32 %v1660_v31 }
 0x277   : > { %2530 = vst.msk [vmem:[%s4243_s24 + $0x3d8] sm:$0xff] %vm2406_vm1, %v4061_v33  ;;  %4068 = vtanh.f32 %v1820_v32 }
 0x27a   : > { %v4063_v34 = vpop.eup %4062 }
 0x27b   : > { %v4065_v35 = vpop.eup %4064  ;;  %2594 = vst.msk [vmem:[%s4243_s24 + $0x5d8] sm:$0xff] %vm2406_vm1, %v4063_v34  ;;  %v1980_v36 = vpop.f32.mrf.mxu2 }
 0x27c   : > { %v2140_v37 = vpop.f32.mrf.mxu3  ;;  %v4067_v38 = vpop.eup %4066  ;;  %2658 = vst.msk [vmem:[%s4243_s24 + $0x7d8] sm:$0xff] %vm2406_vm1, %v4065_v35  ;;  %4070 = vtanh.f32 %v1980_v36 }
 0x27d   : > { %v1662_v39 = vpop.f32.mrf.mxu0  ;;  %v1822_v40 = vpop.f32.mrf.mxu1  ;;  %2467 = vst.msk [vmem:[%s4243_s24 + $0x1e0] sm:$0xff] %vm2406_vm1, %v4067_v38  ;;  %4072 = vtanh.f32 %v2140_v37 }
 0x27e   : > { %v4069_v41 = vpop.eup %4068  ;;  %4074 = vtanh.f32 %v1662_v39 }
 0x27f   : > { %2531 = vst.msk [vmem:[%s4243_s24 + $0x3e0] sm:$0xff] %vm2406_vm1, %v4069_v41  ;;  %4076 = vtanh.f32 %v1822_v40 }
 0x282   : > { %v4071_v42 = vpop.eup %4070 }
 0x283   : > { %v4073_v43 = vpop.eup %4072  ;;  %2595 = vst.msk [vmem:[%s4243_s24 + $0x5e0] sm:$0xff] %vm2406_vm1, %v4071_v42  ;;  %v1982_v44 = vpop.f32.mrf.mxu2 }
 0x284   : > { %v2142_v45 = vpop.f32.mrf.mxu3  ;;  %v4075_v46 = vpop.eup %4074  ;;  %2659 = vst.msk [vmem:[%s4243_s24 + $0x7e0] sm:$0xff] %vm2406_vm1, %v4073_v43  ;;  %4078 = vtanh.f32 %v1982_v44 }
 0x285   : > { %v1665_v47 = vpop.f32.mrf.mxu0  ;;  %v1825_v48 = vpop.f32.mrf.mxu1  ;;  %2468 = vst.msk [vmem:[%s4243_s24 + $0x1e8] sm:$0xff] %vm2406_vm1, %v4075_v46  ;;  %4080 = vtanh.f32 %v2142_v45 }
 0x286   : > { %v4077_v49 = vpop.eup %4076  ;;  %4082 = vtanh.f32 %v1665_v47 }
 0x287   : > { %2532 = vst.msk [vmem:[%s4243_s24 + $0x3e8] sm:$0xff] %vm2406_vm1, %v4077_v49  ;;  %4084 = vtanh.f32 %v1825_v48 }
 0x28a   : > { %v4079_v50 = vpop.eup %4078 }
 0x28b   : > { %v4081_v51 = vpop.eup %4080  ;;  %2596 = vst.msk [vmem:[%s4243_s24 + $0x5e8] sm:$0xff] %vm2406_vm1, %v4079_v50  ;;  %v1985_v52 = vpop.f32.mrf.mxu2 }
 0x28c   : > { %v2145_v53 = vpop.f32.mrf.mxu3  ;;  %v4083_v54 = vpop.eup %4082  ;;  %2660 = vst.msk [vmem:[%s4243_s24 + $0x7e8] sm:$0xff] %vm2406_vm1, %v4081_v51  ;;  %4086 = vtanh.f32 %v1985_v52 }
 0x28d   : > { %v1667_v55 = vpop.f32.mrf.mxu0  ;;  %v1827_v56 = vpop.f32.mrf.mxu1  ;;  %2469 = vst.msk [vmem:[%s4243_s24 + $0x1f0] sm:$0xff] %vm2406_vm1, %v4083_v54  ;;  %4088 = vtanh.f32 %v2145_v53 }
 0x28e   : > { %v4085_v57 = vpop.eup %4084  ;;  %4090 = vtanh.f32 %v1667_v55 }
 0x28f   : > { %2533 = vst.msk [vmem:[%s4243_s24 + $0x3f0] sm:$0xff] %vm2406_vm1, %v4085_v57  ;;  %4092 = vtanh.f32 %v1827_v56 }
 0x292   : > { %v4087_v58 = vpop.eup %4086 }
 0x293   : > { %v4089_v59 = vpop.eup %4088  ;;  %2597 = vst.msk [vmem:[%s4243_s24 + $0x5f0] sm:$0xff] %vm2406_vm1, %v4087_v58  ;;  %v1987_v60 = vpop.f32.mrf.mxu2 }
 0x294   : > { %v2147_v61 = vpop.f32.mrf.mxu3  ;;  %v4091_v62 = vpop.eup %4090  ;;  %2661 = vst.msk [vmem:[%s4243_s24 + $0x7f0] sm:$0xff] %vm2406_vm1, %v4089_v59  ;;  %4094 = vtanh.f32 %v1987_v60 }
 0x295   : > { %v4093_v63 = vpop.eup %4092  ;;  %2470 = vst.msk [vmem:[%s4243_s24 + $0x1f8] sm:$0xff] %vm2406_vm1, %v4091_v62  ;;  %4096 = vtanh.f32 %v2147_v61 }
 0x296   : > { %2534 = vst.msk [vmem:[%s4243_s24 + $0x3f8] sm:$0xff] %vm2406_vm1, %v4093_v63 }
 0x29a   : > { %v4095_v0 = vpop.eup %4094 }
 0x29b   : > { %v4097_v1 = vpop.eup %4096  ;;  %2598 = vst.msk [vmem:[%s4243_s24 + $0x5f8] sm:$0xff] %vm2406_vm1, %v4095_v0 }
 0x29c   : > { %2662 = vst.msk [vmem:[%s4243_s24 + $0x7f8] sm:$0xff] %vm2406_vm1, %v4097_v1 }
 0x29d PF: > { %s12_s11 = sadd.s32 1, %s4120_s11   ;;  %s4953_s9 = smov %s4116_s10 }
 0x29e   : > { %p9_p5 = scmp.ge.s32.totalorder %s12_s11, 6   ;;  %s4954_s10 = smov %s4956_s12 }
 0x2a0   :  { %11 = sbr.rel (!%p9_p5) target bundleno = 2 (0x2), region = 61 }

</bundles_post_ra>
